<compile_context>
chip_gen: v7x
topology: tpu7x:2x2x1
jax: 0.10.0
libtpu: 0.0.40
codegen_flags: <defaults>
</compile_context>

<pallas_src>
import functools

import jax
import jax.numpy as jnp
import numpy as np
from jax.experimental import pallas as pl
from jax.experimental.pallas import tpu as pltpu

NHEAD = 4
FF_DIM = 2048       # nn.TransformerEncoderLayer default dim_feedforward
LN_EPS = 1e-5       # nn.LayerNorm default

# Order of per-layer weight refs handed to the kernel.
LAYER_KEYS = ("wq", "wk", "wv", "bq", "bk", "bv", "wo", "bo",
              "w1", "b1", "w2", "b2", "ln1_g", "ln1_b", "ln2_g", "ln2_b")


# ----------------------------------------------------------------------------
# helpers
# ----------------------------------------------------------------------------
def _full_block(a):
    """Full-array (untiled) block; constant index map -> stays resident in VMEM
    across grid steps (weights are DMA'd once)."""
    nd = a.ndim
    return pl.BlockSpec(a.shape, lambda i, _nd=nd: (0,) * _nd)


def _ln(x, g, b, eps):
    mean = jnp.mean(x, axis=-1, keepdims=True)
    xc = x - mean
    var = jnp.mean(xc * xc, axis=-1, keepdims=True)
    return xc * jax.lax.rsqrt(var + eps) * g + b


def _bf16(x):
    return x.astype(jnp.bfloat16)


def _pick_bb(B, S, target_rows=256):
    """Sequences per grid block: aim for ~256 rows (v6e/v7x MXU) but keep at
    least 2 grid blocks when B >= 2 so both v7x TensorCores get work."""
    bb = max(1, min(B, target_rows // max(S, 1)))
    while B % bb:
        bb -= 1
    if B >= 2 and B // bb < 2:
        bb = max(1, B // 2)
        while B % bb:
            bb -= 1
    return bb


# ----------------------------------------------------------------------------
# Fused forward kernel: embed -> L encoder layers -> last token -> fc1/fc2
# ----------------------------------------------------------------------------
def _fused_kernel(*refs, num_layers, nhead, eps):
    o_ref = refs[-1]
    refs = refs[:-1]
    x_ref, emb_w, emb_b = refs[0], refs[1], refs[2]
    idx = 3
    layer_refs = []
    for _ in range(num_layers):
        layer_refs.append(refs[idx:idx + len(LAYER_KEYS)])
        idx += len(LAYER_KEYS)
    fc1_w, fc1_b, fc2_w, fc2_b = refs[idx:idx + 4]

    bb, s, f = x_ref.shape
    r = bb * s
    d = emb_w.shape[1]
    dh = d // nhead
    inv_sqrt_dh = 1.0 / float(np.sqrt(dh))

    # ---- embedding (sqrt(D) scale already folded into emb_w / emb_b) --------
    x = x_ref[...].reshape(r, f)
    h = jnp.dot(_bf16(x), emb_w[...],
                preferred_element_type=jnp.float32) + emb_b[...]      # (R, D) f32

    # ---- encoder layers (post-norm, ReLU FFN, dropout = identity) -----------
    for (wq, wk, wv, bq, bk, bv, wo, bo,
         w1, b1, w2, b2, g1, be1, g2, be2) in layer_refs:
        h_b = _bf16(h)

        attn = jnp.zeros((r, d), jnp.float32)
        for hd in range(nhead):                       # static, unrolled
            qh = jnp.dot(h_b, wq[hd], preferred_element_type=jnp.float32) + bq[hd]
            kh = jnp.dot(h_b, wk[hd], preferred_element_type=jnp.float32) + bk[hd]
            vh = jnp.dot(h_b, wv[hd], preferred_element_type=jnp.float32) + bv[hd]
            q3 = _bf16(qh).reshape(bb, s, dh)
            k3 = _bf16(kh).reshape(bb, s, dh)
            v3 = _bf16(vh).reshape(bb, s, dh)

            logits = jnp.einsum("bqd,bkd->bqk", q3, k3,
                                preferred_element_type=jnp.float32) * inv_sqrt_dh
            m = jnp.max(logits, axis=-1, keepdims=True)
            p = jnp.exp(logits - m)
            l = jnp.sum(p, axis=-1, keepdims=True)
            p = p * pl.reciprocal(l, approx=True)     # divide on EUP slot
            oh = jnp.einsum("bqk,bkd->bqd", _bf16(p), v3,
                            preferred_element_type=jnp.float32)        # (BB,S,Dh)
            # concat(heads) @ Wo == sum_h head_h @ Wo[h*Dh:(h+1)*Dh, :]
            attn = attn + jnp.dot(_bf16(oh.reshape(r, dh)), wo[hd],
                                  preferred_element_type=jnp.float32)
        a = attn + bo[...]

        h1 = _ln(h + a, g1[...], be1[...], eps)                        # add+LN1 (f32)

        ff = jnp.dot(_bf16(h1), w1[...],
                     preferred_element_type=jnp.float32) + b1[...]     # (R, FF)
        ff = jnp.maximum(ff, 0.0)
        ff = jnp.dot(_bf16(ff), w2[...],
                     preferred_element_type=jnp.float32) + b2[...]     # (R, D)

        h = _ln(h1 + ff, g2[...], be2[...], eps)                       # add+LN2

    # ---- last token per sequence + fc1/ReLU/fc2 (dropout = identity) --------
    last = h.reshape(bb, s, d)[:, s - 1, :]                            # (BB, D)
    y = jnp.dot(_bf16(last), fc1_w[...],
                preferred_element_type=jnp.float32) + fc1_b[...]
    y = jnp.maximum(y, 0.0)
    y = jnp.dot(_bf16(y), fc2_w[...],
                preferred_element_type=jnp.float32) + fc2_b[...]       # (BB, O)
    o_ref[...] = y.astype(o_ref.dtype)


# ----------------------------------------------------------------------------
# pallas_call wrapper (single fused call)
# ----------------------------------------------------------------------------
@jax.jit
def ohlc_transformer_forward(x, kp):
    """x: (B, S, input_size) f32; kp: packed kernel params -> (B, output_size)."""
    B, S, F = x.shape
    O = kp["fc2_w"].shape[1]
    num_layers = len(kp["layers"])
    BB = _pick_bb(B, S)
    nblk = B // BB

    flat = [kp["emb_w"], kp["emb_b"]]
    for lp in kp["layers"]:
        flat += [lp[k] for k in LAYER_KEYS]
    flat += [kp["fc1_w"], kp["fc1_b"], kp["fc2_w"], kp["fc2_b"]]

    in_specs = [pl.BlockSpec((BB, S, F), lambda i: (i, 0, 0))]
    in_specs += [_full_block(w) for w in flat]

    out = pl.pallas_call(
        functools.partial(_fused_kernel, num_layers=num_layers,
                          nhead=NHEAD, eps=float(LN_EPS)),
        grid=(nblk,),
        in_specs=in_specs,
        out_specs=pl.BlockSpec((None, BB, O), lambda i: (i, 0, 0)),
        out_shape=jax.ShapeDtypeStruct((nblk, BB, O), jnp.float32),
        compiler_params=pltpu.CompilerParams(dimension_semantics=("parallel",)),
    )(x, *flat)
    return out.reshape(B, O)


# ----------------------------------------------------------------------------
# Parameters: f32 "master" params (for the reference) + bf16 packed kernel params
# ----------------------------------------------------------------------------
def init_params(key, input_size, hidden_size, num_layers, output_size):
    def nxt():
        nonlocal key
        key, sub = jax.random.split(key)
        return sub

    def rnd(shape, s=0.05):
        return jax.random.normal(nxt(), shape, jnp.float32) * s

    # All weights stored (in, out) so forward computes x @ w + b.
    params = {
        "emb_w": rnd((input_size, hidden_size)),
        "emb_b": rnd((1, hidden_size)),
        "fc1_w": rnd((hidden_size, 16)),
        "fc1_b": rnd((1, 16)),
        "fc2_w": rnd((16, output_size)),
        "fc2_b": rnd((1, output_size)),
        "layers": [],
    }
    for _ in range(num_layers):
        params["layers"].append({
            "wq": rnd((hidden_size, hidden_size)), "bq": rnd((1, hidden_size)),
            "wk": rnd((hidden_size, hidden_size)), "bk": rnd((1, hidden_size)),
            "wv": rnd((hidden_size, hidden_size)), "bv": rnd((1, hidden_size)),
            "wo": rnd((hidden_size, hidden_size)), "bo": rnd((1, hidden_size)),
            "w1": rnd((hidden_size, FF_DIM)), "b1": rnd((1, FF_DIM)),
            "w2": rnd((FF_DIM, hidden_size)), "b2": rnd((1, hidden_size)),
            "ln1_g": jnp.ones((1, hidden_size), jnp.float32),
            "ln1_b": jnp.zeros((1, hidden_size), jnp.float32),
            "ln2_g": jnp.ones((1, hidden_size), jnp.float32),
            "ln2_b": jnp.zeros((1, hidden_size), jnp.float32),
        })
    return params


def pack_params(p, nhead=NHEAD):
    """Kernel layout: matmul weights bf16, Q/K/V/out-proj split per head,
    sqrt(hidden) scale folded into the embedding; biases / LN params f32."""
    D = p["emb_w"].shape[1]
    dh = D // nhead
    sqrt_d = float(np.sqrt(D))

    def split_w(w):   # (D, D) -> (H, D, Dh), bf16
        return jnp.transpose(w.reshape(D, nhead, dh), (1, 0, 2)).astype(jnp.bfloat16)

    def split_b(b):   # (1, D) -> (H, 1, Dh), f32
        return jnp.transpose(b.reshape(1, nhead, dh), (1, 0, 2))

    kp = {
        "emb_w": (p["emb_w"] * sqrt_d).astype(jnp.bfloat16),
        "emb_b": p["emb_b"] * sqrt_d,
        "fc1_w": p["fc1_w"].astype(jnp.bfloat16), "fc1_b": p["fc1_b"],
        "fc2_w": p["fc2_w"].astype(jnp.bfloat16), "fc2_b": p["fc2_b"],
        "layers": [],
    }
    for lp in p["layers"]:
        kp["layers"].append({
            "wq": split_w(lp["wq"]), "wk": split_w(lp["wk"]), "wv": split_w(lp["wv"]),
            "bq": split_b(lp["bq"]), "bk": split_b(lp["bk"]), "bv": split_b(lp["bv"]),
            "wo": lp["wo"].reshape(nhead, dh, D).astype(jnp.bfloat16),
            "bo": lp["bo"],
            "w1": lp["w1"].astype(jnp.bfloat16), "b1": lp["b1"],
            "w2": lp["w2"].astype(jnp.bfloat16), "b2": lp["b2"],
            "ln1_g": lp["ln1_g"], "ln1_b": lp["ln1_b"],
            "ln2_g": lp["ln2_g"], "ln2_b": lp["ln2_b"],
        })
    return kp


# ----------------------------------------------------------------------------
# Pure-JAX f32 reference (PyTorch semantics, inference mode)
# ----------------------------------------------------------------------------
def reference_forward(x, p, nhead=NHEAD, eps=LN_EPS):
    B, S, _ = x.shape
    D = p["emb_w"].shape[1]
    dh = D // nhead

    def ln(t, g, b):
        m = jnp.mean(t, -1, keepdims=True)
        v = jnp.mean((t - m) ** 2, -1, keepdims=True)
        return (t - m) * jax.lax.rsqrt(v + eps) * g + b

    h = (x @ p["emb_w"] + p["emb_b"]) * np.sqrt(D)
    for lp in p["layers"]:
        q = h @ lp["wq"] + lp["bq"]
        k = h @ lp["wk"] + lp["bk"]
        v = h @ lp["wv"] + lp["bv"]

        def heads(t):
            return t.reshape(B, S, nhead, dh).transpose(0, 2, 1, 3)

        s_ = jnp.einsum("bhqd,bhkd->bhqk", heads(q), heads(k)) / np.sqrt(dh)
        pr = jax.nn.softmax(s_, axis=-1)
        a = jnp.einsum("bhqk,bhkd->bhqd", pr, heads(v))
        a = a.transpose(0, 2, 1, 3).reshape(B, S, D)
        a = a @ lp["wo"] + lp["bo"]
        h = ln(h + a, lp["ln1_g"], lp["ln1_b"])
        ff = jnp.maximum(h @ lp["w1"] + lp["b1"], 0.0) @ lp["w2"] + lp["b2"]
        h = ln(h + ff, lp["ln2_g"], lp["ln2_b"])
    last = h[:, -1, :]
    y = jnp.maximum(last @ p["fc1_w"] + p["fc1_b"], 0.0)
    return y @ p["fc2_w"] + p["fc2_b"]


# ----------------------------------------------------------------------------
if __name__ == "__main__":
    # OHLC -> input_size=4; small shapes consistent with the module.
    batch, seq, input_size = 2, 8, 4
    hidden_size, num_layers, output_size = 32, 2, 1

    key = jax.random.PRNGKey(0)
    key, pkey, xkey = jax.random.split(key, 3)
    params = init_params(pkey, input_size, hidden_size, num_layers, output_size)
    kparams = pack_params(params)
    x = jax.random.normal(xkey, (batch, seq, input_size), jnp.float32)

    out = jax.block_until_ready(ohlc_transformer_forward(x, kparams))
    ref = jax.block_until_ready(reference_forward(x, params))

    # bf16 MXU weights/operands + approx reciprocal vs f32 reference.
    np.testing.assert_allclose(np.asarray(out), np.asarray(ref),
                               rtol=3e-2, atol=2e-2)
    assert out.shape == (batch, output_size)
    print("KERNEL_OK")
</pallas_src>

<mosaic_0001>
module attributes {stable_mosaic.version = 11 : i64} {
  func.func @_fused_kernel(%arg0: i32, %arg1: memref<1x8x4xf32, #tpu.memory_space<vmem>>, %arg2: memref<4x32xbf16, #tpu.memory_space<vmem>>, %arg3: memref<1x32xf32, #tpu.memory_space<vmem>>, %arg4: memref<4x32x8xbf16, #tpu.memory_space<vmem>>, %arg5: memref<4x32x8xbf16, #tpu.memory_space<vmem>>, %arg6: memref<4x32x8xbf16, #tpu.memory_space<vmem>>, %arg7: memref<4x1x8xf32, #tpu.memory_space<vmem>>, %arg8: memref<4x1x8xf32, #tpu.memory_space<vmem>>, %arg9: memref<4x1x8xf32, #tpu.memory_space<vmem>>, %arg10: memref<4x8x32xbf16, #tpu.memory_space<vmem>>, %arg11: memref<1x32xf32, #tpu.memory_space<vmem>>, %arg12: memref<32x2048xbf16, #tpu.memory_space<vmem>>, %arg13: memref<1x2048xf32, #tpu.memory_space<vmem>>, %arg14: memref<2048x32xbf16, #tpu.memory_space<vmem>>, %arg15: memref<1x32xf32, #tpu.memory_space<vmem>>, %arg16: memref<1x32xf32, #tpu.memory_space<vmem>>, %arg17: memref<1x32xf32, #tpu.memory_space<vmem>>, %arg18: memref<1x32xf32, #tpu.memory_space<vmem>>, %arg19: memref<1x32xf32, #tpu.memory_space<vmem>>, %arg20: memref<4x32x8xbf16, #tpu.memory_space<vmem>>, %arg21: memref<4x32x8xbf16, #tpu.memory_space<vmem>>, %arg22: memref<4x32x8xbf16, #tpu.memory_space<vmem>>, %arg23: memref<4x1x8xf32, #tpu.memory_space<vmem>>, %arg24: memref<4x1x8xf32, #tpu.memory_space<vmem>>, %arg25: memref<4x1x8xf32, #tpu.memory_space<vmem>>, %arg26: memref<4x8x32xbf16, #tpu.memory_space<vmem>>, %arg27: memref<1x32xf32, #tpu.memory_space<vmem>>, %arg28: memref<32x2048xbf16, #tpu.memory_space<vmem>>, %arg29: memref<1x2048xf32, #tpu.memory_space<vmem>>, %arg30: memref<2048x32xbf16, #tpu.memory_space<vmem>>, %arg31: memref<1x32xf32, #tpu.memory_space<vmem>>, %arg32: memref<1x32xf32, #tpu.memory_space<vmem>>, %arg33: memref<1x32xf32, #tpu.memory_space<vmem>>, %arg34: memref<1x32xf32, #tpu.memory_space<vmem>>, %arg35: memref<1x32xf32, #tpu.memory_space<vmem>>, %arg36: memref<32x16xbf16, #tpu.memory_space<vmem>>, %arg37: memref<1x16xf32, #tpu.memory_space<vmem>>, %arg38: memref<16x1xbf16, #tpu.memory_space<vmem>>, %arg39: memref<1x1xf32, #tpu.memory_space<vmem>>, %arg40: memref<1x1x1xf32, #tpu.memory_space<vmem>>) attributes {dimension_semantics = [#tpu.dimension_semantics<parallel>], iteration_bounds = array<i64: 2>, scalar_prefetch = 0 : i64, scratch_operands = 0 : i64, tpu.core_type = #tpu.core_type<tc>, window_params = [{transform_indices = @transform_0, window_bounds = array<i64: 1, 8, 4>}, {pipeline_mode = #tpu.pipeline_mode<synchronous>, transform_indices = @transform_1, window_bounds = array<i64: 4, 32>}, {pipeline_mode = #tpu.pipeline_mode<synchronous>, transform_indices = @transform_2, window_bounds = array<i64: 1, 32>}, {pipeline_mode = #tpu.pipeline_mode<synchronous>, transform_indices = @transform_3, window_bounds = array<i64: 4, 32, 8>}, {pipeline_mode = #tpu.pipeline_mode<synchronous>, transform_indices = @transform_4, window_bounds = array<i64: 4, 32, 8>}, {pipeline_mode = #tpu.pipeline_mode<synchronous>, transform_indices = @transform_5, window_bounds = array<i64: 4, 32, 8>}, {pipeline_mode = #tpu.pipeline_mode<synchronous>, transform_indices = @transform_6, window_bounds = array<i64: 4, 1, 8>}, {pipeline_mode = #tpu.pipeline_mode<synchronous>, transform_indices = @transform_7, window_bounds = array<i64: 4, 1, 8>}, {pipeline_mode = #tpu.pipeline_mode<synchronous>, transform_indices = @transform_8, window_bounds = array<i64: 4, 1, 8>}, {pipeline_mode = #tpu.pipeline_mode<synchronous>, transform_indices = @transform_9, window_bounds = array<i64: 4, 8, 32>}, {pipeline_mode = #tpu.pipeline_mode<synchronous>, transform_indices = @transform_10, window_bounds = array<i64: 1, 32>}, {pipeline_mode = #tpu.pipeline_mode<synchronous>, transform_indices = @transform_11, window_bounds = array<i64: 32, 2048>}, {pipeline_mode = #tpu.pipeline_mode<synchronous>, transform_indices = @transform_12, window_bounds = array<i64: 1, 2048>}, {pipeline_mode = #tpu.pipeline_mode<synchronous>, transform_indices = @transform_13, window_bounds = array<i64: 2048, 32>}, {pipeline_mode = #tpu.pipeline_mode<synchronous>, transform_indices = @transform_14, window_bounds = array<i64: 1, 32>}, {pipeline_mode = #tpu.pipeline_mode<synchronous>, transform_indices = @transform_15, window_bounds = array<i64: 1, 32>}, {pipeline_mode = #tpu.pipeline_mode<synchronous>, transform_indices = @transform_16, window_bounds = array<i64: 1, 32>}, {pipeline_mode = #tpu.pipeline_mode<synchronous>, transform_indices = @transform_17, window_bounds = array<i64: 1, 32>}, {pipeline_mode = #tpu.pipeline_mode<synchronous>, transform_indices = @transform_18, window_bounds = array<i64: 1, 32>}, {pipeline_mode = #tpu.pipeline_mode<synchronous>, transform_indices = @transform_19, window_bounds = array<i64: 4, 32, 8>}, {pipeline_mode = #tpu.pipeline_mode<synchronous>, transform_indices = @transform_20, window_bounds = array<i64: 4, 32, 8>}, {pipeline_mode = #tpu.pipeline_mode<synchronous>, transform_indices = @transform_21, window_bounds = array<i64: 4, 32, 8>}, {pipeline_mode = #tpu.pipeline_mode<synchronous>, transform_indices = @transform_22, window_bounds = array<i64: 4, 1, 8>}, {pipeline_mode = #tpu.pipeline_mode<synchronous>, transform_indices = @transform_23, window_bounds = array<i64: 4, 1, 8>}, {pipeline_mode = #tpu.pipeline_mode<synchronous>, transform_indices = @transform_24, window_bounds = array<i64: 4, 1, 8>}, {pipeline_mode = #tpu.pipeline_mode<synchronous>, transform_indices = @transform_25, window_bounds = array<i64: 4, 8, 32>}, {pipeline_mode = #tpu.pipeline_mode<synchronous>, transform_indices = @transform_26, window_bounds = array<i64: 1, 32>}, {pipeline_mode = #tpu.pipeline_mode<synchronous>, transform_indices = @transform_27, window_bounds = array<i64: 32, 2048>}, {pipeline_mode = #tpu.pipeline_mode<synchronous>, transform_indices = @transform_28, window_bounds = array<i64: 1, 2048>}, {pipeline_mode = #tpu.pipeline_mode<synchronous>, transform_indices = @transform_29, window_bounds = array<i64: 2048, 32>}, {pipeline_mode = #tpu.pipeline_mode<synchronous>, transform_indices = @transform_30, window_bounds = array<i64: 1, 32>}, {pipeline_mode = #tpu.pipeline_mode<synchronous>, transform_indices = @transform_31, window_bounds = array<i64: 1, 32>}, {pipeline_mode = #tpu.pipeline_mode<synchronous>, transform_indices = @transform_32, window_bounds = array<i64: 1, 32>}, {pipeline_mode = #tpu.pipeline_mode<synchronous>, transform_indices = @transform_33, window_bounds = array<i64: 1, 32>}, {pipeline_mode = #tpu.pipeline_mode<synchronous>, transform_indices = @transform_34, window_bounds = array<i64: 1, 32>}, {pipeline_mode = #tpu.pipeline_mode<synchronous>, transform_indices = @transform_35, window_bounds = array<i64: 32, 16>}, {pipeline_mode = #tpu.pipeline_mode<synchronous>, transform_indices = @transform_36, window_bounds = array<i64: 1, 16>}, {pipeline_mode = #tpu.pipeline_mode<synchronous>, transform_indices = @transform_37, window_bounds = array<i64: 16, 1>}, {pipeline_mode = #tpu.pipeline_mode<synchronous>, transform_indices = @transform_38, window_bounds = array<i64: 1, 1>}, {transform_indices = @transform_39, window_bounds = array<i64: 1, 1, 1>}]} {
    %c0 = arith.constant 0 : index
    %c0_0 = arith.constant 0 : index
    %c0_1 = arith.constant 0 : index
    %0 = vector.load %arg1[%c0, %c0_0, %c0_1] : memref<1x8x4xf32, #tpu.memory_space<vmem>>, vector<1x8x4xf32>
    %1 = vector.shape_cast %0 : vector<1x8x4xf32> to vector<8x4xf32>
    %2 = arith.truncf %1 : vector<8x4xf32> to vector<8x4xbf16>
    %c0_2 = arith.constant 0 : index
    %c0_3 = arith.constant 0 : index
    %3 = vector.load %arg2[%c0_2, %c0_3] : memref<4x32xbf16, #tpu.memory_space<vmem>>, vector<4x32xbf16>
    %cst = arith.constant dense<0.000000e+00> : vector<8x32xf32>
    %4 = tpu.matmul %2, %3, %cst {dimension_numbers = #tpu.dot_dimension_numbers<[1], [0], [0], [1], [0, 0, 1, 1], [], []>} : vector<8x4xbf16>, vector<4x32xbf16>, vector<8x32xf32> -> vector<8x32xf32>
    %c0_4 = arith.constant 0 : index
    %c0_5 = arith.constant 0 : index
    %5 = vector.load %arg3[%c0_4, %c0_5] : memref<1x32xf32, #tpu.memory_space<vmem>>, vector<1x32xf32>
    %6 = vector.broadcast %5 : vector<1x32xf32> to vector<8x32xf32>
    %7 = arith.addf %4, %6 : vector<8x32xf32>
    %8 = arith.truncf %7 : vector<8x32xf32> to vector<8x32xbf16>
    %cst_6 = arith.constant 0.000000e+00 : f32
    %9 = vector.broadcast %cst_6 : f32 to vector<8x32xf32>
    %c0_7 = arith.constant 0 : index
    %c0_8 = arith.constant 0 : index
    %c0_9 = arith.constant 0 : index
    %10 = vector.load %arg4[%c0_7, %c0_8, %c0_9] : memref<4x32x8xbf16, #tpu.memory_space<vmem>>, vector<1x32x8xbf16>
    %11 = vector.shape_cast %10 : vector<1x32x8xbf16> to vector<32x8xbf16>
    %cst_10 = arith.constant dense<0.000000e+00> : vector<8x8xf32>
    %12 = tpu.matmul %8, %11, %cst_10 {dimension_numbers = #tpu.dot_dimension_numbers<[1], [0], [0], [1], [0, 0, 1, 1], [], []>} : vector<8x32xbf16>, vector<32x8xbf16>, vector<8x8xf32> -> vector<8x8xf32>
    %c0_11 = arith.constant 0 : index
    %c0_12 = arith.constant 0 : index
    %c0_13 = arith.constant 0 : index
    %13 = vector.load %arg7[%c0_11, %c0_12, %c0_13] : memref<4x1x8xf32, #tpu.memory_space<vmem>>, vector<1x1x8xf32>
    %14 = vector.shape_cast %13 : vector<1x1x8xf32> to vector<1x8xf32>
    %15 = vector.broadcast %14 : vector<1x8xf32> to vector<8x8xf32>
    %16 = arith.addf %12, %15 : vector<8x8xf32>
    %c0_14 = arith.constant 0 : index
    %c0_15 = arith.constant 0 : index
    %c0_16 = arith.constant 0 : index
    %17 = vector.load %arg5[%c0_14, %c0_15, %c0_16] : memref<4x32x8xbf16, #tpu.memory_space<vmem>>, vector<1x32x8xbf16>
    %18 = vector.shape_cast %17 : vector<1x32x8xbf16> to vector<32x8xbf16>
    %cst_17 = arith.constant dense<0.000000e+00> : vector<8x8xf32>
    %19 = tpu.matmul %8, %18, %cst_17 {dimension_numbers = #tpu.dot_dimension_numbers<[1], [0], [0], [1], [0, 0, 1, 1], [], []>} : vector<8x32xbf16>, vector<32x8xbf16>, vector<8x8xf32> -> vector<8x8xf32>
    %c0_18 = arith.constant 0 : index
    %c0_19 = arith.constant 0 : index
    %c0_20 = arith.constant 0 : index
    %20 = vector.load %arg8[%c0_18, %c0_19, %c0_20] : memref<4x1x8xf32, #tpu.memory_space<vmem>>, vector<1x1x8xf32>
    %21 = vector.shape_cast %20 : vector<1x1x8xf32> to vector<1x8xf32>
    %22 = vector.broadcast %21 : vector<1x8xf32> to vector<8x8xf32>
    %23 = arith.addf %19, %22 : vector<8x8xf32>
    %c0_21 = arith.constant 0 : index
    %c0_22 = arith.constant 0 : index
    %c0_23 = arith.constant 0 : index
    %24 = vector.load %arg6[%c0_21, %c0_22, %c0_23] : memref<4x32x8xbf16, #tpu.memory_space<vmem>>, vector<1x32x8xbf16>
    %25 = vector.shape_cast %24 : vector<1x32x8xbf16> to vector<32x8xbf16>
    %cst_24 = arith.constant dense<0.000000e+00> : vector<8x8xf32>
    %26 = tpu.matmul %8, %25, %cst_24 {dimension_numbers = #tpu.dot_dimension_numbers<[1], [0], [0], [1], [0, 0, 1, 1], [], []>} : vector<8x32xbf16>, vector<32x8xbf16>, vector<8x8xf32> -> vector<8x8xf32>
    %c0_25 = arith.constant 0 : index
    %c0_26 = arith.constant 0 : index
    %c0_27 = arith.constant 0 : index
    %27 = vector.load %arg9[%c0_25, %c0_26, %c0_27] : memref<4x1x8xf32, #tpu.memory_space<vmem>>, vector<1x1x8xf32>
    %28 = vector.shape_cast %27 : vector<1x1x8xf32> to vector<1x8xf32>
    %29 = vector.broadcast %28 : vector<1x8xf32> to vector<8x8xf32>
    %30 = arith.addf %26, %29 : vector<8x8xf32>
    %31 = arith.truncf %16 : vector<8x8xf32> to vector<8x8xbf16>
    %32 = vector.shape_cast %31 : vector<8x8xbf16> to vector<1x8x8xbf16>
    %33 = arith.truncf %23 : vector<8x8xf32> to vector<8x8xbf16>
    %34 = vector.shape_cast %33 : vector<8x8xbf16> to vector<1x8x8xbf16>
    %35 = arith.truncf %30 : vector<8x8xf32> to vector<8x8xbf16>
    %36 = vector.shape_cast %35 : vector<8x8xbf16> to vector<1x8x8xbf16>
    "tpu.trace_start"() <{level = 10 : i32, message = "bqd,bkd->bqk"}> : () -> ()
    %cst_28 = arith.constant dense<0.000000e+00> : vector<1x8x8xf32>
    %37 = tpu.matmul %32, %34, %cst_28 {dimension_numbers = #tpu.dot_dimension_numbers<[2], [2], [1], [1], [0, 0, 0, 1, 1, 1], [0], [0]>} : vector<1x8x8xbf16>, vector<1x8x8xbf16>, vector<1x8x8xf32> -> vector<1x8x8xf32>
    "tpu.trace_stop"() : () -> ()
    %cst_29 = arith.constant 0.353553385 : f32
    %38 = vector.broadcast %cst_29 : f32 to vector<1x8x8xf32>
    %39 = arith.mulf %37, %38 : vector<1x8x8xf32>
    %cst_30 = arith.constant dense<0xFF800000> : vector<1x8xf32>
    %40 = vector.multi_reduction <maximumf>, %39, %cst_30 [2] : vector<1x8x8xf32> to vector<1x8xf32>
    %41 = vector.shape_cast %40 : vector<1x8xf32> to vector<1x8x1xf32>
    %42 = vector.broadcast %41 : vector<1x8x1xf32> to vector<1x8x8xf32>
    %43 = arith.subf %39, %42 : vector<1x8x8xf32>
    %44 = math.exp %43 : vector<1x8x8xf32>
    %cst_31 = arith.constant dense<0.000000e+00> : vector<1x8xf32>
    %45 = vector.multi_reduction <add>, %44, %cst_31 [2] : vector<1x8x8xf32> to vector<1x8xf32>
    %46 = vector.shape_cast %45 : vector<1x8xf32> to vector<1x8x1xf32>
    %47 = tpu.reciprocal %46 {approx = true} : vector<1x8x1xf32> -> vector<1x8x1xf32>
    %48 = vector.broadcast %47 : vector<1x8x1xf32> to vector<1x8x8xf32>
    %49 = arith.mulf %44, %48 : vector<1x8x8xf32>
    %50 = arith.truncf %49 : vector<1x8x8xf32> to vector<1x8x8xbf16>
    "tpu.trace_start"() <{level = 10 : i32, message = "bqk,bkd->bqd"}> : () -> ()
    %cst_32 = arith.constant dense<0.000000e+00> : vector<1x8x8xf32>
    %51 = tpu.matmul %50, %36, %cst_32 {dimension_numbers = #tpu.dot_dimension_numbers<[2], [1], [1], [2], [0, 0, 0, 1, 1, 2], [0], [0]>} : vector<1x8x8xbf16>, vector<1x8x8xbf16>, vector<1x8x8xf32> -> vector<1x8x8xf32>
    "tpu.trace_stop"() : () -> ()
    %52 = vector.shape_cast %51 : vector<1x8x8xf32> to vector<8x8xf32>
    %53 = arith.truncf %52 : vector<8x8xf32> to vector<8x8xbf16>
    %c0_33 = arith.constant 0 : index
    %c0_34 = arith.constant 0 : index
    %c0_35 = arith.constant 0 : index
    %54 = vector.load %arg10[%c0_33, %c0_34, %c0_35] : memref<4x8x32xbf16, #tpu.memory_space<vmem>>, vector<1x8x32xbf16>
    %55 = vector.shape_cast %54 : vector<1x8x32xbf16> to vector<8x32xbf16>
    %cst_36 = arith.constant dense<0.000000e+00> : vector<8x32xf32>
    %56 = tpu.matmul %53, %55, %cst_36 {dimension_numbers = #tpu.dot_dimension_numbers<[1], [0], [0], [1], [0, 0, 1, 1], [], []>} : vector<8x8xbf16>, vector<8x32xbf16>, vector<8x32xf32> -> vector<8x32xf32>
    %57 = arith.addf %9, %56 : vector<8x32xf32>
    %c1 = arith.constant 1 : index
    %c0_37 = arith.constant 0 : index
    %c0_38 = arith.constant 0 : index
    %58 = vector.load %arg4[%c1, %c0_37, %c0_38] : memref<4x32x8xbf16, #tpu.memory_space<vmem>>, vector<1x32x8xbf16>
    %59 = vector.shape_cast %58 : vector<1x32x8xbf16> to vector<32x8xbf16>
    %cst_39 = arith.constant dense<0.000000e+00> : vector<8x8xf32>
    %60 = tpu.matmul %8, %59, %cst_39 {dimension_numbers = #tpu.dot_dimension_numbers<[1], [0], [0], [1], [0, 0, 1, 1], [], []>} : vector<8x32xbf16>, vector<32x8xbf16>, vector<8x8xf32> -> vector<8x8xf32>
    %c1_40 = arith.constant 1 : index
    %c0_41 = arith.constant 0 : index
    %c0_42 = arith.constant 0 : index
    %61 = vector.load %arg7[%c1_40, %c0_41, %c0_42] : memref<4x1x8xf32, #tpu.memory_space<vmem>>, vector<1x1x8xf32>
    %62 = vector.shape_cast %61 : vector<1x1x8xf32> to vector<1x8xf32>
    %63 = vector.broadcast %62 : vector<1x8xf32> to vector<8x8xf32>
    %64 = arith.addf %60, %63 : vector<8x8xf32>
    %c1_43 = arith.constant 1 : index
    %c0_44 = arith.constant 0 : index
    %c0_45 = arith.constant 0 : index
    %65 = vector.load %arg5[%c1_43, %c0_44, %c0_45] : memref<4x32x8xbf16, #tpu.memory_space<vmem>>, vector<1x32x8xbf16>
    %66 = vector.shape_cast %65 : vector<1x32x8xbf16> to vector<32x8xbf16>
    %cst_46 = arith.constant dense<0.000000e+00> : vector<8x8xf32>
    %67 = tpu.matmul %8, %66, %cst_46 {dimension_numbers = #tpu.dot_dimension_numbers<[1], [0], [0], [1], [0, 0, 1, 1], [], []>} : vector<8x32xbf16>, vector<32x8xbf16>, vector<8x8xf32> -> vector<8x8xf32>
    %c1_47 = arith.constant 1 : index
    %c0_48 = arith.constant 0 : index
    %c0_49 = arith.constant 0 : index
    %68 = vector.load %arg8[%c1_47, %c0_48, %c0_49] : memref<4x1x8xf32, #tpu.memory_space<vmem>>, vector<1x1x8xf32>
    %69 = vector.shape_cast %68 : vector<1x1x8xf32> to vector<1x8xf32>
    %70 = vector.broadcast %69 : vector<1x8xf32> to vector<8x8xf32>
    %71 = arith.addf %67, %70 : vector<8x8xf32>
    %c1_50 = arith.constant 1 : index
    %c0_51 = arith.constant 0 : index
    %c0_52 = arith.constant 0 : index
    %72 = vector.load %arg6[%c1_50, %c0_51, %c0_52] : memref<4x32x8xbf16, #tpu.memory_space<vmem>>, vector<1x32x8xbf16>
    %73 = vector.shape_cast %72 : vector<1x32x8xbf16> to vector<32x8xbf16>
    %cst_53 = arith.constant dense<0.000000e+00> : vector<8x8xf32>
    %74 = tpu.matmul %8, %73, %cst_53 {dimension_numbers = #tpu.dot_dimension_numbers<[1], [0], [0], [1], [0, 0, 1, 1], [], []>} : vector<8x32xbf16>, vector<32x8xbf16>, vector<8x8xf32> -> vector<8x8xf32>
    %c1_54 = arith.constant 1 : index
    %c0_55 = arith.constant 0 : index
    %c0_56 = arith.constant 0 : index
    %75 = vector.load %arg9[%c1_54, %c0_55, %c0_56] : memref<4x1x8xf32, #tpu.memory_space<vmem>>, vector<1x1x8xf32>
    %76 = vector.shape_cast %75 : vector<1x1x8xf32> to vector<1x8xf32>
    %77 = vector.broadcast %76 : vector<1x8xf32> to vector<8x8xf32>
    %78 = arith.addf %74, %77 : vector<8x8xf32>
    %79 = arith.truncf %64 : vector<8x8xf32> to vector<8x8xbf16>
    %80 = vector.shape_cast %79 : vector<8x8xbf16> to vector<1x8x8xbf16>
    %81 = arith.truncf %71 : vector<8x8xf32> to vector<8x8xbf16>
    %82 = vector.shape_cast %81 : vector<8x8xbf16> to vector<1x8x8xbf16>
    %83 = arith.truncf %78 : vector<8x8xf32> to vector<8x8xbf16>
    %84 = vector.shape_cast %83 : vector<8x8xbf16> to vector<1x8x8xbf16>
    "tpu.trace_start"() <{level = 10 : i32, message = "bqd,bkd->bqk"}> : () -> ()
    %cst_57 = arith.constant dense<0.000000e+00> : vector<1x8x8xf32>
    %85 = tpu.matmul %80, %82, %cst_57 {dimension_numbers = #tpu.dot_dimension_numbers<[2], [2], [1], [1], [0, 0, 0, 1, 1, 1], [0], [0]>} : vector<1x8x8xbf16>, vector<1x8x8xbf16>, vector<1x8x8xf32> -> vector<1x8x8xf32>
    "tpu.trace_stop"() : () -> ()
    %cst_58 = arith.constant 0.353553385 : f32
    %86 = vector.broadcast %cst_58 : f32 to vector<1x8x8xf32>
    %87 = arith.mulf %85, %86 : vector<1x8x8xf32>
    %cst_59 = arith.constant dense<0xFF800000> : vector<1x8xf32>
    %88 = vector.multi_reduction <maximumf>, %87, %cst_59 [2] : vector<1x8x8xf32> to vector<1x8xf32>
    %89 = vector.shape_cast %88 : vector<1x8xf32> to vector<1x8x1xf32>
    %90 = vector.broadcast %89 : vector<1x8x1xf32> to vector<1x8x8xf32>
    %91 = arith.subf %87, %90 : vector<1x8x8xf32>
    %92 = math.exp %91 : vector<1x8x8xf32>
    %cst_60 = arith.constant dense<0.000000e+00> : vector<1x8xf32>
    %93 = vector.multi_reduction <add>, %92, %cst_60 [2] : vector<1x8x8xf32> to vector<1x8xf32>
    %94 = vector.shape_cast %93 : vector<1x8xf32> to vector<1x8x1xf32>
    %95 = tpu.reciprocal %94 {approx = true} : vector<1x8x1xf32> -> vector<1x8x1xf32>
    %96 = vector.broadcast %95 : vector<1x8x1xf32> to vector<1x8x8xf32>
    %97 = arith.mulf %92, %96 : vector<1x8x8xf32>
    %98 = arith.truncf %97 : vector<1x8x8xf32> to vector<1x8x8xbf16>
    "tpu.trace_start"() <{level = 10 : i32, message = "bqk,bkd->bqd"}> : () -> ()
    %cst_61 = arith.constant dense<0.000000e+00> : vector<1x8x8xf32>
    %99 = tpu.matmul %98, %84, %cst_61 {dimension_numbers = #tpu.dot_dimension_numbers<[2], [1], [1], [2], [0, 0, 0, 1, 1, 2], [0], [0]>} : vector<1x8x8xbf16>, vector<1x8x8xbf16>, vector<1x8x8xf32> -> vector<1x8x8xf32>
    "tpu.trace_stop"() : () -> ()
    %100 = vector.shape_cast %99 : vector<1x8x8xf32> to vector<8x8xf32>
    %101 = arith.truncf %100 : vector<8x8xf32> to vector<8x8xbf16>
    %c1_62 = arith.constant 1 : index
    %c0_63 = arith.constant 0 : index
    %c0_64 = arith.constant 0 : index
    %102 = vector.load %arg10[%c1_62, %c0_63, %c0_64] : memref<4x8x32xbf16, #tpu.memory_space<vmem>>, vector<1x8x32xbf16>
    %103 = vector.shape_cast %102 : vector<1x8x32xbf16> to vector<8x32xbf16>
    %cst_65 = arith.constant dense<0.000000e+00> : vector<8x32xf32>
    %104 = tpu.matmul %101, %103, %cst_65 {dimension_numbers = #tpu.dot_dimension_numbers<[1], [0], [0], [1], [0, 0, 1, 1], [], []>} : vector<8x8xbf16>, vector<8x32xbf16>, vector<8x32xf32> -> vector<8x32xf32>
    %105 = arith.addf %57, %104 : vector<8x32xf32>
    %c2 = arith.constant 2 : index
    %c0_66 = arith.constant 0 : index
    %c0_67 = arith.constant 0 : index
    %106 = vector.load %arg4[%c2, %c0_66, %c0_67] : memref<4x32x8xbf16, #tpu.memory_space<vmem>>, vector<1x32x8xbf16>
    %107 = vector.shape_cast %106 : vector<1x32x8xbf16> to vector<32x8xbf16>
    %cst_68 = arith.constant dense<0.000000e+00> : vector<8x8xf32>
    %108 = tpu.matmul %8, %107, %cst_68 {dimension_numbers = #tpu.dot_dimension_numbers<[1], [0], [0], [1], [0, 0, 1, 1], [], []>} : vector<8x32xbf16>, vector<32x8xbf16>, vector<8x8xf32> -> vector<8x8xf32>
    %c2_69 = arith.constant 2 : index
    %c0_70 = arith.constant 0 : index
    %c0_71 = arith.constant 0 : index
    %109 = vector.load %arg7[%c2_69, %c0_70, %c0_71] : memref<4x1x8xf32, #tpu.memory_space<vmem>>, vector<1x1x8xf32>
    %110 = vector.shape_cast %109 : vector<1x1x8xf32> to vector<1x8xf32>
    %111 = vector.broadcast %110 : vector<1x8xf32> to vector<8x8xf32>
    %112 = arith.addf %108, %111 : vector<8x8xf32>
    %c2_72 = arith.constant 2 : index
    %c0_73 = arith.constant 0 : index
    %c0_74 = arith.constant 0 : index
    %113 = vector.load %arg5[%c2_72, %c0_73, %c0_74] : memref<4x32x8xbf16, #tpu.memory_space<vmem>>, vector<1x32x8xbf16>
    %114 = vector.shape_cast %113 : vector<1x32x8xbf16> to vector<32x8xbf16>
    %cst_75 = arith.constant dense<0.000000e+00> : vector<8x8xf32>
    %115 = tpu.matmul %8, %114, %cst_75 {dimension_numbers = #tpu.dot_dimension_numbers<[1], [0], [0], [1], [0, 0, 1, 1], [], []>} : vector<8x32xbf16>, vector<32x8xbf16>, vector<8x8xf32> -> vector<8x8xf32>
    %c2_76 = arith.constant 2 : index
    %c0_77 = arith.constant 0 : index
    %c0_78 = arith.constant 0 : index
    %116 = vector.load %arg8[%c2_76, %c0_77, %c0_78] : memref<4x1x8xf32, #tpu.memory_space<vmem>>, vector<1x1x8xf32>
    %117 = vector.shape_cast %116 : vector<1x1x8xf32> to vector<1x8xf32>
    %118 = vector.broadcast %117 : vector<1x8xf32> to vector<8x8xf32>
    %119 = arith.addf %115, %118 : vector<8x8xf32>
    %c2_79 = arith.constant 2 : index
    %c0_80 = arith.constant 0 : index
    %c0_81 = arith.constant 0 : index
    %120 = vector.load %arg6[%c2_79, %c0_80, %c0_81] : memref<4x32x8xbf16, #tpu.memory_space<vmem>>, vector<1x32x8xbf16>
    %121 = vector.shape_cast %120 : vector<1x32x8xbf16> to vector<32x8xbf16>
    %cst_82 = arith.constant dense<0.000000e+00> : vector<8x8xf32>
    %122 = tpu.matmul %8, %121, %cst_82 {dimension_numbers = #tpu.dot_dimension_numbers<[1], [0], [0], [1], [0, 0, 1, 1], [], []>} : vector<8x32xbf16>, vector<32x8xbf16>, vector<8x8xf32> -> vector<8x8xf32>
    %c2_83 = arith.constant 2 : index
    %c0_84 = arith.constant 0 : index
    %c0_85 = arith.constant 0 : index
    %123 = vector.load %arg9[%c2_83, %c0_84, %c0_85] : memref<4x1x8xf32, #tpu.memory_space<vmem>>, vector<1x1x8xf32>
    %124 = vector.shape_cast %123 : vector<1x1x8xf32> to vector<1x8xf32>
    %125 = vector.broadcast %124 : vector<1x8xf32> to vector<8x8xf32>
    %126 = arith.addf %122, %125 : vector<8x8xf32>
    %127 = arith.truncf %112 : vector<8x8xf32> to vector<8x8xbf16>
    %128 = vector.shape_cast %127 : vector<8x8xbf16> to vector<1x8x8xbf16>
    %129 = arith.truncf %119 : vector<8x8xf32> to vector<8x8xbf16>
    %130 = vector.shape_cast %129 : vector<8x8xbf16> to vector<1x8x8xbf16>
    %131 = arith.truncf %126 : vector<8x8xf32> to vector<8x8xbf16>
    %132 = vector.shape_cast %131 : vector<8x8xbf16> to vector<1x8x8xbf16>
    "tpu.trace_start"() <{level = 10 : i32, message = "bqd,bkd->bqk"}> : () -> ()
    %cst_86 = arith.constant dense<0.000000e+00> : vector<1x8x8xf32>
    %133 = tpu.matmul %128, %130, %cst_86 {dimension_numbers = #tpu.dot_dimension_numbers<[2], [2], [1], [1], [0, 0, 0, 1, 1, 1], [0], [0]>} : vector<1x8x8xbf16>, vector<1x8x8xbf16>, vector<1x8x8xf32> -> vector<1x8x8xf32>
    "tpu.trace_stop"() : () -> ()
    %cst_87 = arith.constant 0.353553385 : f32
    %134 = vector.broadcast %cst_87 : f32 to vector<1x8x8xf32>
    %135 = arith.mulf %133, %134 : vector<1x8x8xf32>
    %cst_88 = arith.constant dense<0xFF800000> : vector<1x8xf32>
    %136 = vector.multi_reduction <maximumf>, %135, %cst_88 [2] : vector<1x8x8xf32> to vector<1x8xf32>
    %137 = vector.shape_cast %136 : vector<1x8xf32> to vector<1x8x1xf32>
    %138 = vector.broadcast %137 : vector<1x8x1xf32> to vector<1x8x8xf32>
    %139 = arith.subf %135, %138 : vector<1x8x8xf32>
    %140 = math.exp %139 : vector<1x8x8xf32>
    %cst_89 = arith.constant dense<0.000000e+00> : vector<1x8xf32>
    %141 = vector.multi_reduction <add>, %140, %cst_89 [2] : vector<1x8x8xf32> to vector<1x8xf32>
    %142 = vector.shape_cast %141 : vector<1x8xf32> to vector<1x8x1xf32>
    %143 = tpu.reciprocal %142 {approx = true} : vector<1x8x1xf32> -> vector<1x8x1xf32>
    %144 = vector.broadcast %143 : vector<1x8x1xf32> to vector<1x8x8xf32>
    %145 = arith.mulf %140, %144 : vector<1x8x8xf32>
    %146 = arith.truncf %145 : vector<1x8x8xf32> to vector<1x8x8xbf16>
    "tpu.trace_start"() <{level = 10 : i32, message = "bqk,bkd->bqd"}> : () -> ()
    %cst_90 = arith.constant dense<0.000000e+00> : vector<1x8x8xf32>
    %147 = tpu.matmul %146, %132, %cst_90 {dimension_numbers = #tpu.dot_dimension_numbers<[2], [1], [1], [2], [0, 0, 0, 1, 1, 2], [0], [0]>} : vector<1x8x8xbf16>, vector<1x8x8xbf16>, vector<1x8x8xf32> -> vector<1x8x8xf32>
    "tpu.trace_stop"() : () -> ()
    %148 = vector.shape_cast %147 : vector<1x8x8xf32> to vector<8x8xf32>
    %149 = arith.truncf %148 : vector<8x8xf32> to vector<8x8xbf16>
    %c2_91 = arith.constant 2 : index
    %c0_92 = arith.constant 0 : index
    %c0_93 = arith.constant 0 : index
    %150 = vector.load %arg10[%c2_91, %c0_92, %c0_93] : memref<4x8x32xbf16, #tpu.memory_space<vmem>>, vector<1x8x32xbf16>
    %151 = vector.shape_cast %150 : vector<1x8x32xbf16> to vector<8x32xbf16>
    %cst_94 = arith.constant dense<0.000000e+00> : vector<8x32xf32>
    %152 = tpu.matmul %149, %151, %cst_94 {dimension_numbers = #tpu.dot_dimension_numbers<[1], [0], [0], [1], [0, 0, 1, 1], [], []>} : vector<8x8xbf16>, vector<8x32xbf16>, vector<8x32xf32> -> vector<8x32xf32>
    %153 = arith.addf %105, %152 : vector<8x32xf32>
    %c3 = arith.constant 3 : index
    %c0_95 = arith.constant 0 : index
    %c0_96 = arith.constant 0 : index
    %154 = vector.load %arg4[%c3, %c0_95, %c0_96] : memref<4x32x8xbf16, #tpu.memory_space<vmem>>, vector<1x32x8xbf16>
    %155 = vector.shape_cast %154 : vector<1x32x8xbf16> to vector<32x8xbf16>
    %cst_97 = arith.constant dense<0.000000e+00> : vector<8x8xf32>
    %156 = tpu.matmul %8, %155, %cst_97 {dimension_numbers = #tpu.dot_dimension_numbers<[1], [0], [0], [1], [0, 0, 1, 1], [], []>} : vector<8x32xbf16>, vector<32x8xbf16>, vector<8x8xf32> -> vector<8x8xf32>
    %c3_98 = arith.constant 3 : index
    %c0_99 = arith.constant 0 : index
    %c0_100 = arith.constant 0 : index
    %157 = vector.load %arg7[%c3_98, %c0_99, %c0_100] : memref<4x1x8xf32, #tpu.memory_space<vmem>>, vector<1x1x8xf32>
    %158 = vector.shape_cast %157 : vector<1x1x8xf32> to vector<1x8xf32>
    %159 = vector.broadcast %158 : vector<1x8xf32> to vector<8x8xf32>
    %160 = arith.addf %156, %159 : vector<8x8xf32>
    %c3_101 = arith.constant 3 : index
    %c0_102 = arith.constant 0 : index
    %c0_103 = arith.constant 0 : index
    %161 = vector.load %arg5[%c3_101, %c0_102, %c0_103] : memref<4x32x8xbf16, #tpu.memory_space<vmem>>, vector<1x32x8xbf16>
    %162 = vector.shape_cast %161 : vector<1x32x8xbf16> to vector<32x8xbf16>
    %cst_104 = arith.constant dense<0.000000e+00> : vector<8x8xf32>
    %163 = tpu.matmul %8, %162, %cst_104 {dimension_numbers = #tpu.dot_dimension_numbers<[1], [0], [0], [1], [0, 0, 1, 1], [], []>} : vector<8x32xbf16>, vector<32x8xbf16>, vector<8x8xf32> -> vector<8x8xf32>
    %c3_105 = arith.constant 3 : index
    %c0_106 = arith.constant 0 : index
    %c0_107 = arith.constant 0 : index
    %164 = vector.load %arg8[%c3_105, %c0_106, %c0_107] : memref<4x1x8xf32, #tpu.memory_space<vmem>>, vector<1x1x8xf32>
    %165 = vector.shape_cast %164 : vector<1x1x8xf32> to vector<1x8xf32>
    %166 = vector.broadcast %165 : vector<1x8xf32> to vector<8x8xf32>
    %167 = arith.addf %163, %166 : vector<8x8xf32>
    %c3_108 = arith.constant 3 : index
    %c0_109 = arith.constant 0 : index
    %c0_110 = arith.constant 0 : index
    %168 = vector.load %arg6[%c3_108, %c0_109, %c0_110] : memref<4x32x8xbf16, #tpu.memory_space<vmem>>, vector<1x32x8xbf16>
    %169 = vector.shape_cast %168 : vector<1x32x8xbf16> to vector<32x8xbf16>
    %cst_111 = arith.constant dense<0.000000e+00> : vector<8x8xf32>
    %170 = tpu.matmul %8, %169, %cst_111 {dimension_numbers = #tpu.dot_dimension_numbers<[1], [0], [0], [1], [0, 0, 1, 1], [], []>} : vector<8x32xbf16>, vector<32x8xbf16>, vector<8x8xf32> -> vector<8x8xf32>
    %c3_112 = arith.constant 3 : index
    %c0_113 = arith.constant 0 : index
    %c0_114 = arith.constant 0 : index
    %171 = vector.load %arg9[%c3_112, %c0_113, %c0_114] : memref<4x1x8xf32, #tpu.memory_space<vmem>>, vector<1x1x8xf32>
    %172 = vector.shape_cast %171 : vector<1x1x8xf32> to vector<1x8xf32>
    %173 = vector.broadcast %172 : vector<1x8xf32> to vector<8x8xf32>
    %174 = arith.addf %170, %173 : vector<8x8xf32>
    %175 = arith.truncf %160 : vector<8x8xf32> to vector<8x8xbf16>
    %176 = vector.shape_cast %175 : vector<8x8xbf16> to vector<1x8x8xbf16>
    %177 = arith.truncf %167 : vector<8x8xf32> to vector<8x8xbf16>
    %178 = vector.shape_cast %177 : vector<8x8xbf16> to vector<1x8x8xbf16>
    %179 = arith.truncf %174 : vector<8x8xf32> to vector<8x8xbf16>
    %180 = vector.shape_cast %179 : vector<8x8xbf16> to vector<1x8x8xbf16>
    "tpu.trace_start"() <{level = 10 : i32, message = "bqd,bkd->bqk"}> : () -> ()
    %cst_115 = arith.constant dense<0.000000e+00> : vector<1x8x8xf32>
    %181 = tpu.matmul %176, %178, %cst_115 {dimension_numbers = #tpu.dot_dimension_numbers<[2], [2], [1], [1], [0, 0, 0, 1, 1, 1], [0], [0]>} : vector<1x8x8xbf16>, vector<1x8x8xbf16>, vector<1x8x8xf32> -> vector<1x8x8xf32>
    "tpu.trace_stop"() : () -> ()
    %cst_116 = arith.constant 0.353553385 : f32
    %182 = vector.broadcast %cst_116 : f32 to vector<1x8x8xf32>
    %183 = arith.mulf %181, %182 : vector<1x8x8xf32>
    %cst_117 = arith.constant dense<0xFF800000> : vector<1x8xf32>
    %184 = vector.multi_reduction <maximumf>, %183, %cst_117 [2] : vector<1x8x8xf32> to vector<1x8xf32>
    %185 = vector.shape_cast %184 : vector<1x8xf32> to vector<1x8x1xf32>
    %186 = vector.broadcast %185 : vector<1x8x1xf32> to vector<1x8x8xf32>
    %187 = arith.subf %183, %186 : vector<1x8x8xf32>
    %188 = math.exp %187 : vector<1x8x8xf32>
    %cst_118 = arith.constant dense<0.000000e+00> : vector<1x8xf32>
    %189 = vector.multi_reduction <add>, %188, %cst_118 [2] : vector<1x8x8xf32> to vector<1x8xf32>
    %190 = vector.shape_cast %189 : vector<1x8xf32> to vector<1x8x1xf32>
    %191 = tpu.reciprocal %190 {approx = true} : vector<1x8x1xf32> -> vector<1x8x1xf32>
    %192 = vector.broadcast %191 : vector<1x8x1xf32> to vector<1x8x8xf32>
    %193 = arith.mulf %188, %192 : vector<1x8x8xf32>
    %194 = arith.truncf %193 : vector<1x8x8xf32> to vector<1x8x8xbf16>
    "tpu.trace_start"() <{level = 10 : i32, message = "bqk,bkd->bqd"}> : () -> ()
    %cst_119 = arith.constant dense<0.000000e+00> : vector<1x8x8xf32>
    %195 = tpu.matmul %194, %180, %cst_119 {dimension_numbers = #tpu.dot_dimension_numbers<[2], [1], [1], [2], [0, 0, 0, 1, 1, 2], [0], [0]>} : vector<1x8x8xbf16>, vector<1x8x8xbf16>, vector<1x8x8xf32> -> vector<1x8x8xf32>
    "tpu.trace_stop"() : () -> ()
    %196 = vector.shape_cast %195 : vector<1x8x8xf32> to vector<8x8xf32>
    %197 = arith.truncf %196 : vector<8x8xf32> to vector<8x8xbf16>
    %c3_120 = arith.constant 3 : index
    %c0_121 = arith.constant 0 : index
    %c0_122 = arith.constant 0 : index
    %198 = vector.load %arg10[%c3_120, %c0_121, %c0_122] : memref<4x8x32xbf16, #tpu.memory_space<vmem>>, vector<1x8x32xbf16>
    %199 = vector.shape_cast %198 : vector<1x8x32xbf16> to vector<8x32xbf16>
    %cst_123 = arith.constant dense<0.000000e+00> : vector<8x32xf32>
    %200 = tpu.matmul %197, %199, %cst_123 {dimension_numbers = #tpu.dot_dimension_numbers<[1], [0], [0], [1], [0, 0, 1, 1], [], []>} : vector<8x8xbf16>, vector<8x32xbf16>, vector<8x32xf32> -> vector<8x32xf32>
    %201 = arith.addf %153, %200 : vector<8x32xf32>
    %c0_124 = arith.constant 0 : index
    %c0_125 = arith.constant 0 : index
    %202 = vector.load %arg11[%c0_124, %c0_125] : memref<1x32xf32, #tpu.memory_space<vmem>>, vector<1x32xf32>
    %203 = vector.broadcast %202 : vector<1x32xf32> to vector<8x32xf32>
    %204 = arith.addf %201, %203 : vector<8x32xf32>
    %205 = arith.addf %7, %204 : vector<8x32xf32>
    %c0_126 = arith.constant 0 : index
    %c0_127 = arith.constant 0 : index
    %206 = vector.load %arg16[%c0_126, %c0_127] : memref<1x32xf32, #tpu.memory_space<vmem>>, vector<1x32xf32>
    %c0_128 = arith.constant 0 : index
    %c0_129 = arith.constant 0 : index
    %207 = vector.load %arg17[%c0_128, %c0_129] : memref<1x32xf32, #tpu.memory_space<vmem>>, vector<1x32xf32>
    %cst_130 = arith.constant dense<0.000000e+00> : vector<8xf32>
    %208 = vector.multi_reduction <add>, %205, %cst_130 [1] : vector<8x32xf32> to vector<8xf32>
    %209 = vector.shape_cast %208 : vector<8xf32> to vector<8x1xf32>
    %cst_131 = arith.constant 3.200000e+01 : f32
    %210 = vector.broadcast %cst_131 : f32 to vector<8x1xf32>
    %211 = arith.divf %209, %210 : vector<8x1xf32>
    %212 = vector.broadcast %211 : vector<8x1xf32> to vector<8x32xf32>
    %213 = arith.subf %205, %212 : vector<8x32xf32>
    %214 = arith.mulf %213, %213 : vector<8x32xf32>
    %cst_132 = arith.constant dense<0.000000e+00> : vector<8xf32>
    %215 = vector.multi_reduction <add>, %214, %cst_132 [1] : vector<8x32xf32> to vector<8xf32>
    %216 = vector.shape_cast %215 : vector<8xf32> to vector<8x1xf32>
    %cst_133 = arith.constant 3.200000e+01 : f32
    %217 = vector.broadcast %cst_133 : f32 to vector<8x1xf32>
    %218 = arith.divf %216, %217 : vector<8x1xf32>
    %cst_134 = arith.constant 9.99999974E-6 : f32
    %219 = vector.broadcast %cst_134 : f32 to vector<8x1xf32>
    %220 = arith.addf %218, %219 : vector<8x1xf32>
    %221 = math.rsqrt %220 : vector<8x1xf32>
    %222 = vector.broadcast %221 : vector<8x1xf32> to vector<8x32xf32>
    %223 = arith.mulf %213, %222 : vector<8x32xf32>
    %224 = vector.broadcast %206 : vector<1x32xf32> to vector<8x32xf32>
    %225 = arith.mulf %223, %224 : vector<8x32xf32>
    %226 = vector.broadcast %207 : vector<1x32xf32> to vector<8x32xf32>
    %227 = arith.addf %225, %226 : vector<8x32xf32>
    %228 = arith.truncf %227 : vector<8x32xf32> to vector<8x32xbf16>
    %c0_135 = arith.constant 0 : index
    %c0_136 = arith.constant 0 : index
    %229 = vector.load %arg12[%c0_135, %c0_136] : memref<32x2048xbf16, #tpu.memory_space<vmem>>, vector<32x2048xbf16>
    %cst_137 = arith.constant dense<0.000000e+00> : vector<8x2048xf32>
    %230 = tpu.matmul %228, %229, %cst_137 {dimension_numbers = #tpu.dot_dimension_numbers<[1], [0], [0], [1], [0, 0, 1, 1], [], []>} : vector<8x32xbf16>, vector<32x2048xbf16>, vector<8x2048xf32> -> vector<8x2048xf32>
    %c0_138 = arith.constant 0 : index
    %c0_139 = arith.constant 0 : index
    %231 = vector.load %arg13[%c0_138, %c0_139] : memref<1x2048xf32, #tpu.memory_space<vmem>>, vector<1x2048xf32>
    %232 = vector.broadcast %231 : vector<1x2048xf32> to vector<8x2048xf32>
    %233 = arith.addf %230, %232 : vector<8x2048xf32>
    %cst_140 = arith.constant 0.000000e+00 : f32
    %234 = vector.broadcast %cst_140 : f32 to vector<8x2048xf32>
    %235 = arith.maximumf %233, %234 : vector<8x2048xf32>
    %236 = arith.truncf %235 : vector<8x2048xf32> to vector<8x2048xbf16>
    %c0_141 = arith.constant 0 : index
    %c0_142 = arith.constant 0 : index
    %237 = vector.load %arg14[%c0_141, %c0_142] : memref<2048x32xbf16, #tpu.memory_space<vmem>>, vector<2048x32xbf16>
    %cst_143 = arith.constant dense<0.000000e+00> : vector<8x32xf32>
    %238 = tpu.matmul %236, %237, %cst_143 {dimension_numbers = #tpu.dot_dimension_numbers<[1], [0], [0], [1], [0, 0, 1, 1], [], []>} : vector<8x2048xbf16>, vector<2048x32xbf16>, vector<8x32xf32> -> vector<8x32xf32>
    %c0_144 = arith.constant 0 : index
    %c0_145 = arith.constant 0 : index
    %239 = vector.load %arg15[%c0_144, %c0_145] : memref<1x32xf32, #tpu.memory_space<vmem>>, vector<1x32xf32>
    %240 = vector.broadcast %239 : vector<1x32xf32> to vector<8x32xf32>
    %241 = arith.addf %238, %240 : vector<8x32xf32>
    %242 = arith.addf %227, %241 : vector<8x32xf32>
    %c0_146 = arith.constant 0 : index
    %c0_147 = arith.constant 0 : index
    %243 = vector.load %arg18[%c0_146, %c0_147] : memref<1x32xf32, #tpu.memory_space<vmem>>, vector<1x32xf32>
    %c0_148 = arith.constant 0 : index
    %c0_149 = arith.constant 0 : index
    %244 = vector.load %arg19[%c0_148, %c0_149] : memref<1x32xf32, #tpu.memory_space<vmem>>, vector<1x32xf32>
    %cst_150 = arith.constant dense<0.000000e+00> : vector<8xf32>
    %245 = vector.multi_reduction <add>, %242, %cst_150 [1] : vector<8x32xf32> to vector<8xf32>
    %246 = vector.shape_cast %245 : vector<8xf32> to vector<8x1xf32>
    %cst_151 = arith.constant 3.200000e+01 : f32
    %247 = vector.broadcast %cst_151 : f32 to vector<8x1xf32>
    %248 = arith.divf %246, %247 : vector<8x1xf32>
    %249 = vector.broadcast %248 : vector<8x1xf32> to vector<8x32xf32>
    %250 = arith.subf %242, %249 : vector<8x32xf32>
    %251 = arith.mulf %250, %250 : vector<8x32xf32>
    %cst_152 = arith.constant dense<0.000000e+00> : vector<8xf32>
    %252 = vector.multi_reduction <add>, %251, %cst_152 [1] : vector<8x32xf32> to vector<8xf32>
    %253 = vector.shape_cast %252 : vector<8xf32> to vector<8x1xf32>
    %cst_153 = arith.constant 3.200000e+01 : f32
    %254 = vector.broadcast %cst_153 : f32 to vector<8x1xf32>
    %255 = arith.divf %253, %254 : vector<8x1xf32>
    %cst_154 = arith.constant 9.99999974E-6 : f32
    %256 = vector.broadcast %cst_154 : f32 to vector<8x1xf32>
    %257 = arith.addf %255, %256 : vector<8x1xf32>
    %258 = math.rsqrt %257 : vector<8x1xf32>
    %259 = vector.broadcast %258 : vector<8x1xf32> to vector<8x32xf32>
    %260 = arith.mulf %250, %259 : vector<8x32xf32>
    %261 = vector.broadcast %243 : vector<1x32xf32> to vector<8x32xf32>
    %262 = arith.mulf %260, %261 : vector<8x32xf32>
    %263 = vector.broadcast %244 : vector<1x32xf32> to vector<8x32xf32>
    %264 = arith.addf %262, %263 : vector<8x32xf32>
    %265 = arith.truncf %264 : vector<8x32xf32> to vector<8x32xbf16>
    %cst_155 = arith.constant 0.000000e+00 : f32
    %266 = vector.broadcast %cst_155 : f32 to vector<8x32xf32>
    %c0_156 = arith.constant 0 : index
    %c0_157 = arith.constant 0 : index
    %c0_158 = arith.constant 0 : index
    %267 = vector.load %arg20[%c0_156, %c0_157, %c0_158] : memref<4x32x8xbf16, #tpu.memory_space<vmem>>, vector<1x32x8xbf16>
    %268 = vector.shape_cast %267 : vector<1x32x8xbf16> to vector<32x8xbf16>
    %cst_159 = arith.constant dense<0.000000e+00> : vector<8x8xf32>
    %269 = tpu.matmul %265, %268, %cst_159 {dimension_numbers = #tpu.dot_dimension_numbers<[1], [0], [0], [1], [0, 0, 1, 1], [], []>} : vector<8x32xbf16>, vector<32x8xbf16>, vector<8x8xf32> -> vector<8x8xf32>
    %c0_160 = arith.constant 0 : index
    %c0_161 = arith.constant 0 : index
    %c0_162 = arith.constant 0 : index
    %270 = vector.load %arg23[%c0_160, %c0_161, %c0_162] : memref<4x1x8xf32, #tpu.memory_space<vmem>>, vector<1x1x8xf32>
    %271 = vector.shape_cast %270 : vector<1x1x8xf32> to vector<1x8xf32>
    %272 = vector.broadcast %271 : vector<1x8xf32> to vector<8x8xf32>
    %273 = arith.addf %269, %272 : vector<8x8xf32>
    %c0_163 = arith.constant 0 : index
    %c0_164 = arith.constant 0 : index
    %c0_165 = arith.constant 0 : index
    %274 = vector.load %arg21[%c0_163, %c0_164, %c0_165] : memref<4x32x8xbf16, #tpu.memory_space<vmem>>, vector<1x32x8xbf16>
    %275 = vector.shape_cast %274 : vector<1x32x8xbf16> to vector<32x8xbf16>
    %cst_166 = arith.constant dense<0.000000e+00> : vector<8x8xf32>
    %276 = tpu.matmul %265, %275, %cst_166 {dimension_numbers = #tpu.dot_dimension_numbers<[1], [0], [0], [1], [0, 0, 1, 1], [], []>} : vector<8x32xbf16>, vector<32x8xbf16>, vector<8x8xf32> -> vector<8x8xf32>
    %c0_167 = arith.constant 0 : index
    %c0_168 = arith.constant 0 : index
    %c0_169 = arith.constant 0 : index
    %277 = vector.load %arg24[%c0_167, %c0_168, %c0_169] : memref<4x1x8xf32, #tpu.memory_space<vmem>>, vector<1x1x8xf32>
    %278 = vector.shape_cast %277 : vector<1x1x8xf32> to vector<1x8xf32>
    %279 = vector.broadcast %278 : vector<1x8xf32> to vector<8x8xf32>
    %280 = arith.addf %276, %279 : vector<8x8xf32>
    %c0_170 = arith.constant 0 : index
    %c0_171 = arith.constant 0 : index
    %c0_172 = arith.constant 0 : index
    %281 = vector.load %arg22[%c0_170, %c0_171, %c0_172] : memref<4x32x8xbf16, #tpu.memory_space<vmem>>, vector<1x32x8xbf16>
    %282 = vector.shape_cast %281 : vector<1x32x8xbf16> to vector<32x8xbf16>
    %cst_173 = arith.constant dense<0.000000e+00> : vector<8x8xf32>
    %283 = tpu.matmul %265, %282, %cst_173 {dimension_numbers = #tpu.dot_dimension_numbers<[1], [0], [0], [1], [0, 0, 1, 1], [], []>} : vector<8x32xbf16>, vector<32x8xbf16>, vector<8x8xf32> -> vector<8x8xf32>
    %c0_174 = arith.constant 0 : index
    %c0_175 = arith.constant 0 : index
    %c0_176 = arith.constant 0 : index
    %284 = vector.load %arg25[%c0_174, %c0_175, %c0_176] : memref<4x1x8xf32, #tpu.memory_space<vmem>>, vector<1x1x8xf32>
    %285 = vector.shape_cast %284 : vector<1x1x8xf32> to vector<1x8xf32>
    %286 = vector.broadcast %285 : vector<1x8xf32> to vector<8x8xf32>
    %287 = arith.addf %283, %286 : vector<8x8xf32>
    %288 = arith.truncf %273 : vector<8x8xf32> to vector<8x8xbf16>
    %289 = vector.shape_cast %288 : vector<8x8xbf16> to vector<1x8x8xbf16>
    %290 = arith.truncf %280 : vector<8x8xf32> to vector<8x8xbf16>
    %291 = vector.shape_cast %290 : vector<8x8xbf16> to vector<1x8x8xbf16>
    %292 = arith.truncf %287 : vector<8x8xf32> to vector<8x8xbf16>
    %293 = vector.shape_cast %292 : vector<8x8xbf16> to vector<1x8x8xbf16>
    "tpu.trace_start"() <{level = 10 : i32, message = "bqd,bkd->bqk"}> : () -> ()
    %cst_177 = arith.constant dense<0.000000e+00> : vector<1x8x8xf32>
    %294 = tpu.matmul %289, %291, %cst_177 {dimension_numbers = #tpu.dot_dimension_numbers<[2], [2], [1], [1], [0, 0, 0, 1, 1, 1], [0], [0]>} : vector<1x8x8xbf16>, vector<1x8x8xbf16>, vector<1x8x8xf32> -> vector<1x8x8xf32>
    "tpu.trace_stop"() : () -> ()
    %cst_178 = arith.constant 0.353553385 : f32
    %295 = vector.broadcast %cst_178 : f32 to vector<1x8x8xf32>
    %296 = arith.mulf %294, %295 : vector<1x8x8xf32>
    %cst_179 = arith.constant dense<0xFF800000> : vector<1x8xf32>
    %297 = vector.multi_reduction <maximumf>, %296, %cst_179 [2] : vector<1x8x8xf32> to vector<1x8xf32>
    %298 = vector.shape_cast %297 : vector<1x8xf32> to vector<1x8x1xf32>
    %299 = vector.broadcast %298 : vector<1x8x1xf32> to vector<1x8x8xf32>
    %300 = arith.subf %296, %299 : vector<1x8x8xf32>
    %301 = math.exp %300 : vector<1x8x8xf32>
    %cst_180 = arith.constant dense<0.000000e+00> : vector<1x8xf32>
    %302 = vector.multi_reduction <add>, %301, %cst_180 [2] : vector<1x8x8xf32> to vector<1x8xf32>
    %303 = vector.shape_cast %302 : vector<1x8xf32> to vector<1x8x1xf32>
    %304 = tpu.reciprocal %303 {approx = true} : vector<1x8x1xf32> -> vector<1x8x1xf32>
    %305 = vector.broadcast %304 : vector<1x8x1xf32> to vector<1x8x8xf32>
    %306 = arith.mulf %301, %305 : vector<1x8x8xf32>
    %307 = arith.truncf %306 : vector<1x8x8xf32> to vector<1x8x8xbf16>
    "tpu.trace_start"() <{level = 10 : i32, message = "bqk,bkd->bqd"}> : () -> ()
    %cst_181 = arith.constant dense<0.000000e+00> : vector<1x8x8xf32>
    %308 = tpu.matmul %307, %293, %cst_181 {dimension_numbers = #tpu.dot_dimension_numbers<[2], [1], [1], [2], [0, 0, 0, 1, 1, 2], [0], [0]>} : vector<1x8x8xbf16>, vector<1x8x8xbf16>, vector<1x8x8xf32> -> vector<1x8x8xf32>
    "tpu.trace_stop"() : () -> ()
    %309 = vector.shape_cast %308 : vector<1x8x8xf32> to vector<8x8xf32>
    %310 = arith.truncf %309 : vector<8x8xf32> to vector<8x8xbf16>
    %c0_182 = arith.constant 0 : index
    %c0_183 = arith.constant 0 : index
    %c0_184 = arith.constant 0 : index
    %311 = vector.load %arg26[%c0_182, %c0_183, %c0_184] : memref<4x8x32xbf16, #tpu.memory_space<vmem>>, vector<1x8x32xbf16>
    %312 = vector.shape_cast %311 : vector<1x8x32xbf16> to vector<8x32xbf16>
    %cst_185 = arith.constant dense<0.000000e+00> : vector<8x32xf32>
    %313 = tpu.matmul %310, %312, %cst_185 {dimension_numbers = #tpu.dot_dimension_numbers<[1], [0], [0], [1], [0, 0, 1, 1], [], []>} : vector<8x8xbf16>, vector<8x32xbf16>, vector<8x32xf32> -> vector<8x32xf32>
    %314 = arith.addf %266, %313 : vector<8x32xf32>
    %c1_186 = arith.constant 1 : index
    %c0_187 = arith.constant 0 : index
    %c0_188 = arith.constant 0 : index
    %315 = vector.load %arg20[%c1_186, %c0_187, %c0_188] : memref<4x32x8xbf16, #tpu.memory_space<vmem>>, vector<1x32x8xbf16>
    %316 = vector.shape_cast %315 : vector<1x32x8xbf16> to vector<32x8xbf16>
    %cst_189 = arith.constant dense<0.000000e+00> : vector<8x8xf32>
    %317 = tpu.matmul %265, %316, %cst_189 {dimension_numbers = #tpu.dot_dimension_numbers<[1], [0], [0], [1], [0, 0, 1, 1], [], []>} : vector<8x32xbf16>, vector<32x8xbf16>, vector<8x8xf32> -> vector<8x8xf32>
    %c1_190 = arith.constant 1 : index
    %c0_191 = arith.constant 0 : index
    %c0_192 = arith.constant 0 : index
    %318 = vector.load %arg23[%c1_190, %c0_191, %c0_192] : memref<4x1x8xf32, #tpu.memory_space<vmem>>, vector<1x1x8xf32>
    %319 = vector.shape_cast %318 : vector<1x1x8xf32> to vector<1x8xf32>
    %320 = vector.broadcast %319 : vector<1x8xf32> to vector<8x8xf32>
    %321 = arith.addf %317, %320 : vector<8x8xf32>
    %c1_193 = arith.constant 1 : index
    %c0_194 = arith.constant 0 : index
    %c0_195 = arith.constant 0 : index
    %322 = vector.load %arg21[%c1_193, %c0_194, %c0_195] : memref<4x32x8xbf16, #tpu.memory_space<vmem>>, vector<1x32x8xbf16>
    %323 = vector.shape_cast %322 : vector<1x32x8xbf16> to vector<32x8xbf16>
    %cst_196 = arith.constant dense<0.000000e+00> : vector<8x8xf32>
    %324 = tpu.matmul %265, %323, %cst_196 {dimension_numbers = #tpu.dot_dimension_numbers<[1], [0], [0], [1], [0, 0, 1, 1], [], []>} : vector<8x32xbf16>, vector<32x8xbf16>, vector<8x8xf32> -> vector<8x8xf32>
    %c1_197 = arith.constant 1 : index
    %c0_198 = arith.constant 0 : index
    %c0_199 = arith.constant 0 : index
    %325 = vector.load %arg24[%c1_197, %c0_198, %c0_199] : memref<4x1x8xf32, #tpu.memory_space<vmem>>, vector<1x1x8xf32>
    %326 = vector.shape_cast %325 : vector<1x1x8xf32> to vector<1x8xf32>
    %327 = vector.broadcast %326 : vector<1x8xf32> to vector<8x8xf32>
    %328 = arith.addf %324, %327 : vector<8x8xf32>
    %c1_200 = arith.constant 1 : index
    %c0_201 = arith.constant 0 : index
    %c0_202 = arith.constant 0 : index
    %329 = vector.load %arg22[%c1_200, %c0_201, %c0_202] : memref<4x32x8xbf16, #tpu.memory_space<vmem>>, vector<1x32x8xbf16>
    %330 = vector.shape_cast %329 : vector<1x32x8xbf16> to vector<32x8xbf16>
    %cst_203 = arith.constant dense<0.000000e+00> : vector<8x8xf32>
    %331 = tpu.matmul %265, %330, %cst_203 {dimension_numbers = #tpu.dot_dimension_numbers<[1], [0], [0], [1], [0, 0, 1, 1], [], []>} : vector<8x32xbf16>, vector<32x8xbf16>, vector<8x8xf32> -> vector<8x8xf32>
    %c1_204 = arith.constant 1 : index
    %c0_205 = arith.constant 0 : index
    %c0_206 = arith.constant 0 : index
    %332 = vector.load %arg25[%c1_204, %c0_205, %c0_206] : memref<4x1x8xf32, #tpu.memory_space<vmem>>, vector<1x1x8xf32>
    %333 = vector.shape_cast %332 : vector<1x1x8xf32> to vector<1x8xf32>
    %334 = vector.broadcast %333 : vector<1x8xf32> to vector<8x8xf32>
    %335 = arith.addf %331, %334 : vector<8x8xf32>
    %336 = arith.truncf %321 : vector<8x8xf32> to vector<8x8xbf16>
    %337 = vector.shape_cast %336 : vector<8x8xbf16> to vector<1x8x8xbf16>
    %338 = arith.truncf %328 : vector<8x8xf32> to vector<8x8xbf16>
    %339 = vector.shape_cast %338 : vector<8x8xbf16> to vector<1x8x8xbf16>
    %340 = arith.truncf %335 : vector<8x8xf32> to vector<8x8xbf16>
    %341 = vector.shape_cast %340 : vector<8x8xbf16> to vector<1x8x8xbf16>
    "tpu.trace_start"() <{level = 10 : i32, message = "bqd,bkd->bqk"}> : () -> ()
    %cst_207 = arith.constant dense<0.000000e+00> : vector<1x8x8xf32>
    %342 = tpu.matmul %337, %339, %cst_207 {dimension_numbers = #tpu.dot_dimension_numbers<[2], [2], [1], [1], [0, 0, 0, 1, 1, 1], [0], [0]>} : vector<1x8x8xbf16>, vector<1x8x8xbf16>, vector<1x8x8xf32> -> vector<1x8x8xf32>
    "tpu.trace_stop"() : () -> ()
    %cst_208 = arith.constant 0.353553385 : f32
    %343 = vector.broadcast %cst_208 : f32 to vector<1x8x8xf32>
    %344 = arith.mulf %342, %343 : vector<1x8x8xf32>
    %cst_209 = arith.constant dense<0xFF800000> : vector<1x8xf32>
    %345 = vector.multi_reduction <maximumf>, %344, %cst_209 [2] : vector<1x8x8xf32> to vector<1x8xf32>
    %346 = vector.shape_cast %345 : vector<1x8xf32> to vector<1x8x1xf32>
    %347 = vector.broadcast %346 : vector<1x8x1xf32> to vector<1x8x8xf32>
    %348 = arith.subf %344, %347 : vector<1x8x8xf32>
    %349 = math.exp %348 : vector<1x8x8xf32>
    %cst_210 = arith.constant dense<0.000000e+00> : vector<1x8xf32>
    %350 = vector.multi_reduction <add>, %349, %cst_210 [2] : vector<1x8x8xf32> to vector<1x8xf32>
    %351 = vector.shape_cast %350 : vector<1x8xf32> to vector<1x8x1xf32>
    %352 = tpu.reciprocal %351 {approx = true} : vector<1x8x1xf32> -> vector<1x8x1xf32>
    %353 = vector.broadcast %352 : vector<1x8x1xf32> to vector<1x8x8xf32>
    %354 = arith.mulf %349, %353 : vector<1x8x8xf32>
    %355 = arith.truncf %354 : vector<1x8x8xf32> to vector<1x8x8xbf16>
    "tpu.trace_start"() <{level = 10 : i32, message = "bqk,bkd->bqd"}> : () -> ()
    %cst_211 = arith.constant dense<0.000000e+00> : vector<1x8x8xf32>
    %356 = tpu.matmul %355, %341, %cst_211 {dimension_numbers = #tpu.dot_dimension_numbers<[2], [1], [1], [2], [0, 0, 0, 1, 1, 2], [0], [0]>} : vector<1x8x8xbf16>, vector<1x8x8xbf16>, vector<1x8x8xf32> -> vector<1x8x8xf32>
    "tpu.trace_stop"() : () -> ()
    %357 = vector.shape_cast %356 : vector<1x8x8xf32> to vector<8x8xf32>
    %358 = arith.truncf %357 : vector<8x8xf32> to vector<8x8xbf16>
    %c1_212 = arith.constant 1 : index
    %c0_213 = arith.constant 0 : index
    %c0_214 = arith.constant 0 : index
    %359 = vector.load %arg26[%c1_212, %c0_213, %c0_214] : memref<4x8x32xbf16, #tpu.memory_space<vmem>>, vector<1x8x32xbf16>
    %360 = vector.shape_cast %359 : vector<1x8x32xbf16> to vector<8x32xbf16>
    %cst_215 = arith.constant dense<0.000000e+00> : vector<8x32xf32>
    %361 = tpu.matmul %358, %360, %cst_215 {dimension_numbers = #tpu.dot_dimension_numbers<[1], [0], [0], [1], [0, 0, 1, 1], [], []>} : vector<8x8xbf16>, vector<8x32xbf16>, vector<8x32xf32> -> vector<8x32xf32>
    %362 = arith.addf %314, %361 : vector<8x32xf32>
    %c2_216 = arith.constant 2 : index
    %c0_217 = arith.constant 0 : index
    %c0_218 = arith.constant 0 : index
    %363 = vector.load %arg20[%c2_216, %c0_217, %c0_218] : memref<4x32x8xbf16, #tpu.memory_space<vmem>>, vector<1x32x8xbf16>
    %364 = vector.shape_cast %363 : vector<1x32x8xbf16> to vector<32x8xbf16>
    %cst_219 = arith.constant dense<0.000000e+00> : vector<8x8xf32>
    %365 = tpu.matmul %265, %364, %cst_219 {dimension_numbers = #tpu.dot_dimension_numbers<[1], [0], [0], [1], [0, 0, 1, 1], [], []>} : vector<8x32xbf16>, vector<32x8xbf16>, vector<8x8xf32> -> vector<8x8xf32>
    %c2_220 = arith.constant 2 : index
    %c0_221 = arith.constant 0 : index
    %c0_222 = arith.constant 0 : index
    %366 = vector.load %arg23[%c2_220, %c0_221, %c0_222] : memref<4x1x8xf32, #tpu.memory_space<vmem>>, vector<1x1x8xf32>
    %367 = vector.shape_cast %366 : vector<1x1x8xf32> to vector<1x8xf32>
    %368 = vector.broadcast %367 : vector<1x8xf32> to vector<8x8xf32>
    %369 = arith.addf %365, %368 : vector<8x8xf32>
    %c2_223 = arith.constant 2 : index
    %c0_224 = arith.constant 0 : index
    %c0_225 = arith.constant 0 : index
    %370 = vector.load %arg21[%c2_223, %c0_224, %c0_225] : memref<4x32x8xbf16, #tpu.memory_space<vmem>>, vector<1x32x8xbf16>
    %371 = vector.shape_cast %370 : vector<1x32x8xbf16> to vector<32x8xbf16>
    %cst_226 = arith.constant dense<0.000000e+00> : vector<8x8xf32>
    %372 = tpu.matmul %265, %371, %cst_226 {dimension_numbers = #tpu.dot_dimension_numbers<[1], [0], [0], [1], [0, 0, 1, 1], [], []>} : vector<8x32xbf16>, vector<32x8xbf16>, vector<8x8xf32> -> vector<8x8xf32>
    %c2_227 = arith.constant 2 : index
    %c0_228 = arith.constant 0 : index
    %c0_229 = arith.constant 0 : index
    %373 = vector.load %arg24[%c2_227, %c0_228, %c0_229] : memref<4x1x8xf32, #tpu.memory_space<vmem>>, vector<1x1x8xf32>
    %374 = vector.shape_cast %373 : vector<1x1x8xf32> to vector<1x8xf32>
    %375 = vector.broadcast %374 : vector<1x8xf32> to vector<8x8xf32>
    %376 = arith.addf %372, %375 : vector<8x8xf32>
    %c2_230 = arith.constant 2 : index
    %c0_231 = arith.constant 0 : index
    %c0_232 = arith.constant 0 : index
    %377 = vector.load %arg22[%c2_230, %c0_231, %c0_232] : memref<4x32x8xbf16, #tpu.memory_space<vmem>>, vector<1x32x8xbf16>
    %378 = vector.shape_cast %377 : vector<1x32x8xbf16> to vector<32x8xbf16>
    %cst_233 = arith.constant dense<0.000000e+00> : vector<8x8xf32>
    %379 = tpu.matmul %265, %378, %cst_233 {dimension_numbers = #tpu.dot_dimension_numbers<[1], [0], [0], [1], [0, 0, 1, 1], [], []>} : vector<8x32xbf16>, vector<32x8xbf16>, vector<8x8xf32> -> vector<8x8xf32>
    %c2_234 = arith.constant 2 : index
    %c0_235 = arith.constant 0 : index
    %c0_236 = arith.constant 0 : index
    %380 = vector.load %arg25[%c2_234, %c0_235, %c0_236] : memref<4x1x8xf32, #tpu.memory_space<vmem>>, vector<1x1x8xf32>
    %381 = vector.shape_cast %380 : vector<1x1x8xf32> to vector<1x8xf32>
    %382 = vector.broadcast %381 : vector<1x8xf32> to vector<8x8xf32>
    %383 = arith.addf %379, %382 : vector<8x8xf32>
    %384 = arith.truncf %369 : vector<8x8xf32> to vector<8x8xbf16>
    %385 = vector.shape_cast %384 : vector<8x8xbf16> to vector<1x8x8xbf16>
    %386 = arith.truncf %376 : vector<8x8xf32> to vector<8x8xbf16>
    %387 = vector.shape_cast %386 : vector<8x8xbf16> to vector<1x8x8xbf16>
    %388 = arith.truncf %383 : vector<8x8xf32> to vector<8x8xbf16>
    %389 = vector.shape_cast %388 : vector<8x8xbf16> to vector<1x8x8xbf16>
    "tpu.trace_start"() <{level = 10 : i32, message = "bqd,bkd->bqk"}> : () -> ()
    %cst_237 = arith.constant dense<0.000000e+00> : vector<1x8x8xf32>
    %390 = tpu.matmul %385, %387, %cst_237 {dimension_numbers = #tpu.dot_dimension_numbers<[2], [2], [1], [1], [0, 0, 0, 1, 1, 1], [0], [0]>} : vector<1x8x8xbf16>, vector<1x8x8xbf16>, vector<1x8x8xf32> -> vector<1x8x8xf32>
    "tpu.trace_stop"() : () -> ()
    %cst_238 = arith.constant 0.353553385 : f32
    %391 = vector.broadcast %cst_238 : f32 to vector<1x8x8xf32>
    %392 = arith.mulf %390, %391 : vector<1x8x8xf32>
    %cst_239 = arith.constant dense<0xFF800000> : vector<1x8xf32>
    %393 = vector.multi_reduction <maximumf>, %392, %cst_239 [2] : vector<1x8x8xf32> to vector<1x8xf32>
    %394 = vector.shape_cast %393 : vector<1x8xf32> to vector<1x8x1xf32>
    %395 = vector.broadcast %394 : vector<1x8x1xf32> to vector<1x8x8xf32>
    %396 = arith.subf %392, %395 : vector<1x8x8xf32>
    %397 = math.exp %396 : vector<1x8x8xf32>
    %cst_240 = arith.constant dense<0.000000e+00> : vector<1x8xf32>
    %398 = vector.multi_reduction <add>, %397, %cst_240 [2] : vector<1x8x8xf32> to vector<1x8xf32>
    %399 = vector.shape_cast %398 : vector<1x8xf32> to vector<1x8x1xf32>
    %400 = tpu.reciprocal %399 {approx = true} : vector<1x8x1xf32> -> vector<1x8x1xf32>
    %401 = vector.broadcast %400 : vector<1x8x1xf32> to vector<1x8x8xf32>
    %402 = arith.mulf %397, %401 : vector<1x8x8xf32>
    %403 = arith.truncf %402 : vector<1x8x8xf32> to vector<1x8x8xbf16>
    "tpu.trace_start"() <{level = 10 : i32, message = "bqk,bkd->bqd"}> : () -> ()
    %cst_241 = arith.constant dense<0.000000e+00> : vector<1x8x8xf32>
    %404 = tpu.matmul %403, %389, %cst_241 {dimension_numbers = #tpu.dot_dimension_numbers<[2], [1], [1], [2], [0, 0, 0, 1, 1, 2], [0], [0]>} : vector<1x8x8xbf16>, vector<1x8x8xbf16>, vector<1x8x8xf32> -> vector<1x8x8xf32>
    "tpu.trace_stop"() : () -> ()
    %405 = vector.shape_cast %404 : vector<1x8x8xf32> to vector<8x8xf32>
    %406 = arith.truncf %405 : vector<8x8xf32> to vector<8x8xbf16>
    %c2_242 = arith.constant 2 : index
    %c0_243 = arith.constant 0 : index
    %c0_244 = arith.constant 0 : index
    %407 = vector.load %arg26[%c2_242, %c0_243, %c0_244] : memref<4x8x32xbf16, #tpu.memory_space<vmem>>, vector<1x8x32xbf16>
    %408 = vector.shape_cast %407 : vector<1x8x32xbf16> to vector<8x32xbf16>
    %cst_245 = arith.constant dense<0.000000e+00> : vector<8x32xf32>
    %409 = tpu.matmul %406, %408, %cst_245 {dimension_numbers = #tpu.dot_dimension_numbers<[1], [0], [0], [1], [0, 0, 1, 1], [], []>} : vector<8x8xbf16>, vector<8x32xbf16>, vector<8x32xf32> -> vector<8x32xf32>
    %410 = arith.addf %362, %409 : vector<8x32xf32>
    %c3_246 = arith.constant 3 : index
    %c0_247 = arith.constant 0 : index
    %c0_248 = arith.constant 0 : index
    %411 = vector.load %arg20[%c3_246, %c0_247, %c0_248] : memref<4x32x8xbf16, #tpu.memory_space<vmem>>, vector<1x32x8xbf16>
    %412 = vector.shape_cast %411 : vector<1x32x8xbf16> to vector<32x8xbf16>
    %cst_249 = arith.constant dense<0.000000e+00> : vector<8x8xf32>
    %413 = tpu.matmul %265, %412, %cst_249 {dimension_numbers = #tpu.dot_dimension_numbers<[1], [0], [0], [1], [0, 0, 1, 1], [], []>} : vector<8x32xbf16>, vector<32x8xbf16>, vector<8x8xf32> -> vector<8x8xf32>
    %c3_250 = arith.constant 3 : index
    %c0_251 = arith.constant 0 : index
    %c0_252 = arith.constant 0 : index
    %414 = vector.load %arg23[%c3_250, %c0_251, %c0_252] : memref<4x1x8xf32, #tpu.memory_space<vmem>>, vector<1x1x8xf32>
    %415 = vector.shape_cast %414 : vector<1x1x8xf32> to vector<1x8xf32>
    %416 = vector.broadcast %415 : vector<1x8xf32> to vector<8x8xf32>
    %417 = arith.addf %413, %416 : vector<8x8xf32>
    %c3_253 = arith.constant 3 : index
    %c0_254 = arith.constant 0 : index
    %c0_255 = arith.constant 0 : index
    %418 = vector.load %arg21[%c3_253, %c0_254, %c0_255] : memref<4x32x8xbf16, #tpu.memory_space<vmem>>, vector<1x32x8xbf16>
    %419 = vector.shape_cast %418 : vector<1x32x8xbf16> to vector<32x8xbf16>
    %cst_256 = arith.constant dense<0.000000e+00> : vector<8x8xf32>
    %420 = tpu.matmul %265, %419, %cst_256 {dimension_numbers = #tpu.dot_dimension_numbers<[1], [0], [0], [1], [0, 0, 1, 1], [], []>} : vector<8x32xbf16>, vector<32x8xbf16>, vector<8x8xf32> -> vector<8x8xf32>
    %c3_257 = arith.constant 3 : index
    %c0_258 = arith.constant 0 : index
    %c0_259 = arith.constant 0 : index
    %421 = vector.load %arg24[%c3_257, %c0_258, %c0_259] : memref<4x1x8xf32, #tpu.memory_space<vmem>>, vector<1x1x8xf32>
    %422 = vector.shape_cast %421 : vector<1x1x8xf32> to vector<1x8xf32>
    %423 = vector.broadcast %422 : vector<1x8xf32> to vector<8x8xf32>
    %424 = arith.addf %420, %423 : vector<8x8xf32>
    %c3_260 = arith.constant 3 : index
    %c0_261 = arith.constant 0 : index
    %c0_262 = arith.constant 0 : index
    %425 = vector.load %arg22[%c3_260, %c0_261, %c0_262] : memref<4x32x8xbf16, #tpu.memory_space<vmem>>, vector<1x32x8xbf16>
    %426 = vector.shape_cast %425 : vector<1x32x8xbf16> to vector<32x8xbf16>
    %cst_263 = arith.constant dense<0.000000e+00> : vector<8x8xf32>
    %427 = tpu.matmul %265, %426, %cst_263 {dimension_numbers = #tpu.dot_dimension_numbers<[1], [0], [0], [1], [0, 0, 1, 1], [], []>} : vector<8x32xbf16>, vector<32x8xbf16>, vector<8x8xf32> -> vector<8x8xf32>
    %c3_264 = arith.constant 3 : index
    %c0_265 = arith.constant 0 : index
    %c0_266 = arith.constant 0 : index
    %428 = vector.load %arg25[%c3_264, %c0_265, %c0_266] : memref<4x1x8xf32, #tpu.memory_space<vmem>>, vector<1x1x8xf32>
    %429 = vector.shape_cast %428 : vector<1x1x8xf32> to vector<1x8xf32>
    %430 = vector.broadcast %429 : vector<1x8xf32> to vector<8x8xf32>
    %431 = arith.addf %427, %430 : vector<8x8xf32>
    %432 = arith.truncf %417 : vector<8x8xf32> to vector<8x8xbf16>
    %433 = vector.shape_cast %432 : vector<8x8xbf16> to vector<1x8x8xbf16>
    %434 = arith.truncf %424 : vector<8x8xf32> to vector<8x8xbf16>
    %435 = vector.shape_cast %434 : vector<8x8xbf16> to vector<1x8x8xbf16>
    %436 = arith.truncf %431 : vector<8x8xf32> to vector<8x8xbf16>
    %437 = vector.shape_cast %436 : vector<8x8xbf16> to vector<1x8x8xbf16>
    "tpu.trace_start"() <{level = 10 : i32, message = "bqd,bkd->bqk"}> : () -> ()
    %cst_267 = arith.constant dense<0.000000e+00> : vector<1x8x8xf32>
    %438 = tpu.matmul %433, %435, %cst_267 {dimension_numbers = #tpu.dot_dimension_numbers<[2], [2], [1], [1], [0, 0, 0, 1, 1, 1], [0], [0]>} : vector<1x8x8xbf16>, vector<1x8x8xbf16>, vector<1x8x8xf32> -> vector<1x8x8xf32>
    "tpu.trace_stop"() : () -> ()
    %cst_268 = arith.constant 0.353553385 : f32
    %439 = vector.broadcast %cst_268 : f32 to vector<1x8x8xf32>
    %440 = arith.mulf %438, %439 : vector<1x8x8xf32>
    %cst_269 = arith.constant dense<0xFF800000> : vector<1x8xf32>
    %441 = vector.multi_reduction <maximumf>, %440, %cst_269 [2] : vector<1x8x8xf32> to vector<1x8xf32>
    %442 = vector.shape_cast %441 : vector<1x8xf32> to vector<1x8x1xf32>
    %443 = vector.broadcast %442 : vector<1x8x1xf32> to vector<1x8x8xf32>
    %444 = arith.subf %440, %443 : vector<1x8x8xf32>
    %445 = math.exp %444 : vector<1x8x8xf32>
    %cst_270 = arith.constant dense<0.000000e+00> : vector<1x8xf32>
    %446 = vector.multi_reduction <add>, %445, %cst_270 [2] : vector<1x8x8xf32> to vector<1x8xf32>
    %447 = vector.shape_cast %446 : vector<1x8xf32> to vector<1x8x1xf32>
    %448 = tpu.reciprocal %447 {approx = true} : vector<1x8x1xf32> -> vector<1x8x1xf32>
    %449 = vector.broadcast %448 : vector<1x8x1xf32> to vector<1x8x8xf32>
    %450 = arith.mulf %445, %449 : vector<1x8x8xf32>
    %451 = arith.truncf %450 : vector<1x8x8xf32> to vector<1x8x8xbf16>
    "tpu.trace_start"() <{level = 10 : i32, message = "bqk,bkd->bqd"}> : () -> ()
    %cst_271 = arith.constant dense<0.000000e+00> : vector<1x8x8xf32>
    %452 = tpu.matmul %451, %437, %cst_271 {dimension_numbers = #tpu.dot_dimension_numbers<[2], [1], [1], [2], [0, 0, 0, 1, 1, 2], [0], [0]>} : vector<1x8x8xbf16>, vector<1x8x8xbf16>, vector<1x8x8xf32> -> vector<1x8x8xf32>
    "tpu.trace_stop"() : () -> ()
    %453 = vector.shape_cast %452 : vector<1x8x8xf32> to vector<8x8xf32>
    %454 = arith.truncf %453 : vector<8x8xf32> to vector<8x8xbf16>
    %c3_272 = arith.constant 3 : index
    %c0_273 = arith.constant 0 : index
    %c0_274 = arith.constant 0 : index
    %455 = vector.load %arg26[%c3_272, %c0_273, %c0_274] : memref<4x8x32xbf16, #tpu.memory_space<vmem>>, vector<1x8x32xbf16>
    %456 = vector.shape_cast %455 : vector<1x8x32xbf16> to vector<8x32xbf16>
    %cst_275 = arith.constant dense<0.000000e+00> : vector<8x32xf32>
    %457 = tpu.matmul %454, %456, %cst_275 {dimension_numbers = #tpu.dot_dimension_numbers<[1], [0], [0], [1], [0, 0, 1, 1], [], []>} : vector<8x8xbf16>, vector<8x32xbf16>, vector<8x32xf32> -> vector<8x32xf32>
    %458 = arith.addf %410, %457 : vector<8x32xf32>
    %c0_276 = arith.constant 0 : index
    %c0_277 = arith.constant 0 : index
    %459 = vector.load %arg27[%c0_276, %c0_277] : memref<1x32xf32, #tpu.memory_space<vmem>>, vector<1x32xf32>
    %460 = vector.broadcast %459 : vector<1x32xf32> to vector<8x32xf32>
    %461 = arith.addf %458, %460 : vector<8x32xf32>
    %462 = arith.addf %264, %461 : vector<8x32xf32>
    %c0_278 = arith.constant 0 : index
    %c0_279 = arith.constant 0 : index
    %463 = vector.load %arg32[%c0_278, %c0_279] : memref<1x32xf32, #tpu.memory_space<vmem>>, vector<1x32xf32>
    %c0_280 = arith.constant 0 : index
    %c0_281 = arith.constant 0 : index
    %464 = vector.load %arg33[%c0_280, %c0_281] : memref<1x32xf32, #tpu.memory_space<vmem>>, vector<1x32xf32>
    %cst_282 = arith.constant dense<0.000000e+00> : vector<8xf32>
    %465 = vector.multi_reduction <add>, %462, %cst_282 [1] : vector<8x32xf32> to vector<8xf32>
    %466 = vector.shape_cast %465 : vector<8xf32> to vector<8x1xf32>
    %cst_283 = arith.constant 3.200000e+01 : f32
    %467 = vector.broadcast %cst_283 : f32 to vector<8x1xf32>
    %468 = arith.divf %466, %467 : vector<8x1xf32>
    %469 = vector.broadcast %468 : vector<8x1xf32> to vector<8x32xf32>
    %470 = arith.subf %462, %469 : vector<8x32xf32>
    %471 = arith.mulf %470, %470 : vector<8x32xf32>
    %cst_284 = arith.constant dense<0.000000e+00> : vector<8xf32>
    %472 = vector.multi_reduction <add>, %471, %cst_284 [1] : vector<8x32xf32> to vector<8xf32>
    %473 = vector.shape_cast %472 : vector<8xf32> to vector<8x1xf32>
    %cst_285 = arith.constant 3.200000e+01 : f32
    %474 = vector.broadcast %cst_285 : f32 to vector<8x1xf32>
    %475 = arith.divf %473, %474 : vector<8x1xf32>
    %cst_286 = arith.constant 9.99999974E-6 : f32
    %476 = vector.broadcast %cst_286 : f32 to vector<8x1xf32>
    %477 = arith.addf %475, %476 : vector<8x1xf32>
    %478 = math.rsqrt %477 : vector<8x1xf32>
    %479 = vector.broadcast %478 : vector<8x1xf32> to vector<8x32xf32>
    %480 = arith.mulf %470, %479 : vector<8x32xf32>
    %481 = vector.broadcast %463 : vector<1x32xf32> to vector<8x32xf32>
    %482 = arith.mulf %480, %481 : vector<8x32xf32>
    %483 = vector.broadcast %464 : vector<1x32xf32> to vector<8x32xf32>
    %484 = arith.addf %482, %483 : vector<8x32xf32>
    %485 = arith.truncf %484 : vector<8x32xf32> to vector<8x32xbf16>
    %c0_287 = arith.constant 0 : index
    %c0_288 = arith.constant 0 : index
    %486 = vector.load %arg28[%c0_287, %c0_288] : memref<32x2048xbf16, #tpu.memory_space<vmem>>, vector<32x2048xbf16>
    %cst_289 = arith.constant dense<0.000000e+00> : vector<8x2048xf32>
    %487 = tpu.matmul %485, %486, %cst_289 {dimension_numbers = #tpu.dot_dimension_numbers<[1], [0], [0], [1], [0, 0, 1, 1], [], []>} : vector<8x32xbf16>, vector<32x2048xbf16>, vector<8x2048xf32> -> vector<8x2048xf32>
    %c0_290 = arith.constant 0 : index
    %c0_291 = arith.constant 0 : index
    %488 = vector.load %arg29[%c0_290, %c0_291] : memref<1x2048xf32, #tpu.memory_space<vmem>>, vector<1x2048xf32>
    %489 = vector.broadcast %488 : vector<1x2048xf32> to vector<8x2048xf32>
    %490 = arith.addf %487, %489 : vector<8x2048xf32>
    %cst_292 = arith.constant 0.000000e+00 : f32
    %491 = vector.broadcast %cst_292 : f32 to vector<8x2048xf32>
    %492 = arith.maximumf %490, %491 : vector<8x2048xf32>
    %493 = arith.truncf %492 : vector<8x2048xf32> to vector<8x2048xbf16>
    %c0_293 = arith.constant 0 : index
    %c0_294 = arith.constant 0 : index
    %494 = vector.load %arg30[%c0_293, %c0_294] : memref<2048x32xbf16, #tpu.memory_space<vmem>>, vector<2048x32xbf16>
    %cst_295 = arith.constant dense<0.000000e+00> : vector<8x32xf32>
    %495 = tpu.matmul %493, %494, %cst_295 {dimension_numbers = #tpu.dot_dimension_numbers<[1], [0], [0], [1], [0, 0, 1, 1], [], []>} : vector<8x2048xbf16>, vector<2048x32xbf16>, vector<8x32xf32> -> vector<8x32xf32>
    %c0_296 = arith.constant 0 : index
    %c0_297 = arith.constant 0 : index
    %496 = vector.load %arg31[%c0_296, %c0_297] : memref<1x32xf32, #tpu.memory_space<vmem>>, vector<1x32xf32>
    %497 = vector.broadcast %496 : vector<1x32xf32> to vector<8x32xf32>
    %498 = arith.addf %495, %497 : vector<8x32xf32>
    %499 = arith.addf %484, %498 : vector<8x32xf32>
    %c0_298 = arith.constant 0 : index
    %c0_299 = arith.constant 0 : index
    %500 = vector.load %arg34[%c0_298, %c0_299] : memref<1x32xf32, #tpu.memory_space<vmem>>, vector<1x32xf32>
    %c0_300 = arith.constant 0 : index
    %c0_301 = arith.constant 0 : index
    %501 = vector.load %arg35[%c0_300, %c0_301] : memref<1x32xf32, #tpu.memory_space<vmem>>, vector<1x32xf32>
    %cst_302 = arith.constant dense<0.000000e+00> : vector<8xf32>
    %502 = vector.multi_reduction <add>, %499, %cst_302 [1] : vector<8x32xf32> to vector<8xf32>
    %503 = vector.shape_cast %502 : vector<8xf32> to vector<8x1xf32>
    %cst_303 = arith.constant 3.200000e+01 : f32
    %504 = vector.broadcast %cst_303 : f32 to vector<8x1xf32>
    %505 = arith.divf %503, %504 : vector<8x1xf32>
    %506 = vector.broadcast %505 : vector<8x1xf32> to vector<8x32xf32>
    %507 = arith.subf %499, %506 : vector<8x32xf32>
    %508 = arith.mulf %507, %507 : vector<8x32xf32>
    %cst_304 = arith.constant dense<0.000000e+00> : vector<8xf32>
    %509 = vector.multi_reduction <add>, %508, %cst_304 [1] : vector<8x32xf32> to vector<8xf32>
    %510 = vector.shape_cast %509 : vector<8xf32> to vector<8x1xf32>
    %cst_305 = arith.constant 3.200000e+01 : f32
    %511 = vector.broadcast %cst_305 : f32 to vector<8x1xf32>
    %512 = arith.divf %510, %511 : vector<8x1xf32>
    %cst_306 = arith.constant 9.99999974E-6 : f32
    %513 = vector.broadcast %cst_306 : f32 to vector<8x1xf32>
    %514 = arith.addf %512, %513 : vector<8x1xf32>
    %515 = math.rsqrt %514 : vector<8x1xf32>
    %516 = vector.broadcast %515 : vector<8x1xf32> to vector<8x32xf32>
    %517 = arith.mulf %507, %516 : vector<8x32xf32>
    %518 = vector.broadcast %500 : vector<1x32xf32> to vector<8x32xf32>
    %519 = arith.mulf %517, %518 : vector<8x32xf32>
    %520 = vector.broadcast %501 : vector<1x32xf32> to vector<8x32xf32>
    %521 = arith.addf %519, %520 : vector<8x32xf32>
    %522 = vector.shape_cast %521 : vector<8x32xf32> to vector<1x8x32xf32>
    %523 = vector.extract_strided_slice %522 {offsets = [0, 7, 0], sizes = [1, 1, 32], strides = [1, 1, 1]} : vector<1x8x32xf32> to vector<1x1x32xf32>
    %524 = vector.shape_cast %523 : vector<1x1x32xf32> to vector<1x32xf32>
    %525 = arith.truncf %524 : vector<1x32xf32> to vector<1x32xbf16>
    %c0_307 = arith.constant 0 : index
    %c0_308 = arith.constant 0 : index
    %526 = vector.load %arg36[%c0_307, %c0_308] : memref<32x16xbf16, #tpu.memory_space<vmem>>, vector<32x16xbf16>
    %cst_309 = arith.constant dense<0.000000e+00> : vector<1x16xf32>
    %527 = tpu.matmul %525, %526, %cst_309 {dimension_numbers = #tpu.dot_dimension_numbers<[1], [0], [0], [1], [0, 0, 1, 1], [], []>} : vector<1x32xbf16>, vector<32x16xbf16>, vector<1x16xf32> -> vector<1x16xf32>
    %c0_310 = arith.constant 0 : index
    %c0_311 = arith.constant 0 : index
    %528 = vector.load %arg37[%c0_310, %c0_311] : memref<1x16xf32, #tpu.memory_space<vmem>>, vector<1x16xf32>
    %529 = arith.addf %527, %528 : vector<1x16xf32>
    %cst_312 = arith.constant 0.000000e+00 : f32
    %530 = vector.broadcast %cst_312 : f32 to vector<1x16xf32>
    %531 = arith.maximumf %529, %530 : vector<1x16xf32>
    %532 = arith.truncf %531 : vector<1x16xf32> to vector<1x16xbf16>
    %c0_313 = arith.constant 0 : index
    %c0_314 = arith.constant 0 : index
    %533 = vector.load %arg38[%c0_313, %c0_314] : memref<16x1xbf16, #tpu.memory_space<vmem>>, vector<16x1xbf16>
    %cst_315 = arith.constant dense<0.000000e+00> : vector<1x1xf32>
    %534 = tpu.matmul %532, %533, %cst_315 {dimension_numbers = #tpu.dot_dimension_numbers<[1], [0], [0], [1], [0, 0, 1, 1], [], []>} : vector<1x16xbf16>, vector<16x1xbf16>, vector<1x1xf32> -> vector<1x1xf32>
    %c0_316 = arith.constant 0 : index
    %c0_317 = arith.constant 0 : index
    %535 = vector.load %arg39[%c0_316, %c0_317] : memref<1x1xf32, #tpu.memory_space<vmem>>, vector<1x1xf32>
    %536 = arith.addf %534, %535 : vector<1x1xf32>
    %c0_318 = arith.constant 0 : index
    %c0_319 = arith.constant 0 : index
    %c0_320 = arith.constant 0 : index
    %537 = vector.load %arg40[%c0_318, %c0_319, %c0_320] : memref<1x1x1xf32, #tpu.memory_space<vmem>>, vector<1x1x1xf32>
    %538 = vector.shape_cast %537 : vector<1x1x1xf32> to vector<1x1xf32>
    %539 = vector.shape_cast %536 : vector<1x1xf32> to vector<1x1x1xf32>
    tpu.vector_store %arg40[%c0_318, %c0_319, %c0_320], %539 {strides = array<i32>} : memref<1x1x1xf32, #tpu.memory_space<vmem>>, vector<1x1x1xf32>,
    return
  }
  func.func @transform_0(%arg0: i32) -> (i32, i32, i32) {
    %c0_i32 = arith.constant 0 : i32
    %c0_i32_0 = arith.constant 0 : i32
    %c0_i32_1 = arith.constant 0 : i32
    return %arg0, %c0_i32, %c0_i32_0 : i32, i32, i32
  }
  func.func @transform_1(%arg0: i32) -> (i32, i32) {
    %c0_i32 = arith.constant 0 : i32
    %c0_i32_0 = arith.constant 0 : i32
    %c0_i32_1 = arith.constant 0 : i32
    return %c0_i32, %c0_i32_0 : i32, i32
  }
  func.func @transform_2(%arg0: i32) -> (i32, i32) {
    %c0_i32 = arith.constant 0 : i32
    %c0_i32_0 = arith.constant 0 : i32
    %c0_i32_1 = arith.constant 0 : i32
    return %c0_i32, %c0_i32_0 : i32, i32
  }
  func.func @transform_3(%arg0: i32) -> (i32, i32, i32) {
    %c0_i32 = arith.constant 0 : i32
    %c0_i32_0 = arith.constant 0 : i32
    %c0_i32_1 = arith.constant 0 : i32
    %c0_i32_2 = arith.constant 0 : i32
    return %c0_i32, %c0_i32_0, %c0_i32_1 : i32, i32, i32
  }
  func.func @transform_4(%arg0: i32) -> (i32, i32, i32) {
    %c0_i32 = arith.constant 0 : i32
    %c0_i32_0 = arith.constant 0 : i32
    %c0_i32_1 = arith.constant 0 : i32
    %c0_i32_2 = arith.constant 0 : i32
    return %c0_i32, %c0_i32_0, %c0_i32_1 : i32, i32, i32
  }
  func.func @transform_5(%arg0: i32) -> (i32, i32, i32) {
    %c0_i32 = arith.constant 0 : i32
    %c0_i32_0 = arith.constant 0 : i32
    %c0_i32_1 = arith.constant 0 : i32
    %c0_i32_2 = arith.constant 0 : i32
    return %c0_i32, %c0_i32_0, %c0_i32_1 : i32, i32, i32
  }
  func.func @transform_6(%arg0: i32) -> (i32, i32, i32) {
    %c0_i32 = arith.constant 0 : i32
    %c0_i32_0 = arith.constant 0 : i32
    %c0_i32_1 = arith.constant 0 : i32
    %c0_i32_2 = arith.constant 0 : i32
    return %c0_i32, %c0_i32_0, %c0_i32_1 : i32, i32, i32
  }
  func.func @transform_7(%arg0: i32) -> (i32, i32, i32) {
    %c0_i32 = arith.constant 0 : i32
    %c0_i32_0 = arith.constant 0 : i32
    %c0_i32_1 = arith.constant 0 : i32
    %c0_i32_2 = arith.constant 0 : i32
    return %c0_i32, %c0_i32_0, %c0_i32_1 : i32, i32, i32
  }
  func.func @transform_8(%arg0: i32) -> (i32, i32, i32) {
    %c0_i32 = arith.constant 0 : i32
    %c0_i32_0 = arith.constant 0 : i32
    %c0_i32_1 = arith.constant 0 : i32
    %c0_i32_2 = arith.constant 0 : i32
    return %c0_i32, %c0_i32_0, %c0_i32_1 : i32, i32, i32
  }
  func.func @transform_9(%arg0: i32) -> (i32, i32, i32) {
    %c0_i32 = arith.constant 0 : i32
    %c0_i32_0 = arith.constant 0 : i32
    %c0_i32_1 = arith.constant 0 : i32
    %c0_i32_2 = arith.constant 0 : i32
    return %c0_i32, %c0_i32_0, %c0_i32_1 : i32, i32, i32
  }
  func.func @transform_10(%arg0: i32) -> (i32, i32) {
    %c0_i32 = arith.constant 0 : i32
    %c0_i32_0 = arith.constant 0 : i32
    %c0_i32_1 = arith.constant 0 : i32
    return %c0_i32, %c0_i32_0 : i32, i32
  }
  func.func @transform_11(%arg0: i32) -> (i32, i32) {
    %c0_i32 = arith.constant 0 : i32
    %c0_i32_0 = arith.constant 0 : i32
    %c0_i32_1 = arith.constant 0 : i32
    return %c0_i32, %c0_i32_0 : i32, i32
  }
  func.func @transform_12(%arg0: i32) -> (i32, i32) {
    %c0_i32 = arith.constant 0 : i32
    %c0_i32_0 = arith.constant 0 : i32
    %c0_i32_1 = arith.constant 0 : i32
    return %c0_i32, %c0_i32_0 : i32, i32
  }
  func.func @transform_13(%arg0: i32) -> (i32, i32) {
    %c0_i32 = arith.constant 0 : i32
    %c0_i32_0 = arith.constant 0 : i32
    %c0_i32_1 = arith.constant 0 : i32
    return %c0_i32, %c0_i32_0 : i32, i32
  }
  func.func @transform_14(%arg0: i32) -> (i32, i32) {
    %c0_i32 = arith.constant 0 : i32
    %c0_i32_0 = arith.constant 0 : i32
    %c0_i32_1 = arith.constant 0 : i32
    return %c0_i32, %c0_i32_0 : i32, i32
  }
  func.func @transform_15(%arg0: i32) -> (i32, i32) {
    %c0_i32 = arith.constant 0 : i32
    %c0_i32_0 = arith.constant 0 : i32
    %c0_i32_1 = arith.constant 0 : i32
    return %c0_i32, %c0_i32_0 : i32, i32
  }
  func.func @transform_16(%arg0: i32) -> (i32, i32) {
    %c0_i32 = arith.constant 0 : i32
    %c0_i32_0 = arith.constant 0 : i32
    %c0_i32_1 = arith.constant 0 : i32
    return %c0_i32, %c0_i32_0 : i32, i32
  }
  func.func @transform_17(%arg0: i32) -> (i32, i32) {
    %c0_i32 = arith.constant 0 : i32
    %c0_i32_0 = arith.constant 0 : i32
    %c0_i32_1 = arith.constant 0 : i32
    return %c0_i32, %c0_i32_0 : i32, i32
  }
  func.func @transform_18(%arg0: i32) -> (i32, i32) {
    %c0_i32 = arith.constant 0 : i32
    %c0_i32_0 = arith.constant 0 : i32
    %c0_i32_1 = arith.constant 0 : i32
    return %c0_i32, %c0_i32_0 : i32, i32
  }
  func.func @transform_19(%arg0: i32) -> (i32, i32, i32) {
    %c0_i32 = arith.constant 0 : i32
    %c0_i32_0 = arith.constant 0 : i32
    %c0_i32_1 = arith.constant 0 : i32
    %c0_i32_2 = arith.constant 0 : i32
    return %c0_i32, %c0_i32_0, %c0_i32_1 : i32, i32, i32
  }
  func.func @transform_20(%arg0: i32) -> (i32, i32, i32) {
    %c0_i32 = arith.constant 0 : i32
    %c0_i32_0 = arith.constant 0 : i32
    %c0_i32_1 = arith.constant 0 : i32
    %c0_i32_2 = arith.constant 0 : i32
    return %c0_i32, %c0_i32_0, %c0_i32_1 : i32, i32, i32
  }
  func.func @transform_21(%arg0: i32) -> (i32, i32, i32) {
    %c0_i32 = arith.constant 0 : i32
    %c0_i32_0 = arith.constant 0 : i32
    %c0_i32_1 = arith.constant 0 : i32
    %c0_i32_2 = arith.constant 0 : i32
    return %c0_i32, %c0_i32_0, %c0_i32_1 : i32, i32, i32
  }
  func.func @transform_22(%arg0: i32) -> (i32, i32, i32) {
    %c0_i32 = arith.constant 0 : i32
    %c0_i32_0 = arith.constant 0 : i32
    %c0_i32_1 = arith.constant 0 : i32
    %c0_i32_2 = arith.constant 0 : i32
    return %c0_i32, %c0_i32_0, %c0_i32_1 : i32, i32, i32
  }
  func.func @transform_23(%arg0: i32) -> (i32, i32, i32) {
    %c0_i32 = arith.constant 0 : i32
    %c0_i32_0 = arith.constant 0 : i32
    %c0_i32_1 = arith.constant 0 : i32
    %c0_i32_2 = arith.constant 0 : i32
    return %c0_i32, %c0_i32_0, %c0_i32_1 : i32, i32, i32
  }
  func.func @transform_24(%arg0: i32) -> (i32, i32, i32) {
    %c0_i32 = arith.constant 0 : i32
    %c0_i32_0 = arith.constant 0 : i32
    %c0_i32_1 = arith.constant 0 : i32
    %c0_i32_2 = arith.constant 0 : i32
    return %c0_i32, %c0_i32_0, %c0_i32_1 : i32, i32, i32
  }
  func.func @transform_25(%arg0: i32) -> (i32, i32, i32) {
    %c0_i32 = arith.constant 0 : i32
    %c0_i32_0 = arith.constant 0 : i32
    %c0_i32_1 = arith.constant 0 : i32
    %c0_i32_2 = arith.constant 0 : i32
    return %c0_i32, %c0_i32_0, %c0_i32_1 : i32, i32, i32
  }
  func.func @transform_26(%arg0: i32) -> (i32, i32) {
    %c0_i32 = arith.constant 0 : i32
    %c0_i32_0 = arith.constant 0 : i32
    %c0_i32_1 = arith.constant 0 : i32
    return %c0_i32, %c0_i32_0 : i32, i32
  }
  func.func @transform_27(%arg0: i32) -> (i32, i32) {
    %c0_i32 = arith.constant 0 : i32
    %c0_i32_0 = arith.constant 0 : i32
    %c0_i32_1 = arith.constant 0 : i32
    return %c0_i32, %c0_i32_0 : i32, i32
  }
  func.func @transform_28(%arg0: i32) -> (i32, i32) {
    %c0_i32 = arith.constant 0 : i32
    %c0_i32_0 = arith.constant 0 : i32
    %c0_i32_1 = arith.constant 0 : i32
    return %c0_i32, %c0_i32_0 : i32, i32
  }
  func.func @transform_29(%arg0: i32) -> (i32, i32) {
    %c0_i32 = arith.constant 0 : i32
    %c0_i32_0 = arith.constant 0 : i32
    %c0_i32_1 = arith.constant 0 : i32
    return %c0_i32, %c0_i32_0 : i32, i32
  }
  func.func @transform_30(%arg0: i32) -> (i32, i32) {
    %c0_i32 = arith.constant 0 : i32
    %c0_i32_0 = arith.constant 0 : i32
    %c0_i32_1 = arith.constant 0 : i32
    return %c0_i32, %c0_i32_0 : i32, i32
  }
  func.func @transform_31(%arg0: i32) -> (i32, i32) {
    %c0_i32 = arith.constant 0 : i32
    %c0_i32_0 = arith.constant 0 : i32
    %c0_i32_1 = arith.constant 0 : i32
    return %c0_i32, %c0_i32_0 : i32, i32
  }
  func.func @transform_32(%arg0: i32) -> (i32, i32) {
    %c0_i32 = arith.constant 0 : i32
    %c0_i32_0 = arith.constant 0 : i32
    %c0_i32_1 = arith.constant 0 : i32
    return %c0_i32, %c0_i32_0 : i32, i32
  }
  func.func @transform_33(%arg0: i32) -> (i32, i32) {
    %c0_i32 = arith.constant 0 : i32
    %c0_i32_0 = arith.constant 0 : i32
    %c0_i32_1 = arith.constant 0 : i32
    return %c0_i32, %c0_i32_0 : i32, i32
  }
  func.func @transform_34(%arg0: i32) -> (i32, i32) {
    %c0_i32 = arith.constant 0 : i32
    %c0_i32_0 = arith.constant 0 : i32
    %c0_i32_1 = arith.constant 0 : i32
    return %c0_i32, %c0_i32_0 : i32, i32
  }
  func.func @transform_35(%arg0: i32) -> (i32, i32) {
    %c0_i32 = arith.constant 0 : i32
    %c0_i32_0 = arith.constant 0 : i32
    %c0_i32_1 = arith.constant 0 : i32
    return %c0_i32, %c0_i32_0 : i32, i32
  }
  func.func @transform_36(%arg0: i32) -> (i32, i32) {
    %c0_i32 = arith.constant 0 : i32
    %c0_i32_0 = arith.constant 0 : i32
    %c0_i32_1 = arith.constant 0 : i32
    return %c0_i32, %c0_i32_0 : i32, i32
  }
  func.func @transform_37(%arg0: i32) -> (i32, i32) {
    %c0_i32 = arith.constant 0 : i32
    %c0_i32_0 = arith.constant 0 : i32
    %c0_i32_1 = arith.constant 0 : i32
    return %c0_i32, %c0_i32_0 : i32, i32
  }
  func.func @transform_38(%arg0: i32) -> (i32, i32) {
    %c0_i32 = arith.constant 0 : i32
    %c0_i32_0 = arith.constant 0 : i32
    %c0_i32_1 = arith.constant 0 : i32
    return %c0_i32, %c0_i32_0 : i32, i32
  }
  func.func @transform_39(%arg0: i32) -> (i32, i32, i32) {
    %c0_i32 = arith.constant 0 : i32
    %c0_i32_0 = arith.constant 0 : i32
    %c0_i32_1 = arith.constant 0 : i32
    return %arg0, %c0_i32, %c0_i32_0 : i32, i32, i32
  }
}

</mosaic_0001>

<bundles_post_ra>
// kernel: ohlc_transformer_forward.1
= control target key start
LH: loop header
LB: loop body
LE: loop exit
PB: predicated region body
PF: predicated region fallthrough
CT: control target
= control target key end

     0   :  { %s10200_s6 = smov 1   ;;  %s10201_s10 = smov 2   ;;  %s11411_s0 = inlined_call_operand.smem [shape: u32[40], index: -1, kind: input, shape index: {}] }
   0x1   :  { %s10250_s5 = sld [smem:[%s11411_s0]]   ;;  %s10202_s14 = smov 3  }
   0x2   :  { %s10255_s9 = sld [smem:[%s11411_s0 + %s10200_s6]]   ;;  %s10203_s18 = smov 4  }
   0x3   :  { %s10260_s13 = sld [smem:[%s11411_s0 + %s10201_s10]]   ;;  %s10204_s22 = smov 5  }
   0x4   :  { %s10265_s17 = sld [smem:[%s11411_s0 + %s10202_s14]]   ;;  %s10205_s26 = smov 6  }
   0x5   :  { %s10270_s21 = sld [smem:[%s11411_s0 + %s10203_s18]]   ;;  %s10206_s30 = smov 7  }
   0x6   :  { %s10275_s25 = sld [smem:[%s11411_s0 + %s10204_s22]]   ;;  %s10207_s4 = smov 8  }
   0x7   :  { %s10280_s29 = sld [smem:[%s11411_s0 + %s10205_s26]]   ;;  %s10208_s10 = smov 9  }
   0x8   :  { %s10285_s3 = sld [smem:[%s11411_s0 + %s10206_s30]]   ;;  %s10209_s15 = smov 10  }
   0x9   :  { %s10290_s8 = sld [smem:[%s11411_s0 + %s10207_s4]]   ;;  %s10210_s20 = smov 11  }
   0xa   :  { %s10295_s14 = sld [smem:[%s11411_s0 + %s10208_s10]]   ;;  %s10211_s26 = smov 12  }
   0xb   :  { %s10300_s19 = sld [smem:[%s11411_s0 + %s10209_s15]]   ;;  %s10212_s1 = smov 13  }
   0xc   :  { %s10305_s24 = sld [smem:[%s11411_s0 + %s10210_s20]]   ;;  %s10213_s7 = smov 14  }
   0xd   :  { %s10310_s30 = sld [smem:[%s11411_s0 + %s10211_s26]]   ;;  %s10214_s15 = smov 15  }
   0xe   :  { %s10315_s6 = sld [smem:[%s11411_s0 + %s10212_s1]]   ;;  %s10215_s22 = smov 16  }
   0xf   :  { %s10320_s12 = sld [smem:[%s11411_s0 + %s10213_s7]]   ;;  %s10216_s28 = smov 17  }
  0x10   :  { %s10325_s20 = sld [smem:[%s11411_s0 + %s10214_s15]]   ;;  %s10217_s7 = smov 18  }
  0x11   :  { %s10330_s27 = sld [smem:[%s11411_s0 + %s10215_s22]]   ;;  %s10218_s15 = smov 19  }
  0x12   :  { %s10335_s4 = sld [smem:[%s11411_s0 + %s10216_s28]]   ;;  %s10219_s22 = smov 20  }
  0x13   :  { %11428 = sst [smem:[#allocation3_spill]] %s10310_s30  ;;  %s10220_s28 = smov 21  }
  0x14   :  { %11429 = sst [smem:[#allocation4_spill]] %s10315_s6  ;;  %s10238_s16 = smov 39  }
  0x15   :  { %11430 = sst [smem:[#allocation5_spill]] %s10320_s12 }
  0x16   :  { %s10340_s12 = sld [smem:[%s11411_s0 + %s10217_s7]]   ;;  %s10221_s7 = smov 22  }
  0x17   :  { %s10345_s30 = sld [smem:[%s11411_s0 + %s10218_s15]]   ;;  %s10222_s15 = smov 23  }
  0x18   :  { %11431 = sst [smem:[#allocation6_spill]] %s10335_s4 }
  0x19   :  { %s10350_s6 = sld [smem:[%s11411_s0 + %s10219_s22]]   ;;  %s10223_s22 = smov 24  }
  0x1a   :  { %s10355_s4 = sld [smem:[%s11411_s0 + %s10220_s28]]   ;;  %s10224_s28 = smov 25  }
  0x1c   :  { %11432 = sst [smem:[#allocation7_spill]] %s10340_s12 }
  0x1d   :  { %11433 = sst [smem:[#allocation8_spill]] %s10345_s30 }
  0x1e   :  { %s10360_s12 = sld [smem:[%s11411_s0 + %s10221_s7]]   ;;  %s10225_s7 = smov 26  }
  0x1f   :  { %11434 = sst [smem:[#allocation9_spill]] %s10350_s6 }
  0x20   :  { %11435 = sst [smem:[#allocation10_spill]] %s10355_s4 }
  0x21   :  { %s10365_s30 = sld [smem:[%s11411_s0 + %s10222_s15]]   ;;  %s10226_s15 = smov 27  }
  0x22   :  { %s10370_s6 = sld [smem:[%s11411_s0 + %s10223_s22]]   ;;  %s10227_s22 = smov 28  }
  0x23   :  { %s10375_s4 = sld [smem:[%s11411_s0 + %s10224_s28]]   ;;  %s10228_s28 = smov 29  }
  0x24   :  { %11436 = sst [smem:[#allocation11_spill]] %s10360_s12 }
  0x25   :  { %s10380_s12 = sld [smem:[%s11411_s0 + %s10225_s7]]   ;;  %s10229_s7 = smov 30  }
  0x27   :  { %11437 = sst [smem:[#allocation12_spill]] %s10365_s30 }
  0x28   :  { %11438 = sst [smem:[#allocation13_spill]] %s10370_s6 }
  0x29   :  { %11439 = sst [smem:[#allocation14_spill]] %s10375_s4 }
  0x2a   :  { %s10385_s30 = sld [smem:[%s11411_s0 + %s10226_s15]]   ;;  %s10230_s15 = smov 31  }
  0x2b   :  { %11440 = sst [smem:[#allocation15_spill]] %s10380_s12 }
  0x2c   :  { %s10390_s6 = sld [smem:[%s11411_s0 + %s10227_s22]]   ;;  %s10231_s22 = smov 32  }
  0x2d   :  { %s10395_s4 = sld [smem:[%s11411_s0 + %s10228_s28]]   ;;  %s10232_s28 = smov 33  }
  0x2e   :  { %s10400_s12 = sld [smem:[%s11411_s0 + %s10229_s7]]   ;;  %s10233_s7 = smov 34  }
  0x30   :  { %11441 = sst [smem:[#allocation16_spill]] %s10385_s30 }
  0x31   :  { %s10405_s30 = sld [smem:[%s11411_s0 + %s10230_s15]]   ;;  %s10234_s15 = smov 35  }
  0x32   :  { %11442 = sst [smem:[#allocation17_spill]] %s10390_s6 }
  0x33   :  { %11443 = sst [smem:[#allocation18_spill]] %s10395_s4 }
  0x34   :  { %11444 = sst [smem:[#allocation19_spill]] %s10400_s12 }
  0x35   :  { %s10410_s6 = sld [smem:[%s11411_s0 + %s10231_s22]]   ;;  %s10235_s22 = smov 36  }
  0x36   :  { %s10415_s4 = sld [smem:[%s11411_s0 + %s10232_s28]]   ;;  %s10236_s28 = smov 37  }
  0x37   :  { %11445 = sst [smem:[#allocation20_spill]] %s10405_s30 }
  0x38   :  { %s10420_s12 = sld [smem:[%s11411_s0 + %s10233_s7]]   ;;  %s10237_s7 = smov 38  }
  0x39   :  { %s10425_s30 = sld [smem:[%s11411_s0 + %s10234_s15]]  }
  0x3b   :  { %11446 = sst [smem:[#allocation21_spill]] %s10410_s6 }
  0x3c   :  { %11447 = sst [smem:[#allocation22_spill]] %s10415_s4 }
  0x3d   :  { %s10430_s6 = sld [smem:[%s11411_s0 + %s10235_s22]]   ;;  %s10445_s22 = smov 0  }
  0x3e   :  { %11448 = sst [smem:[#allocation23_spill]] %s10420_s12 }
  0x3f   :  { %11449 = sst [smem:[#allocation24_spill]] %s10425_s30 }
  0x40   :  { %s10435_s4 = sld [smem:[%s11411_s0 + %s10236_s28]]  }
  0x41   :  { %s8379_s12 = sld [smem:[%s11411_s0 + %s10237_s7]]  }
  0x42   :  { %s10443_s30 = sld [smem:[%s11411_s0 + %s10238_s16]]  }
  0x47   :  { %v84_v0 = vstv %s8379_s12 }
  0x48   :  { %85 = vst [vmem:[#allocation2] sm:$0x1] %v84_v0 }
  0x49 LB: > { %s8381_s23 = sadd.s32 4294967295, %s10198_s22   ;;  %p8385_p0 = scmp.ge.s32.totalorder %s10198_s22, 1  ;;  %s10198_s22 = sphi %s10445_s22, %s91_s22  }
  0x4a   : > { %p1078_p1 = scmp.lt.s32.totalorder %s10198_s22, 3 }
  0x4c   : > { %p1079_p2 = pnand %p8385_p0, %p1078_p1 }
  0x4d   : > { %v1181_v1 = vld [vmem:[%s10255_s9] sm:$0x3] (!%p1079_p2)  ;;  %vm1193_vm0 = vcmask (!%p1079_p2), 1041408   ;;  %p1171_p3 = scmp.lt.s32.totalorder (!%p1079_p2), %s8381_s23, 1  ;;  %v10239_v2 = vmov (!%p1079_p2), 0.0   ;;  %vm10240_vm1 = vmmov (!%p1079_p2), 0  }
  0x4e   : > { %1082 = sbr.rel (%p1079_p2) target bundleno = 10862 (0x2a6e), region = 176  ;;  %9439 = vmatprep.subr.bf16.mxu0 (!%p1079_p2), %v10239_v2  ;;  %v1195_v3 = vsel (!%p1079_p2), %vm1193_vm0, %v1181_v1, 0  ;;  %9441 = vmatprep.mubr.msk.bf16.mxu0 (!%p1079_p2), %vm10240_vm1, %v10239_v2  ;;  %v9845_v4 = vld [vmem:[%s10265_s17] sm:$0xff] (!%p1079_p2)   ;;  %vm1189_vm2 = vcmask (!%p1079_p2), 31744   ;;  %v9847_v8 = vld [vmem:[%s10265_s17 + $0x8] sm:$0xff] (!%p1079_p2)   ;;  %vm1261_vm3 = vcmask (!%p1079_p2), 261120  }
  0x4f   : > { %9440 = vmatpush3.bf16.msra.mxu0 (!%p1079_p2), %v1195_v3  ;;  %9445 = vmatprep.subr.bf16.mxu1 (!%p1079_p2), %v10239_v2  ;;  %v9846_v5 = vld [vmem:[%s10270_s21] sm:$0xff] (!%p1079_p2)   ;;  %v9848_v9 = vld [vmem:[%s10270_s21 + $0x8] sm:$0xff] (!%p1079_p2)   ;;  %vm1434_vm4 = vcmask (!%p1079_p2), 64512   ;;  %vm1497_vm5 = vcmask (!%p1079_p2), 1043456   ;;  %v9851_v38 = vld [vmem:[%s10265_s17 + $0x10] sm:$0xff] (!%p1079_p2)   ;;  %s11450_s26 = sld [smem:[#allocation4_spill]] (!%p1079_p2) }
  0x50   : > { %9453 = vmatprep.subr.bf16.mxu0 (!%p1079_p2), %v10239_v2  ;;  %9449 = vmatprep.mubr.msk.bf16.mxu1 (!%p1079_p2), %vm10240_vm1, %v10239_v2  ;;  %v8387_v10 = vld [vmem:[%s10260_s13] ss:$0 sm:$0xff] (!%p1079_p2)  ;;  %v9850_v18 = vld [vmem:[%s10275_s25 + $0x8] sm:$0xff] (!%p1079_p2)   ;;  %v9852_v43 = vld [vmem:[%s10265_s17 + $0x18] sm:$0xff] (!%p1079_p2)   ;;  %s11451_s28 = sld [smem:[#allocation3_spill]] (!%p1079_p2)  ;;  %s11452_s1 = sld [smem:[#allocation5_spill]] (!%p1079_p2) }
  0x51   : > { %9446 = vmatpush3.bf16.msra.mxu1 (!%p1079_p2), %v9845_v4  ;;  %v9849_v15 = vld [vmem:[%s10275_s25] sm:$0xff] (!%p1079_p2)   ;;  %v9853_v44 = vld [vmem:[%s10275_s25 + $0x10] sm:$0xff] (!%p1079_p2)   ;;  %v9854_v45 = vld [vmem:[%s10275_s25 + $0x18] sm:$0xff] (!%p1079_p2)   ;;  %s11453_s2 = sld [smem:[#allocation8_spill]] (!%p1079_p2)  ;;  %s11454_s7 = sld [smem:[#allocation9_spill]] (!%p1079_p2)  ;;  %vm8249_vm6 = vcmask (!%p1079_p2), 130048  }
  0x52   : > { %9447 = vmatprep.subr.bf16.mxu1 (!%p1079_p2), %v10239_v2  ;;  %v8393_v19 = vld [vmem:[%s10285_s3] ss:$0 sm:$0xff] (!%p1079_p2)  ;;  %v8426_v56 = vld [vmem:[%s10290_s8 + $0x1] ss:$0 sm:$0xff] (!%p1079_p2)  ;;  %s11455_s10 = sld [smem:[#allocation6_spill]] (!%p1079_p2)  ;;  %s11456_s11 = sld [smem:[#allocation7_spill]] (!%p1079_p2) }
  0x53   : > { %v8389_v30 = vld [vmem:[%s10280_s29] ss:$0 sm:$0xff] (!%p1079_p2)  ;;  %s11457_s16 = sld [smem:[#allocation10_spill]] (!%p1079_p2)  ;;  %s11458_s15 = sld [smem:[#allocation12_spill]] (!%p1079_p2)  ;;  %vm8293_vm7 = vcmask (!%p1079_p2), 0  }
  0x54   : > { %v8397_v32 = vld [vmem:[%s10290_s8] ss:$0 sm:$0xff] (!%p1079_p2)  ;;  %s11459_s18 = sld [smem:[#allocation11_spill]] (!%p1079_p2) }
  0x55   : > { %s11473_s23 = smov (!%p1171_p3, %s8381_s23), 1  ;;  %9448 = vmatpush3.bf16.msra.mxu1 %v9847_v8 }
  0x56   : > { %s8386_s0 = sshll.u32 %s11473_s23, 3  ;;  %9461 = vmatprep.subr.bf16.mxu1 %v10239_v2 }
  0x57   : > { %s1174_s12 = scalar_lea.vmem %s10250_s5, %s8386_s0  ;;  %s11460_s0 = sld [smem:[#allocation13_spill]] }
  0x58   : > { %v1179_v6 = vld [vmem:[%s1174_s12] sm:$0xff]  ;;  %s11461_s12 = sld [smem:[#allocation14_spill]] }
  0x59   : > { %v1180_v7 = vpack.c.bf16 %v1179_v6, %v1179_v6 }
  0x5b   : > { %9442 = vmatmul.mubr.msk.bf16.vlgmr.msra.gmra.mrb[0].mxu0 %vm1189_vm2, %v1180_v7 }
  0x5c   : > { %9454 = vmatpush3.bf16.msra.mxu0 %v9846_v5  ;;  %9457 = vmatprep.mubr.msk.bf16.mxu0 %vm10240_vm1, %v10239_v2 }
  0x5d   : > { %9455 = vmatprep.subr.bf16.mxu0 %v10239_v2 }
  0x60   : > { %9456 = vmatpush3.bf16.msra.mxu0 %v9848_v9  ;;  %v9855_v9 = vld [vmem:[%s10270_s21 + $0x10] sm:$0xff]  }
  0x61   : > { %9469 = vmatprep.subr.bf16.mxu0 %v10239_v2 }
 0x12e   : > { %v1231_v11 = vpop.f32.mrb[0].mxu0 }
 0x12f   : > { %v10476_v12 = vadd.f32 %v8387_v10, %v1231_v11  ;;  %v9443_v13 = vpop.f32.mrb[1].mxu0  ;;  %v9856_v11 = vld [vmem:[%s10270_s21 + $0x18] sm:$0xff]  }
 0x130   : > { %v1234_v14 = vpop.f32.mrb[2].mxu0 }
 0x131   : > { %v10481_v16 = vpack.c.bf16 %v10476_v12, %v10476_v12  ;;  %v9444_v17 = vpop.f32.mrb[3].mxu0 }
 0x133   : > { %9450 = vmatmul.mubr.msk.bf16.vlgmr.msra.gmra.mrb[0].mxu1 %vm1261_vm3, %v10481_v16  ;;  %9458 = vmatmul.mubr.msk.bf16.vlgmr.msra.gmra.mrb[4].mxu0 %vm1261_vm3, %v10481_v16 }
 0x134   : > { %9462 = vmatpush3.bf16.msra.mxu1 %v9849_v15  ;;  %9465 = vmatprep.mubr.msk.bf16.mxu1 %vm10240_vm1, %v10239_v2 }
 0x135   : > { %9463 = vmatprep.subr.bf16.mxu1 %v10239_v2  ;;  %9471 = vmatprep.mubr.msk.bf16.mxu0 %vm10240_vm1, %v10239_v2 }
 0x138   : > { %9464 = vmatpush3.bf16.msra.mxu1 %v9850_v18  ;;  %v8417_v18 = vld [vmem:[%s10285_s3 + $0x1] ss:$0 sm:$0xff] }
 0x139   : > { %9475 = vmatprep.subr.bf16.mxu1 %v10239_v2 }
 0x13b   : > { %9466 = vmatmul.mubr.msk.bf16.vlgmr.msra.gmra.mrb[4].mxu1 %vm1261_vm3, %v10481_v16 }
 0x13c   : > { %9477 = vmatprep.mubr.msk.bf16.mxu1 %vm10240_vm1, %v10239_v2 }
 0x206   : > { %v1299_v20 = vpop.f32.mrb[0].mxu1  ;;  %v1362_v21 = vpop.f32.mrb[4].mxu0 }
 0x207   : > { %v1363_v22 = vadd.f32 %v8393_v19, %v1362_v21  ;;  %v9451_v23 = vpop.f32.mrb[1].mxu1  ;;  %v9459_v24 = vpop.f32.mrb[5].mxu0  ;;  %v1300_v33 = vadd.f32 %v8389_v30, %v1299_v20 }
 0x208   : > { %v1302_v25 = vpop.f32.mrb[2].mxu1  ;;  %v1365_v26 = vpop.f32.mrb[6].mxu0 }
 0x209   : > { %v1432_v27 = vpack.c.bf16 %v1363_v22, %v1363_v22  ;;  %v9452_v28 = vpop.f32.mrb[3].mxu1  ;;  %v9460_v29 = vpop.f32.mrb[7].mxu0  ;;  %v1431_v39 = vpack.c.bf16 %v1300_v33, %v1300_v33  ;;  %v8408_v25 = vld [vmem:[%s10280_s29 + $0x1] ss:$0 sm:$0xff] }
 0x20b   : > { %v1439_v31 = vsel %vm1434_vm4, %v1432_v27, 0 }
 0x20c   : > { %9470 = vmatpush3.bf16.xpose.msra.mxu0 %v1439_v31 }
 0x20d   : > { %9481 = vmatprep.subr.bf16.mxu0 %v10239_v2 }
 0x20e   : > { %v1425_v34 = vpop.f32.mrb[4].mxu1 }
 0x20f   : > { %v1426_v35 = vadd.f32 %v8397_v32, %v1425_v34  ;;  %v9467_v36 = vpop.f32.mrb[5].mxu1 }
 0x210   : > { %v1428_v37 = vpop.f32.mrb[6].mxu1 }
 0x211   : > { %v1433_v40 = vpack.c.bf16 %v1426_v35, %v1426_v35  ;;  %v9468_v41 = vpop.f32.mrb[7].mxu1 }
 0x213   : > { %v1499_v42 = vsel %vm1497_vm5, %v1433_v40, 0  ;;  %9472 = vmatmul.mubr.msk.bf16.vlgmr.msra.gmra.mrb[8].mxu0 %vm1434_vm4, %v1431_v39  ;;  %v8432_v40 = vld [vmem:[%s10295_s14 + $0x4] sm:$0xf] }
 0x214   : > { %9476 = vmatpush3.bf16.msra.mxu1 %v1499_v42  ;;  %9482 = vmatpush3.bf16.msra.mxu0 %v9851_v38  ;;  %v1853_v41 = vsel %vm1497_vm5, %v8432_v40, 0 }
 0x215   : > { %9483 = vmatprep.subr.bf16.mxu0 %v10239_v2  ;;  %9485 = vmatprep.mubr.msk.bf16.mxu0 %vm10240_vm1, %v10239_v2 }
 0x216   : > { %9489 = vmatprep.subr.bf16.mxu1 %v10239_v2 }
 0x218   : > { %9484 = vmatpush3.bf16.msra.mxu0 %v9852_v43 }
 0x219   : > { %9497 = vmatprep.subr.bf16.mxu0 %v10239_v2 }
 0x21b   : > { %9486 = vmatmul.mubr.msk.bf16.vlgmr.msra.gmra.mrb[12].mxu0 %vm1261_vm3, %v10481_v16 }
 0x21c   : > { %9498 = vmatpush3.bf16.msra.mxu0 %v9853_v44  ;;  %9501 = vmatprep.mubr.msk.bf16.mxu0 %vm10240_vm1, %v10239_v2  ;;  %v1542_v44 = vld [vmem:[%s10295_s14] sm:$0xf] }
 0x21d   : > { %9499 = vmatprep.subr.bf16.mxu0 %v10239_v2 }
 0x220   : > { %9500 = vmatpush3.bf16.msra.mxu0 %v9854_v45 }
 0x221   : > { %9511 = vmatprep.subr.bf16.mxu0 %v10239_v2 }
 0x223   : > { %9502 = vmatmul.mubr.msk.bf16.vlgmr.msra.gmra.mrb[16].mxu0 %vm1261_vm3, %v10481_v16 }
 0x224   : > { %9513 = vmatprep.mubr.msk.bf16.mxu0 %vm10240_vm1, %v10239_v2 }
 0x2e6   : > { %v1475_v46 = vpop.f32.mrb[8].mxu0 }
 0x2e7   : > { %v1481_v47 = vmul.f32 0.35355338, %v1475_v46  ;;  %v9473_v48 = vpop.f32.mrb[9].mxu0 }
 0x2e8   : > { %v1478_v49 = vpop.f32.mrb[10].mxu0  ;;  %v9857_v48 = vld [vmem:[%s10270_s21 + $0x20] sm:$0xff]  }
 0x2e9   : > { %v9474_v50 = vpop.f32.mrb[11].mxu0  ;;  %v1482_v51 = vsel %vm1434_vm4, %v1481_v47, -inf }
 0x2ea   : > { %1483 = vmax.xlane.f32.xlu0 %v1482_v51  ;;  %v9858_v50 = vld [vmem:[%s10270_s21 + $0x28] sm:$0xff]  }
 0x2ee   : > { %v1602_v52 = vpop.f32.mrb[12].mxu0 }
 0x2ef   : > { %v9487_v53 = vpop.f32.mrb[13].mxu0  ;;  %v1603_v27 = vadd.f32 %v8408_v25, %v1602_v52  ;;  %v9859_v52 = vld [vmem:[%s10265_s17 + $0x20] sm:$0xff]  }
 0x2f0   : > { %v1605_v54 = vpop.f32.mrb[14].mxu0 }
 0x2f1   : > { %v9488_v55 = vpop.f32.mrb[15].mxu0  ;;  %v1738_v28 = vpack.c.bf16 %v1603_v27, %v1603_v27 }
 0x2f6   : > { %v1732_v57 = vpop.f32.mrb[16].mxu0 }
 0x2f7   : > { %v1733_v58 = vadd.f32 %v8426_v56, %v1732_v57  ;;  %v9503_v59 = vpop.f32.mrb[17].mxu0  ;;  %v9860_v57 = vld [vmem:[%s10265_s17 + $0x28] sm:$0xff]  }
 0x2f8   : > { %v1735_v60 = vpop.f32.mrb[18].mxu0  ;;  %v9861_v59 = vld [vmem:[%s10275_s25 + $0x20] sm:$0xff]  }
 0x2f9   : > { %v1740_v61 = vpack.c.bf16 %v1733_v58, %v1733_v58  ;;  %v9504_v62 = vpop.f32.mrb[19].mxu0 }
 0x2fb   : > { %v1804_v63 = vsel %vm1497_vm5, %v1740_v61, 0 }
 0x2fc   : > { %9512 = vmatpush3.bf16.msra.mxu0 %v1804_v63  ;;  %v9862_v63 = vld [vmem:[%s10275_s25 + $0x28] sm:$0xff]  }
 0x2fd   : > { %9523 = vmatprep.subr.bf16.mxu0 %v10239_v2 }
 0x377   : > { %v1484_v0 = vpop.xlane.xlu0 %1483 }
 0x378   : > { %v1485_v1 = vsub.f32 %v1481_v47, %v1484_v0  ;;  %v1899_v47 = vsel %vm1497_vm5, %v1542_v44, 0  ;;  %v8449_v0 = vld [vmem:[%s10285_s3 + $0x2] ss:$0 sm:$0xff] }
 0x37a   : > { %v1486_v3 = vmul.f32 1.442695, %v1485_v1 }
 0x37c   : > { %10152 = vpow2.f32 %v1486_v3 }
 0x386   : > { %v10153_v4 = vpop.eup %10152 }
 0x387   : > { %v1488_v5 = vsel %vm1434_vm4, %v10153_v4, 0.0 }
 0x388   : > { %1489 = vadd.xlane.f32.xlu0 %v1488_v5 }
 0x415   : > { %v1490_v6 = vpop.xlane.xlu0 %1489 }
 0x416   : > { %10154 = vrcp.f32 %v1490_v6 }
 0x420   : > { %v10155_v7 = vpop.eup %10154 }
 0x421   : > { %v1492_v8 = vmul.f32 %v10155_v7, %v10153_v4 }
 0x423   : > { %v1493_v10 = vpack.c.bf16 %v1492_v8, %v1492_v8 }
 0x425   : > { %9478 = vmatmul.mubr.msk.bf16.vlgmr.msra.gmra.mrb[8].mxu1 %vm1434_vm4, %v1493_v10 }
 0x426   : > { %9490 = vmatpush3.bf16.msra.mxu1 %v9855_v9  ;;  %9493 = vmatprep.mubr.msk.bf16.mxu1 %vm10240_vm1, %v10239_v2 }
 0x427   : > { %9491 = vmatprep.subr.bf16.mxu1 %v10239_v2 }
 0x42a   : > { %9492 = vmatpush3.bf16.msra.mxu1 %v9856_v11 }
 0x42b   : > { %9505 = vmatprep.subr.bf16.mxu1 %v10239_v2 }
 0x42d   : > { %9494 = vmatmul.mubr.msk.bf16.vlgmr.msra.gmra.mrb[12].mxu1 %vm1261_vm3, %v10481_v16 }
 0x42e   : > { %9507 = vmatprep.mubr.msk.bf16.mxu1 %vm10240_vm1, %v10239_v2 }
 0x4f8   : > { %v1535_v13 = vpop.f32.mrb[8].mxu1 }
 0x4f9   : > { %v9479_v14 = vpop.f32.mrb[9].mxu1  ;;  %v1541_v49 = vpack.c.bf16 %v1535_v13, %v1535_v13 }
 0x4fa   : > { %v1538_v15 = vpop.f32.mrb[10].mxu1 }
 0x4fb   : > { %v9480_v17 = vpop.f32.mrb[11].mxu1  ;;  %v8440_v15 = vld [vmem:[%s10280_s29 + $0x2] ss:$0 sm:$0xff] }
 0x500   : > { %v1667_v19 = vpop.f32.mrb[12].mxu1 }
 0x501   : > { %v1668_v20 = vadd.f32 %v8417_v18, %v1667_v19  ;;  %v9495_v21 = vpop.f32.mrb[13].mxu1 }
 0x502   : > { %v1670_v22 = vpop.f32.mrb[14].mxu1 }
 0x503   : > { %v1739_v23 = vpack.c.bf16 %v1668_v20, %v1668_v20  ;;  %v9496_v24 = vpop.f32.mrb[15].mxu1 }
 0x505   : > { %v1745_v26 = vsel %vm1434_vm4, %v1739_v23, 0  ;;  %v8458_v23 = vld [vmem:[%s10290_s8 + $0x2] ss:$0 sm:$0xff] }
 0x506   : > { %9506 = vmatpush3.bf16.xpose.msra.mxu1 %v1745_v26 }
 0x507   : > { %9517 = vmatprep.subr.bf16.mxu1 %v10239_v2 }
 0x50d   : > { %9508 = vmatmul.mubr.msk.bf16.vlgmr.msra.gmra.mrb[16].mxu1 %vm1434_vm4, %v1738_v28 }
 0x50e   : > { %9519 = vmatprep.mubr.msk.bf16.mxu1 %vm10240_vm1, %v10239_v2  ;;  %9518 = vmatpush3.bf16.msra.mxu1 %v1853_v41 }
 0x50f   : > { %9529 = vmatprep.subr.bf16.mxu1 %v10239_v2 }
 0x5e0   : > { %v1781_v29 = vpop.f32.mrb[16].mxu1 }
 0x5e1   : > { %v1787_v30 = vmul.f32 0.35355338, %v1781_v29  ;;  %v9509_v31 = vpop.f32.mrb[17].mxu1 }
 0x5e2   : > { %v1784_v32 = vpop.f32.mrb[18].mxu1 }
 0x5e3   : > { %v9510_v33 = vpop.f32.mrb[19].mxu1  ;;  %v1788_v34 = vsel %vm1434_vm4, %v1787_v30, -inf }
 0x5e4   : > { %1789 = vmax.xlane.f32.xlu1 %v1788_v34 }
 0x671   : > { %v1790_v35 = vpop.xlane.xlu1 %1789 }
 0x672   : > { %v1791_v36 = vsub.f32 %v1787_v30, %v1790_v35 }
 0x674   : > { %v1792_v37 = vmul.f32 1.442695, %v1791_v36 }
 0x676   : > { %10156 = vpow2.f32 %v1792_v37 }
 0x680   : > { %v10157_v38 = vpop.eup %10156 }
 0x681   : > { %v1794_v39 = vsel %vm1434_vm4, %v10157_v38, 0.0 }
 0x682   : > { %1795 = vadd.xlane.f32.xlu1 %v1794_v39 }
 0x70f   : > { %v1796_v42 = vpop.xlane.xlu1 %1795 }
 0x710   : > { %10158 = vrcp.f32 %v1796_v42  ;;  %v8464_v42 = vld [vmem:[%s10295_s14 + $0x8] sm:$0xf] }
 0x71a   : > { %v10159_v43 = vpop.eup %10158 }
 0x71b   : > { %v1798_v45 = vmul.f32 %v10159_v43, %v10157_v38  ;;  %v2251_v43 = vsel %vm1497_vm5, %v8464_v42, 0 }
 0x71d   : > { %v1799_v46 = vpack.c.bf16 %v1798_v45, %v1798_v45 }
 0x71f   : > { %9514 = vmatmul.mubr.msk.bf16.vlgmr.msra.gmra.mrb[20].mxu0 %vm1434_vm4, %v1799_v46 }
 0x720   : > { %9524 = vmatpush3.bf16.msra.mxu0 %v1899_v47  ;;  %9525 = vmatprep.mubr.msk.bf16.mxu0 %vm10240_vm1, %v10239_v2  ;;  %v9863_v47 = vld [vmem:[%s10265_s17 + $0x30] sm:$0xff]  }
 0x721   : > { %9537 = vmatprep.subr.bf16.mxu0 %v10239_v2 }
 0x727   : > { %9526 = vmatmul.mubr.msk.bf16.vlgmr.msra.gmra.mrb[24].mxu0 %vm1434_vm4, %v1541_v49  ;;  %v9864_v49 = vld [vmem:[%s10265_s17 + $0x38] sm:$0xff]  }
 0x728   : > { %9538 = vmatpush3.bf16.msra.mxu0 %v9857_v48  ;;  %9541 = vmatprep.mubr.msk.bf16.mxu0 %vm10240_vm1, %v10239_v2 }
 0x729   : > { %9539 = vmatprep.subr.bf16.mxu0 %v10239_v2 }
 0x72c   : > { %9540 = vmatpush3.bf16.msra.mxu0 %v9858_v50  ;;  %v9865_v50 = vld [vmem:[%s10275_s25 + $0x30] sm:$0xff]  }
 0x72d   : > { %9553 = vmatprep.subr.bf16.mxu0 %v10239_v2 }
 0x72f   : > { %9542 = vmatmul.mubr.msk.bf16.vlgmr.msra.gmra.mrb[28].mxu0 %vm1261_vm3, %v10481_v16 }
 0x730   : > { %9555 = vmatprep.mubr.msk.bf16.mxu0 %vm10240_vm1, %v10239_v2 }
 0x7f2   : > { %v1840_v51 = vpop.f32.mrb[20].mxu0 }
 0x7f3   : > { %v1846_v53 = vpack.c.bf16 %v1840_v51, %v1840_v51  ;;  %v9515_v54 = vpop.f32.mrb[21].mxu0  ;;  %v9866_v51 = vld [vmem:[%s10275_s25 + $0x38] sm:$0xff]  }
 0x7f4   : > { %v1843_v55 = vpop.f32.mrb[22].mxu0 }
 0x7f5   : > { %v9516_v56 = vpop.f32.mrb[23].mxu0  ;;  %9520 = vmatmul.mubr.msk.bf16.vlgmr.msra.gmra.mrb[20].mxu1 %vm1434_vm4, %v1846_v53  ;;  %v9867_v53 = vld [vmem:[%s10270_s21 + $0x30] sm:$0xff]  }
 0x7f6   : > { %9530 = vmatpush3.bf16.msra.mxu1 %v9859_v52  ;;  %9533 = vmatprep.mubr.msk.bf16.mxu1 %vm10240_vm1, %v10239_v2 }
 0x7f7   : > { %9531 = vmatprep.subr.bf16.mxu1 %v10239_v2 }
 0x7fa   : > { %v1935_v58 = vpop.f32.mrb[24].mxu0  ;;  %9532 = vmatpush3.bf16.msra.mxu1 %v9860_v57 }
 0x7fb   : > { %v9527_v60 = vpop.f32.mrb[25].mxu0  ;;  %9545 = vmatprep.subr.bf16.mxu1 %v10239_v2 }
 0x7fc   : > { %v1938_v61 = vpop.f32.mrb[26].mxu0 }
 0x7fd   : > { %v9528_v62 = vpop.f32.mrb[27].mxu0  ;;  %9534 = vmatmul.mubr.msk.bf16.vlgmr.msra.gmra.mrb[24].mxu1 %vm1261_vm3, %v10481_v16 }
 0x7fe   : > { %9546 = vmatpush3.bf16.msra.mxu1 %v9861_v59  ;;  %9549 = vmatprep.mubr.msk.bf16.mxu1 %vm10240_vm1, %v10239_v2 }
 0x7ff   : > { %9547 = vmatprep.subr.bf16.mxu1 %v10239_v2 }
 0x802   : > { %v2065_v1 = vpop.f32.mrb[28].mxu0  ;;  %9548 = vmatpush3.bf16.msra.mxu1 %v9862_v63  ;;  %v8489_v63 = vld [vmem:[%s10290_s8 + $0x3] ss:$0 sm:$0xff] }
 0x803   : > { %v2066_v3 = vadd.f32 %v8449_v0, %v2065_v1  ;;  %v9543_v4 = vpop.f32.mrb[29].mxu0  ;;  %9559 = vmatprep.subr.bf16.mxu1 %v10239_v2 }
 0x804   : > { %v2068_v5 = vpop.f32.mrb[30].mxu0 }
 0x805   : > { %v2137_v6 = vpack.c.bf16 %v2066_v3, %v2066_v3  ;;  %v9544_v7 = vpop.f32.mrb[31].mxu0  ;;  %9550 = vmatmul.mubr.msk.bf16.vlgmr.msra.gmra.mrb[28].mxu1 %vm1261_vm3, %v10481_v16 }
 0x806   : > { %9561 = vmatprep.mubr.msk.bf16.mxu1 %vm10240_vm1, %v10239_v2 }
 0x807   : > { %v2143_v8 = vsel %vm1434_vm4, %v2137_v6, 0 }
 0x808   : > { %9554 = vmatpush3.bf16.xpose.msra.mxu0 %v2143_v8 }
 0x809   : > { %9565 = vmatprep.subr.bf16.mxu0 %v10239_v2 }
 0x8c8   : > { %v1889_v9 = vpop.f32.mrb[20].mxu1 }
 0x8c9   : > { %v10591_v10 = vadd.f32 %v1935_v58, %v1889_v9  ;;  %v9521_v11 = vpop.f32.mrb[21].mxu1  ;;  %v9868_v58 = vld [vmem:[%s10270_s21 + $0x38] sm:$0xff]  }
 0x8ca   : > { %v1892_v13 = vpop.f32.mrb[22].mxu1 }
 0x8cb   : > { %v9522_v14 = vpop.f32.mrb[23].mxu1 }
 0x8cc   : > { %v8480_v14 = vld [vmem:[%s10285_s3 + $0x3] ss:$0 sm:$0xff] }
 0x8d0   : > { %v2000_v17 = vpop.f32.mrb[24].mxu1 }
 0x8d1   : > { %v2001_v18 = vadd.f32 %v8440_v15, %v2000_v17  ;;  %v9535_v19 = vpop.f32.mrb[25].mxu1 }
 0x8d2   : > { %v2003_v20 = vpop.f32.mrb[26].mxu1 }
 0x8d3   : > { %v2136_v21 = vpack.c.bf16 %v2001_v18, %v2001_v18  ;;  %v9536_v22 = vpop.f32.mrb[27].mxu1 }
 0x8d4   : > { %v8471_v22 = vld [vmem:[%s10280_s29 + $0x3] ss:$0 sm:$0xff] }
 0x8d5   : > { %9556 = vmatmul.mubr.msk.bf16.vlgmr.msra.gmra.mrb[32].mxu0 %vm1434_vm4, %v2136_v21 }
 0x8d6   : > { %9567 = vmatprep.mubr.msk.bf16.mxu0 %vm10240_vm1, %v10239_v2  ;;  %9566 = vmatpush3.bf16.msra.mxu0 %v2251_v43 }
 0x8d7   : > { %9579 = vmatprep.subr.bf16.mxu0 %v10239_v2 }
 0x8d8   : > { %v2130_v24 = vpop.f32.mrb[28].mxu1 }
 0x8d9   : > { %v2131_v25 = vadd.f32 %v8458_v23, %v2130_v24  ;;  %v9551_v26 = vpop.f32.mrb[29].mxu1 }
 0x8da   : > { %v2133_v27 = vpop.f32.mrb[30].mxu1 }
 0x8db   : > { %v2138_v28 = vpack.c.bf16 %v2131_v25, %v2131_v25  ;;  %v9552_v29 = vpop.f32.mrb[31].mxu1 }
 0x8dd   : > { %v2202_v30 = vsel %vm1497_vm5, %v2138_v28, 0 }
 0x8de   : > { %9560 = vmatpush3.bf16.msra.mxu1 %v2202_v30 }
 0x8df   : > { %9571 = vmatprep.subr.bf16.mxu1 %v10239_v2 }
 0x9a8   : > { %v2179_v31 = vpop.f32.mrb[32].mxu0 }
 0x9a9   : > { %v2185_v32 = vmul.f32 0.35355338, %v2179_v31  ;;  %v9557_v33 = vpop.f32.mrb[33].mxu0 }
 0x9aa   : > { %v2182_v34 = vpop.f32.mrb[34].mxu0 }
 0x9ab   : > { %v9558_v35 = vpop.f32.mrb[35].mxu0  ;;  %v2186_v36 = vsel %vm1434_vm4, %v2185_v32, -inf }
 0x9ac   : > { %2187 = vmax.xlane.f32.xlu0 %v2186_v36  ;;  %v8495_v36 = vld [vmem:[%s10295_s14 + $0xc] sm:$0xf] }
 0xa39   : > { %v2188_v37 = vpop.xlane.xlu0 %2187 }
 0xa3a   : > { %v2189_v38 = vsub.f32 %v2185_v32, %v2188_v37  ;;  %v2604_v37 = vsel %vm1497_vm5, %v8495_v36, 0 }
 0xa3c   : > { %v2190_v39 = vmul.f32 1.442695, %v2189_v38 }
 0xa3e   : > { %10160 = vpow2.f32 %v2190_v39 }
 0xa48   : > { %v10161_v40 = vpop.eup %10160 }
 0xa49   : > { %v2192_v41 = vsel %vm1434_vm4, %v10161_v40, 0.0 }
 0xa4a   : > { %2193 = vadd.xlane.f32.xlu1 %v2192_v41 }
 0xad7   : > { %v2194_v44 = vpop.xlane.xlu1 %2193 }
 0xad8   : > { %10162 = vrcp.f32 %v2194_v44 }
 0xae2   : > { %v10163_v45 = vpop.eup %10162 }
 0xae3   : > { %v2196_v46 = vmul.f32 %v10163_v45, %v10161_v40 }
 0xae5   : > { %v2197_v48 = vpack.c.bf16 %v2196_v46, %v2196_v46 }
 0xae7   : > { %9562 = vmatmul.mubr.msk.bf16.vlgmr.msra.gmra.mrb[32].mxu1 %vm1434_vm4, %v2197_v48  ;;  %v8497_v48 = vld [vmem:[%s10300_s19] ss:$0 sm:$0xff] }
 0xae8   : > { %9572 = vmatpush3.bf16.msra.mxu1 %v9863_v47  ;;  %9575 = vmatprep.mubr.msk.bf16.mxu1 %vm10240_vm1, %v10239_v2 }
 0xae9   : > { %9573 = vmatprep.subr.bf16.mxu1 %v10239_v2 }
 0xaec   : > { %9574 = vmatpush3.bf16.msra.mxu1 %v9864_v49 }
 0xaed   : > { %9587 = vmatprep.subr.bf16.mxu1 %v10239_v2 }
 0xaef   : > { %9576 = vmatmul.mubr.msk.bf16.vlgmr.msra.gmra.mrb[36].mxu1 %vm1261_vm3, %v10481_v16 }
 0xaf0   : > { %9588 = vmatpush3.bf16.msra.mxu1 %v9865_v50  ;;  %9591 = vmatprep.mubr.msk.bf16.mxu1 %vm10240_vm1, %v10239_v2 }
 0xaf1   : > { %9589 = vmatprep.subr.bf16.mxu1 %v10239_v2 }
 0xaf4   : > { %9590 = vmatpush3.bf16.msra.mxu1 %v9866_v51 }
 0xaf5   : > { %9601 = vmatprep.subr.bf16.mxu1 %v10239_v2 }
 0xaf7   : > { %9592 = vmatmul.mubr.msk.bf16.vlgmr.msra.gmra.mrb[40].mxu1 %vm1261_vm3, %v10481_v16 }
 0xaf8   : > { %9603 = vmatprep.mubr.msk.bf16.mxu1 %vm10240_vm1, %v10239_v2 }
 0xbba   : > { %v2238_v52 = vpop.f32.mrb[32].mxu1 }
 0xbbb   : > { %v2244_v54 = vpack.c.bf16 %v2238_v52, %v2238_v52  ;;  %v9563_v55 = vpop.f32.mrb[33].mxu1 }
 0xbbc   : > { %v2241_v56 = vpop.f32.mrb[34].mxu1 }
 0xbbd   : > { %v9564_v57 = vpop.f32.mrb[35].mxu1  ;;  %9568 = vmatmul.mubr.msk.bf16.vlgmr.msra.gmra.mrb[36].mxu0 %vm1434_vm4, %v2244_v54 }
 0xbbe   : > { %9580 = vmatpush3.bf16.msra.mxu0 %v9867_v53  ;;  %9583 = vmatprep.mubr.msk.bf16.mxu0 %vm10240_vm1, %v10239_v2 }
 0xbbf   : > { %9581 = vmatprep.subr.bf16.mxu0 %v10239_v2 }
 0xbc2   : > { %v2353_v59 = vpop.f32.mrb[36].mxu1  ;;  %9582 = vmatpush3.bf16.msra.mxu0 %v9868_v58 }
 0xbc3   : > { %v9577_v60 = vpop.f32.mrb[37].mxu1  ;;  %9595 = vmatprep.subr.bf16.mxu0 %v10239_v2  ;;  %v2354_v24 = vadd.f32 %v8471_v22, %v2353_v59 }
 0xbc4   : > { %v2356_v61 = vpop.f32.mrb[38].mxu1 }
 0xbc5   : > { %v9578_v62 = vpop.f32.mrb[39].mxu1  ;;  %9584 = vmatmul.mubr.msk.bf16.vlgmr.msra.gmra.mrb[40].mxu0 %vm1261_vm3, %v10481_v16  ;;  %v2489_v25 = vpack.c.bf16 %v2354_v24, %v2354_v24  ;;  %v2687_v61 = vld [vmem:[%s10305_s24] sm:$0xff] }
 0xbc6   : > { %9597 = vmatprep.mubr.msk.bf16.mxu0 %vm10240_vm1, %v10239_v2  ;;  %v2695_v62 = vld [vmem:[%s10305_s24 + $0x40] sm:$0xff] }
 0xbca   : > { %v2483_v0 = vpop.f32.mrb[40].mxu1 }
 0xbcb   : > { %v2484_v1 = vadd.f32 %v8489_v63, %v2483_v0  ;;  %v9593_v3 = vpop.f32.mrb[41].mxu1  ;;  %v2688_v63 = vld [vmem:[%s10305_s24 + $0x8] sm:$0xff]  ;;  %v8501_v0 = vcombine.high %v2687_v61, %v2695_v62 }
 0xbcc   : > { %v2486_v4 = vpop.f32.mrb[42].mxu1 }
 0xbcd   : > { %v2491_v5 = vpack.c.bf16 %v2484_v1, %v2484_v1  ;;  %v9594_v6 = vpop.f32.mrb[43].mxu1  ;;  %v2696_v1 = vld [vmem:[%s10305_s24 + $0x48] sm:$0xff] }
 0xbce   : > { %v8502_v3 = vcombine.low %v2688_v63, %v2696_v1  ;;  %v8503_v4 = vcombine.high %v2688_v63, %v2696_v1  ;;  %v2711_v6 = vld [vmem:[%s10305_s24 + $0xc0] sm:$0xff]  ;;  %v2709_v63 = vld [vmem:[%s10305_s24 + $0xb0] sm:$0xff]  ;;  %v2710_v1 = vld [vmem:[%s10305_s24 + $0xb8] sm:$0xff] }
 0xbcf   : > { %v2555_v7 = vsel %vm1497_vm5, %v2491_v5, 0  ;;  %v2703_v5 = vld [vmem:[%s10305_s24 + $0x80] sm:$0xff] }
 0xbd0   : > { %9602 = vmatpush3.bf16.msra.mxu1 %v2555_v7  ;;  %v2704_v7 = vld [vmem:[%s10305_s24 + $0x88] sm:$0xff] }
 0xbd1   : > { %2966 = vmatprep.subr.bf16.mxu1 %v8501_v0  ;;  %v2717_v0 = vld [vmem:[%s10305_s24 + $0xf0] sm:$0xff] }
 0xc90   : > { %v2287_v8 = vpop.f32.mrb[36].mxu0 }
 0xc91   : > { %v2293_v9 = vadd.f32 %v2287_v8, %v10591_v10  ;;  %v9569_v11 = vpop.f32.mrb[37].mxu0  ;;  %v8517_v8 = vcombine.high %v2703_v5, %v2711_v6 }
 0xc92   : > { %v2290_v16 = vpop.f32.mrb[38].mxu0  ;;  %v8516_v11 = vcombine.low %v2703_v5, %v2711_v6  ;;  %v8529_v5 = vcombine.high %v2709_v63, %v2717_v0 }
 0xc93   : > { %v9570_v13 = vpop.f32.mrb[39].mxu0 }
 0xc98   : > { %v2418_v15 = vpop.f32.mrb[40].mxu0 }
 0xc99   : > { %v2419_v17 = vadd.f32 %v8480_v14, %v2418_v15  ;;  %v9585_v18 = vpop.f32.mrb[41].mxu0  ;;  %v2689_v14 = vld [vmem:[%s10305_s24 + $0x10] sm:$0xff] }
 0xc9a   : > { %v2421_v19 = vpop.f32.mrb[42].mxu0  ;;  %v2697_v15 = vld [vmem:[%s10305_s24 + $0x50] sm:$0xff] }
 0xc9b   : > { %v2490_v20 = vpack.c.bf16 %v2419_v17, %v2419_v17  ;;  %v9586_v21 = vpop.f32.mrb[43].mxu0  ;;  %v2690_v17 = vld [vmem:[%s10305_s24 + $0x18] sm:$0xff]  ;;  %v8505_v18 = vcombine.high %v2689_v14, %v2697_v15 }
 0xc9c   : > { %v2698_v19 = vld [vmem:[%s10305_s24 + $0x58] sm:$0xff]  ;;  %v8504_v21 = vcombine.low %v2689_v14, %v2697_v15  ;;  %v9873_v14 = vld [vmem:[%s11450_s26 + $0x48] sm:$0xff]  }
 0xc9d   : > { %v2496_v23 = vsel %vm1434_vm4, %v2490_v20, 0  ;;  %v10241_v20 = vmov 0   ;;  %v8506_v22 = vcombine.low %v2690_v17, %v2698_v19  ;;  %v9874_v15 = vld [vmem:[%s11450_s26 + $0xc8] sm:$0xff]  }
 0xc9e   : > { %9596 = vmatpush3.bf16.xpose.msra.mxu0 %v2496_v23  ;;  %v8507_v23 = vcombine.high %v2690_v17, %v2698_v19  ;;  %v9875_v17 = vld [vmem:[%s11450_s26 + $0x8] sm:$0xff]   ;;  %v9877_v19 = vld [vmem:[%s11450_s26 + $0x50] sm:$0xff]  }
 0xc9f   : > { %9607 = vmatprep.subr.bf16.mxu0 %v10239_v2 }
 0xca5   : > { %9598 = vmatmul.mubr.msk.bf16.vlgmr.msra.gmra.mrb[44].mxu0 %vm1434_vm4, %v2489_v25 }
 0xca6   : > { %9609 = vmatprep.mubr.msk.bf16.mxu0 %vm10240_vm1, %v10239_v2  ;;  %9608 = vmatpush3.bf16.msra.mxu0 %v2604_v37 }
 0xca7   : > { %3007 = vmatprep.subr.bf16.mxu0 %v8503_v4 }
 0xd78   : > { %v2532_v10 = vpop.f32.mrb[44].mxu0 }
 0xd79   : > { %v2538_v26 = vmul.f32 0.35355338, %v2532_v10  ;;  %v9599_v27 = vpop.f32.mrb[45].mxu0 }
 0xd7a   : > { %v2535_v28 = vpop.f32.mrb[46].mxu0  ;;  %v8498_v27 = vld [vmem:[%s10325_s20] ss:$0 sm:$0xff] }
 0xd7b   : > { %v9600_v29 = vpop.f32.mrb[47].mxu0  ;;  %v2539_v30 = vsel %vm1434_vm4, %v2538_v26, -inf }
 0xd7c   : > { %2540 = vmax.xlane.f32.xlu0 %v2539_v30  ;;  %v8499_v29 = vld [vmem:[%s10330_s27] ss:$0 sm:$0xff] }
 0xe09   : > { %v2541_v31 = vpop.xlane.xlu0 %2540 }
 0xe0a   : > { %v2542_v32 = vsub.f32 %v2538_v26, %v2541_v31  ;;  %v2705_v31 = vld [vmem:[%s10305_s24 + $0x90] sm:$0xff] }
 0xe0c   : > { %v2543_v33 = vmul.f32 1.442695, %v2542_v32  ;;  %v2713_v32 = vld [vmem:[%s10305_s24 + $0xd0] sm:$0xff] }
 0xe0d   : > { %v8521_v37 = vcombine.high %v2705_v31, %v2713_v32 }
 0xe0e   : > { %10164 = vpow2.f32 %v2543_v33  ;;  %v2706_v33 = vld [vmem:[%s10305_s24 + $0x98] sm:$0xff] }
 0xe18   : > { %v10165_v34 = vpop.eup %10164 }
 0xe19   : > { %v2545_v35 = vsel %vm1434_vm4, %v10165_v34, 0.0 }
 0xe1a   : > { %2546 = vadd.xlane.f32.xlu1 %v2545_v35 }
 0xea7   : > { %v2547_v38 = vpop.xlane.xlu1 %2546 }
 0xea8   : > { %10166 = vrcp.f32 %v2547_v38 }
 0xeb2   : > { %v10167_v39 = vpop.eup %10166 }
 0xeb3   : > { %v2549_v40 = vmul.f32 %v10167_v39, %v10165_v34  ;;  %v2714_v34 = vld [vmem:[%s10305_s24 + $0xd8] sm:$0xff]  ;;  %v2691_v39 = vld [vmem:[%s10305_s24 + $0x20] sm:$0xff] }
 0xeb4   : > { %v8523_v38 = vcombine.high %v2706_v33, %v2714_v34 }
 0xeb5   : > { %v2550_v41 = vpack.c.bf16 %v2549_v40, %v2549_v40  ;;  %v2699_v40 = vld [vmem:[%s10305_s24 + $0x60] sm:$0xff] }
 0xeb7   : > { %9604 = vmatmul.mubr.msk.bf16.vlgmr.msra.gmra.mrb[44].mxu1 %vm1434_vm4, %v2550_v41  ;;  %v2692_v41 = vld [vmem:[%s10305_s24 + $0x28] sm:$0xff] }
 0xeb8   : > { %2998 = vmatprep.mubr.bf16.mxu1 %v10241_v20 }
 0xf8a   : > { %v2591_v42 = vpop.f32.mrb[44].mxu1 }
 0xf8b   : > { %v2597_v43 = vpack.c.bf16 %v2591_v42, %v2591_v42  ;;  %v9605_v44 = vpop.f32.mrb[45].mxu1  ;;  %v2700_v42 = vld [vmem:[%s10305_s24 + $0x68] sm:$0xff] }
 0xf8c   : > { %v2594_v45 = vpop.f32.mrb[46].mxu1  ;;  %v8522_v44 = vcombine.low %v2706_v33, %v2714_v34  ;;  %v9891_v33 = vld [vmem:[%s11450_s26 + $0x28] sm:$0xff]  }
 0xf8d   : > { %v9606_v46 = vpop.f32.mrb[47].mxu1  ;;  %9610 = vmatmul.mubr.msk.bf16.vlgmr.msra.gmra.mrb[48].mxu0 %vm1434_vm4, %v2597_v43  ;;  %v8520_v43 = vcombine.low %v2705_v31, %v2713_v32  ;;  %v8509_v45 = vcombine.high %v2691_v39, %v2699_v40  ;;  %v9889_v31 = vld [vmem:[%s11450_s26 + $0x68] sm:$0xff]  }
 0xf8e   : > { %3008 = vmatpush1.bf16.msra.mxu0 %v8502_v3  ;;  %3039 = vmatprep.mubr.bf16.mxu0 %v10241_v20  ;;  %v8511_v46 = vcombine.high %v2692_v41, %v2700_v42  ;;  %v9890_v32 = vld [vmem:[%s11450_s26 + $0xe8] sm:$0xff]  }
 0xf8f   : > { %v9892_v34 = vld [vmem:[%s11450_s26 + $0xa8] sm:$0xff]  }
0x1060   : > { %v2640_v47 = vpop.f32.mrb[48].mxu0 }
0x1061   : > { %v2646_v49 = vadd.f32 %v2640_v47, %v2293_v9  ;;  %v9611_v50 = vpop.f32.mrb[49].mxu0  ;;  %v2712_v9 = vld [vmem:[%s10305_s24 + $0xc8] sm:$0xff]  ;;  %v2707_v47 = vld [vmem:[%s10305_s24 + $0xa0] sm:$0xff] }
0x1062   : > { %v2643_v51 = vpop.f32.mrb[50].mxu0  ;;  %v8518_v16 = vcombine.low %v2704_v7, %v2712_v9  ;;  %v8519_v13 = vcombine.high %v2704_v7, %v2712_v9  ;;  %v2716_v50 = vld [vmem:[%s10305_s24 + $0xe8] sm:$0xff]  ;;  %v8528_v7 = vcombine.low %v2709_v63, %v2717_v0  ;;  %v9869_v9 = vld [vmem:[%s11450_s26 + $0x40] sm:$0xff]  }
0x1063   : > { %v2654_v52 = vadd.f32 %v8497_v48, %v2646_v49  ;;  %v9612_v53 = vpop.f32.mrb[51].mxu0  ;;  %v2715_v48 = vld [vmem:[%s10305_s24 + $0xe0] sm:$0xff]  ;;  %v2708_v49 = vld [vmem:[%s10305_s24 + $0xa8] sm:$0xff]  ;;  %v8508_v51 = vcombine.low %v2691_v39, %v2699_v40  ;;  %v9896_v39 = vld [vmem:[%s11450_s26 + $0xb0] sm:$0xff]  }
0x1064   : > { %3009 = vmatprep.subr.bf16.mxu0 %v8519_v13  ;;  %v8525_v53 = vcombine.high %v2707_v47, %v2715_v48  ;;  %v9872_v13 = vld [vmem:[%s11450_s26 + $0x80] sm:$0xff]   ;;  %v9897_v40 = vld [vmem:[%s11450_s26 + $0x78] sm:$0xff]  }
0x1065   : > { %v2655_v54 = vadd.f32 %v2654_v52, %v10476_v12  ;;  %v8500_v12 = vcombine.low %v2687_v61, %v2695_v62  ;;  %3010 = vmatpush1.bf16.msra.mxu0 %v8518_v16  ;;  %v8510_v52 = vcombine.low %v2692_v41, %v2700_v42  ;;  %v9871_v16 = vld [vmem:[%s11450_s26] sm:$0xff]   ;;  %v9898_v41 = vld [vmem:[%s11450_s26 + $0xf8] sm:$0xff]  }
0x1066   : > { %3089 = vmatprep.subr.bf16.mxu0 %v8507_v23  ;;  %v9880_v23 = vld [vmem:[%s11450_s26 + $0x90] sm:$0xff]   ;;  %v9899_v42 = vld [vmem:[%s11450_s26 + $0x38] sm:$0xff]  }
0x1067   : > { %v2658_v55 = vsel %vm1261_vm3, %v2655_v54, 0.0  ;;  %2967 = vmatpush1.bf16.msra.mxu1 %v8500_v12  ;;  %v2718_v12 = vld [vmem:[%s10305_s24 + $0xf8] sm:$0xff] }
0x1068   : > { %2659 = vadd.xlane.f32.xlu0 %v2658_v55  ;;  %2968 = vmatprep.subr.bf16.mxu1 %v8517_v8  ;;  %v2693_v55 = vld [vmem:[%s10305_s24 + $0x30] sm:$0xff]  ;;  %v8531_v6 = vcombine.high %v2710_v1, %v2718_v12  ;;  %v8530_v8 = vcombine.low %v2710_v1, %v2718_v12 }
0x106b   : > { %2969 = vmatpush1.bf16.msra.mxu1 %v8516_v11  ;;  %v9870_v11 = vld [vmem:[%s11450_s26 + $0xc0] sm:$0xff]  }
0x106c   : > { %3048 = vmatprep.subr.bf16.mxu1 %v8505_v18  ;;  %v9876_v18 = vld [vmem:[%s11450_s26 + $0x88] sm:$0xff]  }
0x10f5   : > { %v2660_v56 = vpop.xlane.xlu0 %2659 }
0x10f6   : > { %v2662_v57 = vmul.f32 0.03125, %v2660_v56  ;;  %v2701_v56 = vld [vmem:[%s10305_s24 + $0x70] sm:$0xff] }
0x10f7   : > { %v8513_v61 = vcombine.high %v2693_v55, %v2701_v56  ;;  %v8512_v3 = vcombine.low %v2693_v55, %v2701_v56 }
0x10f8   : > { %v2663_v58 = vsub.f32 %v2655_v54, %v2662_v57  ;;  %v8527_v54 = vcombine.high %v2708_v49, %v2716_v50  ;;  %v2694_v57 = vld [vmem:[%s10305_s24 + $0x38] sm:$0xff] }
0x10fa   : > { %v2664_v59 = vmul.f32 %v2663_v58, %v2663_v58 }
0x10fc   : > { %v2665_v60 = vsel %vm1261_vm3, %v2664_v59, 0.0  ;;  %v8524_v59 = vcombine.low %v2707_v47, %v2715_v48 }
0x10fd   : > { %2666 = vadd.xlane.f32.xlu1 %v2665_v60  ;;  %v8526_v60 = vcombine.low %v2708_v49, %v2716_v50  ;;  %v10762_v50 = vld [vmem:[%s11451_s28] sm:$0xff] }
0x118a   : > { %v2667_v24 = vpop.xlane.xlu1 %2666 }
0x118b   : > { %v2668_v25 = vmul.f32 0.03125, %v2667_v24  ;;  %v9881_v24 = vld [vmem:[%s11450_s26 + $0x58] sm:$0xff]  }
0x118d   : > { %v2669_v10 = vadd.f32 1e-05, %v2668_v25  ;;  %v9882_v25 = vld [vmem:[%s11450_s26 + $0xd8] sm:$0xff]  }
0x118f   : > { %10168 = vrsqrt.f32 %v2669_v10  ;;  %v9883_v10 = vld [vmem:[%s11450_s26 + $0x18] sm:$0xff]  }
0x1199   : > { %v10169_v26 = vpop.eup %10168 }
0x119a   : > { %v2671_v28 = vmul.f32 %v10169_v26, %v2663_v58  ;;  %v2702_v58 = vld [vmem:[%s10305_s24 + $0x78] sm:$0xff] }
0x119b   : > { %v8515_v62 = vcombine.high %v2694_v57, %v2702_v58  ;;  %v8514_v4 = vcombine.low %v2694_v57, %v2702_v58  ;;  %v9884_v26 = vld [vmem:[%s11450_s26 + $0x98] sm:$0xff]  }
0x119c   : > { %v2678_v30 = vmul.f32 %v8498_v27, %v2671_v28  ;;  %v9885_v27 = vld [vmem:[%s11450_s26 + $0x60] sm:$0xff]  }
0x119d   : > { %v9886_v28 = vld [vmem:[%s11450_s26 + $0xe0] sm:$0xff]  }
0x119e   : > { %v10675_v35 = vadd.f32 %v8499_v29, %v2678_v30  ;;  %v9887_v29 = vld [vmem:[%s11450_s26 + $0x20] sm:$0xff]  }
0x119f   : > { %v9888_v30 = vld [vmem:[%s11450_s26 + $0xa0] sm:$0xff]  }
0x11a0   : > { %v10679_v36 = vpack.c.bf16 %v10675_v35, %v10675_v35 }
0x11a2   : > { %8532 = vmatmul.mubr.msk.bf16.vlgmr.msra.gmra.mrb[48].mxu1 %vm1261_vm3, %v10679_v36  ;;  %8533 = vmatmul.mubr.msk.bf16.vlgmr.msra.gmra.mrb[52].mxu0 %vm1261_vm3, %v10679_v36 }
0x11a3   : > { %3049 = vmatpush1.bf16.msra.mxu1 %v8504_v21  ;;  %3090 = vmatpush1.bf16.msra.mxu0 %v8506_v22  ;;  %v9878_v21 = vld [vmem:[%s11450_s26 + $0xd0] sm:$0xff]  }
0x11a4   : > { %3050 = vmatprep.subr.bf16.mxu1 %v8521_v37  ;;  %3091 = vmatprep.subr.bf16.mxu0 %v8523_v38  ;;  %v9879_v22 = vld [vmem:[%s11450_s26 + $0x10] sm:$0xff]  }
0x11a5   : > { %3080 = vmatprep.mubr.bf16.mxu1 %v10241_v20  ;;  %3121 = vmatprep.mubr.bf16.mxu0 %v10241_v20  ;;  %v9894_v37 = vld [vmem:[%s11450_s26 + $0xf0] sm:$0xff]  }
0x11a6   : > { %v9895_v38 = vld [vmem:[%s11450_s26 + $0x30] sm:$0xff]  }
0x11a7   : > { %3051 = vmatpush1.bf16.msra.mxu1 %v8520_v43  ;;  %3092 = vmatpush1.bf16.msra.mxu0 %v8522_v44  ;;  %v9900_v43 = vld [vmem:[%s11450_s26 + $0xb8] sm:$0xff]   ;;  %v9901_v44 = vld [vmem:[%s11450_s26 + $0x140] sm:$0xff]  }
0x11a8   : > { %3130 = vmatprep.subr.bf16.mxu1 %v8509_v45  ;;  %3171 = vmatprep.subr.bf16.mxu0 %v8511_v46  ;;  %v9902_v45 = vld [vmem:[%s11450_s26 + $0x1c0] sm:$0xff]   ;;  %v2723_v46 = vlaneseq }
0x11aa   : > { %8534 = vmatmul.mubr.msk.bf16.vlgmr.msra.gmra.mrb[52].mxu1 %vm1261_vm3, %v10679_v36  ;;  %8535 = vmatmul.mubr.msk.bf16.vlgmr.msra.gmra.mrb[56].mxu0 %vm1261_vm3, %v10679_v36  ;;  %v10753_v47 = vshrl.u32 %v2723_v46, 7 }
0x11ab   : > { %3131 = vmatpush1.bf16.msra.mxu1 %v8508_v51  ;;  %3172 = vmatpush1.bf16.msra.mxu0 %v8510_v52 }
0x11ac   : > { %3132 = vmatprep.subr.bf16.mxu1 %v8525_v53  ;;  %3173 = vmatprep.subr.bf16.mxu0 %v8527_v54  ;;  %v10756_v48 = vsub.s32 0, %v10753_v47  ;;  %v10759_v49 = vsub.s32 2, %v10753_v47  ;;  %v10765_v51 = vsub.s32 1, %v10753_v47  ;;  %v10768_v52 = vsub.s32 3, %v10753_v47 }
0x11ad   : > { %3162 = vmatprep.mubr.bf16.mxu1 %v10241_v20  ;;  %3203 = vmatprep.mubr.bf16.mxu0 %v10241_v20 }
0x11ae   : > { %v2726_v53 = vrot.slane %v10762_v50, %v10756_v48  ;;  %v2734_v54 = vrot.slane %v10762_v50, %v10759_v49  ;;  %v2730_v55 = vrot.slane %v10762_v50, %v10765_v51  ;;  %v2738_v56 = vrot.slane %v10762_v50, %v10768_v52 }
0x11af   : > { %3133 = vmatpush1.bf16.msra.mxu1 %v8524_v59  ;;  %3174 = vmatpush1.bf16.msra.mxu0 %v8526_v60 }
0x11b0   : > { %3212 = vmatprep.subr.bf16.mxu1 %v8513_v61  ;;  %3253 = vmatprep.subr.bf16.mxu0 %v8515_v62 }
0x11b2   : > { %8536 = vmatmul.mubr.msk.bf16.vlgmr.msra.gmra.mrb[56].mxu1 %vm1261_vm3, %v10679_v36  ;;  %8537 = vmatmul.mubr.msk.bf16.vlgmr.msra.gmra.mrb[60].mxu0 %vm1261_vm3, %v10679_v36 }
0x11b3   : > { %3213 = vmatpush1.bf16.msra.mxu1 %v8512_v3  ;;  %3254 = vmatpush1.bf16.msra.mxu0 %v8514_v4  ;;  %v10779_v3 = vsub.s32 5, %v10753_v47  ;;  %v10782_v4 = vsub.s32 7, %v10753_v47 }
0x11b4   : > { %3214 = vmatprep.subr.bf16.mxu1 %v8529_v5  ;;  %3255 = vmatprep.subr.bf16.mxu0 %v8531_v6 }
0x11b5   : > { %3244 = vmatprep.mubr.bf16.mxu1 %v10241_v20  ;;  %3285 = vmatprep.mubr.bf16.mxu0 %v10241_v20 }
0x11b7   : > { %3215 = vmatpush1.bf16.msra.mxu1 %v8528_v7  ;;  %3256 = vmatpush1.bf16.msra.mxu0 %v8530_v8 }
0x11b8   : > { %9022 = vmatprep.subr.bf16.mxu1 %v9869_v9  ;;  %9044 = vmatprep.subr.bf16.mxu0 %v9870_v11 }
0x11ba   : > { %8538 = vmatmul.mubr.msk.bf16.vlgmr.msra.gmra.mrb[60].mxu1 %vm1261_vm3, %v10679_v36  ;;  %8539 = vmatmul.mubr.msk.bf16.vlgmr.msra.gmra.mrb[64].mxu0 %vm1261_vm3, %v10679_v36  ;;  %v9893_v36 = vld [vmem:[%s11450_s26 + $0x70] sm:$0xff]  }
0x11bb   : > { %9023 = vmatpush3.bf16.msra.mxu1 %v9871_v16  ;;  %9045 = vmatpush3.bf16.msra.mxu0 %v9872_v13 }
0x11bc   : > { %9024 = vmatprep.subr.bf16.mxu1 %v9873_v14  ;;  %9046 = vmatprep.subr.bf16.mxu0 %v9874_v15  ;;  %v2746_v14 = vrot.slane %v10762_v50, %v10779_v3  ;;  %v2754_v15 = vrot.slane %v10762_v50, %v10782_v4 }
0x11bf   : > { %9025 = vmatpush3.bf16.msra.mxu1 %v9875_v17  ;;  %9047 = vmatpush3.bf16.msra.mxu0 %v9876_v18  ;;  %v9903_v17 = vld [vmem:[%s11450_s26 + $0x100] sm:$0xff]  }
0x11c0   : > { %9026 = vmatprep.subr.bf16.mxu1 %v9877_v19  ;;  %9048 = vmatprep.subr.bf16.mxu0 %v9878_v21  ;;  %v9904_v18 = vld [vmem:[%s11450_s26 + $0x180] sm:$0xff]  }
0x11c3   : > { %9027 = vmatpush3.bf16.msra.mxu1 %v9879_v22  ;;  %9049 = vmatpush3.bf16.msra.mxu0 %v9880_v23  ;;  %v9905_v22 = vld [vmem:[%s11450_s26 + $0x148] sm:$0xff]  }
0x11c4   : > { %9028 = vmatprep.subr.bf16.mxu1 %v9881_v24  ;;  %9050 = vmatprep.subr.bf16.mxu0 %v9882_v25  ;;  %v9906_v23 = vld [vmem:[%s11450_s26 + $0x1c8] sm:$0xff]  }
0x11c7   : > { %9029 = vmatpush3.bf16.msra.mxu1 %v9883_v10  ;;  %9051 = vmatpush3.bf16.msra.mxu0 %v9884_v26 }
0x11c8   : > { %9030 = vmatprep.subr.bf16.mxu1 %v9885_v27  ;;  %9052 = vmatprep.subr.bf16.mxu0 %v9886_v28 }
0x11cb   : > { %9031 = vmatpush3.bf16.msra.mxu1 %v9887_v29  ;;  %9053 = vmatpush3.bf16.msra.mxu0 %v9888_v30 }
0x11cc   : > { %9032 = vmatprep.subr.bf16.mxu1 %v9889_v31  ;;  %9054 = vmatprep.subr.bf16.mxu0 %v9890_v32  ;;  %v9907_v31 = vld [vmem:[%s11450_s26 + $0x108] sm:$0xff]  }
0x11cd   : > { %v9908_v32 = vld [vmem:[%s11450_s26 + $0x188] sm:$0xff]  }
0x11cf   : > { %9033 = vmatpush3.bf16.msra.mxu1 %v9891_v33  ;;  %9055 = vmatpush3.bf16.msra.mxu0 %v9892_v34 }
0x11d0   : > { %9034 = vmatprep.subr.bf16.mxu1 %v9893_v36  ;;  %9056 = vmatprep.subr.bf16.mxu0 %v9894_v37  ;;  %v9909_v36 = vld [vmem:[%s11450_s26 + $0x150] sm:$0xff]  }
0x11d1   : > { %v9910_v37 = vld [vmem:[%s11450_s26 + $0x1d0] sm:$0xff]  }
0x11d3   : > { %9035 = vmatpush3.bf16.msra.mxu1 %v9895_v38  ;;  %9057 = vmatpush3.bf16.msra.mxu0 %v9896_v39 }
0x11d4   : > { %9036 = vmatprep.subr.bf16.mxu1 %v9897_v40  ;;  %9058 = vmatprep.subr.bf16.mxu0 %v9898_v41 }
0x11d7   : > { %9037 = vmatpush3.bf16.msra.mxu1 %v9899_v42  ;;  %9059 = vmatpush3.bf16.msra.mxu0 %v9900_v43  ;;  %v9911_v42 = vld [vmem:[%s11450_s26 + $0x110] sm:$0xff]  }
0x11d8   : > { %9066 = vmatprep.subr.bf16.mxu1 %v9901_v44  ;;  %9088 = vmatprep.subr.bf16.mxu0 %v9902_v45  ;;  %v9912_v43 = vld [vmem:[%s11450_s26 + $0x190] sm:$0xff]   ;;  %v9913_v44 = vld [vmem:[%s11450_s26 + $0x158] sm:$0xff]  }
0x11d9   : > { %v9914_v45 = vld [vmem:[%s11450_s26 + $0x1d8] sm:$0xff]  }
0x1275   : > { %v3000_v57 = vpop.f32.mrb[48].mxu1  ;;  %v3041_v58 = vpop.f32.mrb[52].mxu0 }
0x1276   : > { %v3001_v59 = vadd.f32 %v3000_v57, %v2726_v53  ;;  %v3042_v60 = vadd.f32 %v3041_v58, %v2734_v54  ;;  %v3002_v61 = vpop.f32.mrb[49].mxu1  ;;  %v3043_v62 = vpop.f32.mrb[53].mxu0  ;;  %v9915_v58 = vld [vmem:[%s11450_s26 + $0x118] sm:$0xff]  }
0x1277   : > { %v3003_v63 = vadd.f32 %v3002_v61, %v2730_v55  ;;  %v3044_v0 = vadd.f32 %v3043_v62, %v2738_v56  ;;  %v3004_v1 = vpop.f32.mrb[50].mxu1  ;;  %v3045_v12 = vpop.f32.mrb[54].mxu0 }
0x1278   : > { %v3294_v5 = vmax.f32 %v3001_v59, 0.0  ;;  %v3296_v6 = vmax.f32 %v3042_v60, 0.0  ;;  %v3005_v7 = vpop.f32.mrb[51].mxu1  ;;  %v3046_v8 = vpop.f32.mrb[55].mxu0  ;;  %v9916_v59 = vld [vmem:[%s11450_s26 + $0x198] sm:$0xff]   ;;  %v10811_v60 = vsub.s32 6, %v10753_v47 }
0x1279   : > { %v3295_v9 = vmax.f32 %v3003_v63, 0.0  ;;  %v3297_v11 = vmax.f32 %v3044_v0, 0.0  ;;  %v9917_v63 = vld [vmem:[%s11450_s26 + $0x160] sm:$0xff]   ;;  %v10816_v1 = vld [vmem:[%s11451_s28 + $0x8] sm:$0xff]  ;;  %v10823_v7 = vsub.s32 4, %v10753_v47 }
0x127a   : > { %v3310_v19 = vpack.c.bf16 %v3294_v5, %v3294_v5  ;;  %v3312_v21 = vpack.c.bf16 %v3296_v6, %v3296_v6  ;;  %v9918_v0 = vld [vmem:[%s11450_s26 + $0x1e0] sm:$0xff]   ;;  %v2782_v12 = vrot.slane %v10816_v1, %v10811_v60  ;;  %v9921_v8 = vld [vmem:[%s11450_s26 + $0x168] sm:$0xff]  }
0x127b   : > { %v3311_v16 = vpack.c.bf16 %v3295_v9, %v3295_v9  ;;  %v3313_v13 = vpack.c.bf16 %v3297_v11, %v3297_v11  ;;  %v9919_v5 = vld [vmem:[%s11450_s26 + $0x120] sm:$0xff]   ;;  %v9922_v9 = vld [vmem:[%s11450_s26 + $0x1e8] sm:$0xff]  }
0x127c   : > { %v9920_v6 = vld [vmem:[%s11450_s26 + $0x1a0] sm:$0xff]  }
0x127d   : > { %v10792_v24 = vpop.f32.mrb[52].mxu1  ;;  %v10794_v25 = vpop.f32.mrb[56].mxu0  ;;  %4389 = vmatprep.mubr.bf16.mxu1 %v3311_v16  ;;  %4429 = vmatprep.mubr.bf16.mxu0 %v3313_v13 }
0x127e   : > { %v3084_v10 = vpop.f32.mrb[53].mxu1  ;;  %v3125_v26 = vpop.f32.mrb[57].mxu0  ;;  %4390 = vmatmul.mubr.bf16.vlgmr.msra.gmra.mrb[64].mxu1 %v3310_v19  ;;  %4430 = vmatmul.mubr.bf16.vlgmr.msra.gmra.mrb[68].mxu0 %v3312_v21  ;;  %v9924_v19 = vld [vmem:[%s11450_s26 + $0x1a8] sm:$0xff]   ;;  %v2742_v21 = vrot.slane %v10762_v50, %v10823_v7 }
0x127f   : > { %v3085_v27 = vadd.f32 %v3084_v10, %v2746_v14  ;;  %v3126_v28 = vadd.f32 %v3125_v26, %v2754_v15  ;;  %9067 = vmatpush3.bf16.msra.mxu1 %v9903_v17  ;;  %9089 = vmatpush3.bf16.msra.mxu0 %v9904_v18  ;;  %v3086_v29 = vpop.f32.mrb[54].mxu1  ;;  %v3127_v30 = vpop.f32.mrb[58].mxu0  ;;  %v9923_v18 = vld [vmem:[%s11450_s26 + $0x128] sm:$0xff]   ;;  %v9925_v26 = vld [vmem:[%s11450_s26 + $0x170] sm:$0xff]  }
0x1280   : > { %v3087_v33 = vpop.f32.mrb[55].mxu1  ;;  %v3128_v34 = vpop.f32.mrb[59].mxu0  ;;  %9068 = vmatprep.subr.bf16.mxu1 %v9905_v22  ;;  %9090 = vmatprep.subr.bf16.mxu0 %v9906_v23  ;;  %v2750_v22 = vrot.slane %v10762_v50, %v10811_v60  ;;  %v2770_v29 = vrot.slane %v10816_v1, %v10768_v52  ;;  %v9927_v30 = vld [vmem:[%s11450_s26 + $0x130] sm:$0xff]  }
0x1281   : > { %v3299_v38 = vmax.f32 %v3085_v27, 0.0  ;;  %v3301_v39 = vmax.f32 %v3126_v28, 0.0  ;;  %v9926_v27 = vld [vmem:[%s11450_s26 + $0x1f0] sm:$0xff]   ;;  %v2762_v28 = vrot.slane %v10816_v1, %v10765_v51  ;;  %v9929_v33 = vld [vmem:[%s11450_s26 + $0x178] sm:$0xff]  }
0x1282   : > { %v9928_v50 = vld [vmem:[%s11450_s26 + $0x1b0] sm:$0xff]   ;;  %v9930_v34 = vld [vmem:[%s11450_s26 + $0x1f8] sm:$0xff]  }
0x1283   : > { %v3315_v40 = vpack.c.bf16 %v3299_v38, %v3299_v38  ;;  %v3317_v41 = vpack.c.bf16 %v3301_v39, %v3301_v39  ;;  %9069 = vmatpush3.bf16.msra.mxu1 %v9907_v31  ;;  %9091 = vmatpush3.bf16.msra.mxu0 %v9908_v32  ;;  %v3083_v31 = vadd.f32 %v10792_v24, %v2742_v21  ;;  %v9931_v38 = vld [vmem:[%s11450_s26 + $0x138] sm:$0xff]   ;;  %v9933_v24 = vld [vmem:[%s11450_s26 + $0x240] sm:$0xff]   ;;  %v9953_v21 = vld [vmem:[%s11450_s26 + $0x268] sm:$0xff]  }
0x1284   : > { %9070 = vmatprep.subr.bf16.mxu1 %v9909_v36  ;;  %9092 = vmatprep.subr.bf16.mxu0 %v9910_v37  ;;  %v3124_v32 = vadd.f32 %v10794_v25, %v2750_v22  ;;  %v9932_v39 = vld [vmem:[%s11450_s26 + $0x1b8] sm:$0xff]   ;;  %v9934_v25 = vld [vmem:[%s11450_s26 + $0x2c0] sm:$0xff]   ;;  %v9954_v22 = vld [vmem:[%s11450_s26 + $0x2e8] sm:$0xff]  }
0x1285   : > { %v10804_v46 = vpop.f32.mrb[56].mxu1  ;;  %v10806_v53 = vpop.f32.mrb[60].mxu0  ;;  %4469 = vmatprep.mubr.bf16.mxu1 %v3315_v40  ;;  %4509 = vmatprep.mubr.bf16.mxu0 %v3317_v41  ;;  %v3298_v40 = vmax.f32 %v3083_v31, 0.0  ;;  %v9959_v31 = vld [vmem:[%s11450_s26 + $0x230] sm:$0xff]  }
0x1286   : > { %v3166_v54 = vpop.f32.mrb[57].mxu1  ;;  %v3207_v55 = vpop.f32.mrb[61].mxu0  ;;  %v3300_v41 = vmax.f32 %v3124_v32, 0.0 }
0x1287   : > { %9071 = vmatpush3.bf16.msra.mxu1 %v9911_v42  ;;  %9093 = vmatpush3.bf16.msra.mxu0 %v9912_v43  ;;  %v3168_v56 = vpop.f32.mrb[58].mxu1  ;;  %v3209_v57 = vpop.f32.mrb[62].mxu0  ;;  %v3167_v36 = vadd.f32 %v3166_v54, %v2762_v28  ;;  %v3208_v37 = vadd.f32 %v3207_v55, %v2770_v29  ;;  %v9936_v55 = vld [vmem:[%s11450_s26 + $0x280] sm:$0xff]   ;;  %v2766_v28 = vrot.slane %v10816_v1, %v10759_v49  ;;  %v9958_v29 = vld [vmem:[%s11450_s26 + $0x2f0] sm:$0xff]  }
0x1288   : > { %v3169_v61 = vpop.f32.mrb[59].mxu1  ;;  %v3210_v62 = vpop.f32.mrb[63].mxu0  ;;  %9072 = vmatprep.subr.bf16.mxu1 %v9913_v44  ;;  %9094 = vmatprep.subr.bf16.mxu0 %v9914_v45  ;;  %v9935_v44 = vld [vmem:[%s11450_s26 + $0x200] sm:$0xff]   ;;  %v3314_v45 = vpack.c.bf16 %v3298_v40, %v3298_v40  ;;  %v3316_v54 = vpack.c.bf16 %v3300_v41, %v3300_v41  ;;  %v9937_v57 = vld [vmem:[%s11450_s26 + $0x248] sm:$0xff]   ;;  %v9963_v40 = vld [vmem:[%s11450_s26 + $0x238] sm:$0xff]  }
0x1289   : > { %v3303_v42 = vmax.f32 %v3167_v36, 0.0  ;;  %v3305_v43 = vmax.f32 %v3208_v37, 0.0  ;;  %v9939_v61 = vld [vmem:[%s11450_s26 + $0x208] sm:$0xff]   ;;  %v3206_v36 = vadd.f32 %v10806_v53, %v2766_v28  ;;  %v9962_v37 = vld [vmem:[%s11450_s26 + $0x2f8] sm:$0xff]   ;;  %v9966_v53 = vld [vmem:[%s11450_s26 + $0x3c0] sm:$0xff]  }
0x128a   : > { %v9940_v62 = vld [vmem:[%s11450_s26 + $0x288] sm:$0xff]  }
0x128b   : > { %9073 = vmatpush3.bf16.msra.mxu1 %v9915_v58  ;;  %9095 = vmatpush3.bf16.msra.mxu0 %v9916_v59  ;;  %v3319_v56 = vpack.c.bf16 %v3303_v42, %v3303_v42  ;;  %v9938_v58 = vld [vmem:[%s11450_s26 + $0x2c8] sm:$0xff]   ;;  %v3321_v59 = vpack.c.bf16 %v3305_v43, %v3305_v43 }
0x128c   : > { %9074 = vmatprep.subr.bf16.mxu1 %v9917_v63  ;;  %9096 = vmatprep.subr.bf16.mxu0 %v9918_v0  ;;  %v9941_v63 = vld [vmem:[%s11450_s26 + $0x250] sm:$0xff]  }
0x128d   : > { %v10827_v11 = vpop.f32.mrb[60].mxu1  ;;  %v3287_v16 = vpop.f32.mrb[64].mxu0  ;;  %v9942_v0 = vld [vmem:[%s11450_s26 + $0x2d0] sm:$0xff]  }
0x128e   : > { %v10829_v13 = vadd.f32 %v3287_v16, %v2782_v12  ;;  %v10831_v14 = vpop.f32.mrb[61].mxu1  ;;  %v10833_v15 = vpop.f32.mrb[65].mxu0  ;;  %v9943_v12 = vld [vmem:[%s11450_s26 + $0x210] sm:$0xff]   ;;  %v9948_v16 = vld [vmem:[%s11450_s26 + $0x298] sm:$0xff]  }
0x128f   : > { %9075 = vmatpush3.bf16.msra.mxu1 %v9919_v5  ;;  %9097 = vmatpush3.bf16.msra.mxu0 %v9920_v6  ;;  %v3250_v17 = vpop.f32.mrb[62].mxu1  ;;  %v3291_v47 = vpop.f32.mrb[66].mxu0  ;;  %v9944_v5 = vld [vmem:[%s11450_s26 + $0x290] sm:$0xff]   ;;  %v9945_v6 = vld [vmem:[%s11450_s26 + $0x258] sm:$0xff]  }
0x1290   : > { %v3251_v23 = vpop.f32.mrb[63].mxu1  ;;  %v3292_v10 = vpop.f32.mrb[67].mxu0  ;;  %9076 = vmatprep.subr.bf16.mxu1 %v9921_v8  ;;  %9098 = vmatprep.subr.bf16.mxu0 %v9922_v9  ;;  %v9946_v8 = vld [vmem:[%s11450_s26 + $0x2d8] sm:$0xff]   ;;  %v9949_v17 = vld [vmem:[%s11450_s26 + $0x260] sm:$0xff]  }
0x1291   : > { %v9947_v9 = vld [vmem:[%s11450_s26 + $0x218] sm:$0xff]   ;;  %v9950_v47 = vld [vmem:[%s11450_s26 + $0x2e0] sm:$0xff]   ;;  %v9955_v23 = vld [vmem:[%s11450_s26 + $0x228] sm:$0xff]   ;;  %v2758_v10 = vrot.slane %v10816_v1, %v10756_v48 }
0x1293   : > { %9077 = vmatpush3.bf16.msra.mxu1 %v9923_v18  ;;  %9099 = vmatpush3.bf16.msra.mxu0 %v9924_v19  ;;  %v9951_v18 = vld [vmem:[%s11450_s26 + $0x220] sm:$0xff]   ;;  %v3165_v32 = vadd.f32 %v10804_v46, %v2758_v10  ;;  %v9964_v46 = vld [vmem:[%s11450_s26 + $0x2b8] sm:$0xff]   ;;  %v9989_v10 = vld [vmem:[%s11450_s26 + $0x370] sm:$0xff]  }
0x1294   : > { %9078 = vmatprep.subr.bf16.mxu1 %v9925_v26  ;;  %9100 = vmatprep.subr.bf16.mxu0 %v9926_v27  ;;  %v9952_v19 = vld [vmem:[%s11450_s26 + $0x2a0] sm:$0xff]   ;;  %v9956_v26 = vld [vmem:[%s11450_s26 + $0x2a8] sm:$0xff]   ;;  %v9957_v27 = vld [vmem:[%s11450_s26 + $0x270] sm:$0xff]  }
0x1295   : > { %v3302_v41 = vmax.f32 %v3165_v32, 0.0  ;;  %v9996_v32 = vld [vmem:[%s11450_s26 + $0x3b8] sm:$0xff]  }
0x1297   : > { %9079 = vmatpush3.bf16.msra.mxu1 %v9927_v30  ;;  %9101 = vmatpush3.bf16.msra.mxu0 %v9928_v50  ;;  %v2778_v30 = vrot.slane %v10816_v1, %v10779_v3  ;;  %v2786_v50 = vrot.slane %v10816_v1, %v10782_v4 }
0x1298   : > { %9080 = vmatprep.subr.bf16.mxu1 %v9929_v33  ;;  %9102 = vmatprep.subr.bf16.mxu0 %v9930_v34  ;;  %v9960_v33 = vld [vmem:[%s11450_s26 + $0x2b0] sm:$0xff]   ;;  %v9961_v34 = vld [vmem:[%s11450_s26 + $0x278] sm:$0xff]  }
0x129b   : > { %9081 = vmatpush3.bf16.msra.mxu1 %v9931_v38  ;;  %9103 = vmatpush3.bf16.msra.mxu0 %v9932_v39  ;;  %v3249_v38 = vadd.f32 %v10831_v14, %v2778_v30  ;;  %v3290_v39 = vadd.f32 %v10833_v15, %v2786_v50  ;;  %v9967_v14 = vld [vmem:[%s11450_s26 + $0x300] sm:$0xff]   ;;  %v9993_v30 = vld [vmem:[%s11450_s26 + $0x378] sm:$0xff]  }
0x129c   : > { %9110 = vmatprep.subr.bf16.mxu1 %v9933_v24  ;;  %9132 = vmatprep.subr.bf16.mxu0 %v9934_v25  ;;  %v9965_v24 = vld [vmem:[%s11450_s26 + $0x340] sm:$0xff]   ;;  %v3304_v25 = vmax.f32 %v3206_v36, 0.0  ;;  %v9994_v50 = vld [vmem:[%s11450_s26 + $0x3f8] sm:$0xff]  }
0x129d   : > { %v3307_v42 = vmax.f32 %v3249_v38, 0.0  ;;  %v3309_v43 = vmax.f32 %v3290_v39, 0.0  ;;  %v9968_v15 = vld [vmem:[%s11450_s26 + $0x380] sm:$0xff]  }
0x129e   : > { %4470 = vmatmul.mubr.bf16.vlgmr.msra.gmra.mrb[68].mxu1 %v3314_v45  ;;  %4510 = vmatmul.mubr.bf16.vlgmr.msra.gmra.mrb[72].mxu0 %v3316_v54  ;;  %v3320_v45 = vpack.c.bf16 %v3304_v25, %v3304_v25  ;;  %v9969_v54 = vld [vmem:[%s11450_s26 + $0x348] sm:$0xff]  }
0x129f   : > { %9111 = vmatpush3.bf16.msra.mxu1 %v9935_v44  ;;  %4549 = vmatprep.mubr.bf16.mxu1 %v3319_v56  ;;  %v3318_v44 = vpack.c.bf16 %v3302_v41, %v3302_v41  ;;  %v9970_v56 = vld [vmem:[%s11450_s26 + $0x3c8] sm:$0xff]  }
0x12a0   : > { %9133 = vmatpush3.bf16.msra.mxu0 %v9936_v55  ;;  %4589 = vmatprep.mubr.bf16.mxu0 %v3321_v59  ;;  %v3323_v55 = vpack.c.bf16 %v3307_v42, %v3307_v42  ;;  %v9972_v59 = vld [vmem:[%s11450_s26 + $0x388] sm:$0xff]  }
0x12a1   : > { %9112 = vmatprep.subr.bf16.mxu1 %v9937_v57  ;;  %9134 = vmatprep.subr.bf16.mxu0 %v9938_v58  ;;  %v3325_v57 = vpack.c.bf16 %v3309_v43, %v3309_v43  ;;  %v9971_v58 = vld [vmem:[%s11450_s26 + $0x308] sm:$0xff]  }
0x12a3   : > { %9113 = vmatpush3.bf16.msra.mxu1 %v9939_v61  ;;  %v9973_v61 = vld [vmem:[%s11450_s26 + $0x350] sm:$0xff]  }
0x12a4   : > { %9135 = vmatpush3.bf16.msra.mxu0 %v9940_v62  ;;  %9114 = vmatprep.subr.bf16.mxu1 %v9941_v63  ;;  %v9974_v62 = vld [vmem:[%s11450_s26 + $0x3d0] sm:$0xff]  }
0x12a5   : > { %9136 = vmatprep.subr.bf16.mxu0 %v9942_v0  ;;  %v9975_v63 = vld [vmem:[%s11450_s26 + $0x310] sm:$0xff]  }
0x12a6   : > { %v9976_v0 = vld [vmem:[%s11450_s26 + $0x390] sm:$0xff]  }
0x12a7   : > { %9115 = vmatpush3.bf16.msra.mxu1 %v9943_v12  ;;  %v9977_v12 = vld [vmem:[%s11450_s26 + $0x358] sm:$0xff]  }
0x12a8   : > { %9137 = vmatpush3.bf16.msra.mxu0 %v9944_v5  ;;  %9116 = vmatprep.subr.bf16.mxu1 %v9945_v6  ;;  %v9978_v5 = vld [vmem:[%s11450_s26 + $0x3d8] sm:$0xff]  }
0x12a9   : > { %9138 = vmatprep.subr.bf16.mxu0 %v9946_v8  ;;  %v9979_v6 = vld [vmem:[%s11450_s26 + $0x318] sm:$0xff]  }
0x12aa   : > { %v9980_v8 = vld [vmem:[%s11450_s26 + $0x398] sm:$0xff]  }
0x12ab   : > { %9117 = vmatpush3.bf16.msra.mxu1 %v9947_v9  ;;  %v9981_v9 = vld [vmem:[%s11450_s26 + $0x360] sm:$0xff]  }
0x12ac   : > { %9139 = vmatpush3.bf16.msra.mxu0 %v9948_v16  ;;  %9118 = vmatprep.subr.bf16.mxu1 %v9949_v17  ;;  %v9982_v16 = vld [vmem:[%s11450_s26 + $0x3e0] sm:$0xff]  }
0x12ad   : > { %9140 = vmatprep.subr.bf16.mxu0 %v9950_v47  ;;  %v9983_v17 = vld [vmem:[%s11450_s26 + $0x320] sm:$0xff]  }
0x12ae   : > { %v9984_v47 = vld [vmem:[%s11450_s26 + $0x3a0] sm:$0xff]  }
0x12af   : > { %9119 = vmatpush3.bf16.msra.mxu1 %v9951_v18  ;;  %v9985_v18 = vld [vmem:[%s11450_s26 + $0x368] sm:$0xff]  }
0x12b0   : > { %9141 = vmatpush3.bf16.msra.mxu0 %v9952_v19  ;;  %9120 = vmatprep.subr.bf16.mxu1 %v9953_v21  ;;  %v9986_v19 = vld [vmem:[%s11450_s26 + $0x3e8] sm:$0xff]  }
0x12b1   : > { %9142 = vmatprep.subr.bf16.mxu0 %v9954_v22  ;;  %v9987_v21 = vld [vmem:[%s11450_s26 + $0x328] sm:$0xff]   ;;  %v2774_v22 = vrot.slane %v10816_v1, %v10823_v7  ;;  %v9995_v1 = vld [vmem:[%s11450_s26 + $0x338] sm:$0xff]  }
0x12b3   : > { %9121 = vmatpush3.bf16.msra.mxu1 %v9955_v23  ;;  %v9988_v23 = vld [vmem:[%s11450_s26 + $0x3a8] sm:$0xff]   ;;  %v3247_v28 = vadd.f32 %v10827_v11, %v2774_v22 }
0x12b4   : > { %9143 = vmatpush3.bf16.msra.mxu0 %v9956_v26  ;;  %9122 = vmatprep.subr.bf16.mxu1 %v9957_v27  ;;  %v9990_v26 = vld [vmem:[%s11450_s26 + $0x3f0] sm:$0xff]  }
0x12b5   : > { %9144 = vmatprep.subr.bf16.mxu0 %v9958_v29  ;;  %v9991_v27 = vld [vmem:[%s11450_s26 + $0x330] sm:$0xff]  }
0x12b6   : > { %v9992_v29 = vld [vmem:[%s11450_s26 + $0x3b0] sm:$0xff]  }
0x12b7   : > { %9123 = vmatpush3.bf16.msra.mxu1 %v9959_v31  ;;  %v3306_v31 = vmax.f32 %v3247_v28, 0.0 }
0x12b8   : > { %9145 = vmatpush3.bf16.msra.mxu0 %v9960_v33  ;;  %9124 = vmatprep.subr.bf16.mxu1 %v9961_v34  ;;  %v3308_v33 = vmax.f32 %v10829_v13, 0.0  ;;  %v8540_v13 = vld [vmem:[%s11452_s1] ss:$0 sm:$0xff]  ;;  %s11462_s1 = sld [smem:[#allocation15_spill]] }
0x12b9   : > { %9146 = vmatprep.subr.bf16.mxu0 %v9962_v37  ;;  %v3322_v34 = vpack.c.bf16 %v3306_v31, %v3306_v31 }
0x12ba   : > { %v3324_v11 = vpack.c.bf16 %v3308_v33, %v3308_v33 }
0x12bb   : > { %9125 = vmatpush3.bf16.msra.mxu1 %v9963_v40 }
0x12bc   : > { %9147 = vmatpush3.bf16.msra.mxu0 %v9964_v46  ;;  %9154 = vmatprep.subr.bf16.mxu1 %v9965_v24 }
0x12bd   : > { %9176 = vmatprep.subr.bf16.mxu0 %v9966_v53 }
0x12be   : > { %4550 = vmatmul.mubr.bf16.vlgmr.msra.gmra.mrb[72].mxu1 %v3318_v44 }
0x12bf   : > { %4590 = vmatmul.mubr.bf16.vlgmr.msra.gmra.mrb[76].mxu0 %v3320_v45  ;;  %9155 = vmatpush3.bf16.msra.mxu1 %v9967_v14 }
0x12c0   : > { %4629 = vmatprep.mubr.bf16.mxu1 %v3323_v55  ;;  %9177 = vmatpush3.bf16.msra.mxu0 %v9968_v15 }
0x12c1   : > { %4669 = vmatprep.mubr.bf16.mxu0 %v3325_v57  ;;  %9156 = vmatprep.subr.bf16.mxu1 %v9969_v54 }
0x12c2   : > { %9178 = vmatprep.subr.bf16.mxu0 %v9970_v56 }
0x12c3   : > { %9157 = vmatpush3.bf16.msra.mxu1 %v9971_v58 }
0x12c4   : > { %9179 = vmatpush3.bf16.msra.mxu0 %v9972_v59  ;;  %9158 = vmatprep.subr.bf16.mxu1 %v9973_v61 }
0x12c5   : > { %9180 = vmatprep.subr.bf16.mxu0 %v9974_v62 }
0x12c7   : > { %9159 = vmatpush3.bf16.msra.mxu1 %v9975_v63 }
0x12c8   : > { %9181 = vmatpush3.bf16.msra.mxu0 %v9976_v0  ;;  %9160 = vmatprep.subr.bf16.mxu1 %v9977_v12 }
0x12c9   : > { %9182 = vmatprep.subr.bf16.mxu0 %v9978_v5 }
0x12cb   : > { %9161 = vmatpush3.bf16.msra.mxu1 %v9979_v6 }
0x12cc   : > { %9183 = vmatpush3.bf16.msra.mxu0 %v9980_v8  ;;  %9162 = vmatprep.subr.bf16.mxu1 %v9981_v9 }
0x12cd   : > { %9184 = vmatprep.subr.bf16.mxu0 %v9982_v16 }
0x12cf   : > { %9163 = vmatpush3.bf16.msra.mxu1 %v9983_v17 }
0x12d0   : > { %9185 = vmatpush3.bf16.msra.mxu0 %v9984_v47  ;;  %9164 = vmatprep.subr.bf16.mxu1 %v9985_v18 }
0x12d1   : > { %9186 = vmatprep.subr.bf16.mxu0 %v9986_v19 }
0x12d3   : > { %9165 = vmatpush3.bf16.msra.mxu1 %v9987_v21 }
0x12d4   : > { %9187 = vmatpush3.bf16.msra.mxu0 %v9988_v23  ;;  %9166 = vmatprep.subr.bf16.mxu1 %v9989_v10 }
0x12d5   : > { %9188 = vmatprep.subr.bf16.mxu0 %v9990_v26 }
0x12d7   : > { %9167 = vmatpush3.bf16.msra.mxu1 %v9991_v27 }
0x12d8   : > { %9189 = vmatpush3.bf16.msra.mxu0 %v9992_v29  ;;  %9168 = vmatprep.subr.bf16.mxu1 %v9993_v30 }
0x12d9   : > { %9190 = vmatprep.subr.bf16.mxu0 %v9994_v50 }
0x12db   : > { %9169 = vmatpush3.bf16.msra.mxu1 %v9995_v1 }
0x12dc   : > { %9191 = vmatpush3.bf16.msra.mxu0 %v9996_v32  ;;  %9613 = vmatprep.subr.bf16.mxu1 %v10239_v2 }
0x12dd   : > { %9621 = vmatprep.subr.bf16.mxu0 %v10239_v2 }
0x12de   : > { %4630 = vmatmul.mubr.bf16.vlgmr.msra.gmra.mrb[76].mxu1 %v3322_v34 }
0x12df   : > { %4670 = vmatmul.mubr.bf16.vlgmr.msra.gmra.mrb[80].mxu0 %v3324_v11  ;;  %9617 = vmatprep.mubr.msk.bf16.mxu1 %vm10240_vm1, %v10239_v2 }
0x12e0   : > { %9625 = vmatprep.mubr.msk.bf16.mxu0 %vm10240_vm1, %v10239_v2 }
0x1351   : > { %v9038_v36 = vpop.f32.mrb[64].mxu1  ;;  %v9060_v37 = vpop.f32.mrb[68].mxu0 }
0x1352   : > { %v9039_v38 = vpop.f32.mrb[65].mxu1  ;;  %v9061_v39 = vpop.f32.mrb[69].mxu0 }
0x1353   : > { %v9040_v40 = vadd.f32 %v9039_v38, %v9038_v36  ;;  %v9062_v41 = vadd.f32 %v9061_v39, %v9060_v37  ;;  %v9041_v46 = vpop.f32.mrb[66].mxu1  ;;  %v9063_v24 = vpop.f32.mrb[70].mxu0  ;;  %v9997_v38 = vld [vmem:[%s11453_s2] sm:$0xff]  }
0x1354   : > { %v9042_v25 = vpop.f32.mrb[67].mxu1  ;;  %v9064_v53 = vpop.f32.mrb[71].mxu0  ;;  %v9998_v39 = vld [vmem:[%s11454_s7] sm:$0xff]   ;;  %9614 = vmatpush3.bf16.msra.mxu1 %v9997_v38 }
0x1355   : > { %v4392_v42 = vadd.f32 %v9040_v40, %v8540_v13  ;;  %9622 = vmatpush3.bf16.msra.mxu0 %v9998_v39  ;;  %9615 = vmatprep.subr.bf16.mxu1 %v10239_v2  ;;  %v10000_v40 = vld [vmem:[%s11454_s7 + $0x8] sm:$0xff]   ;;  %v8669_v53 = vld [vmem:[%s11455_s10] ss:$0 sm:$0xff]  ;;  %s11463_s10 = sld [smem:[#allocation16_spill]] }
0x1356   : > { %9623 = vmatprep.subr.bf16.mxu0 %v10239_v2 }
0x1357   : > { %v4432_v43 = vadd.f32 %v9062_v41, %v4392_v42 }
0x1359   : > { %9624 = vmatpush3.bf16.msra.mxu0 %v10000_v40 }
0x135a   : > { %9637 = vmatprep.subr.bf16.mxu0 %v10239_v2 }
0x1371   : > { %v9082_v14 = vpop.f32.mrb[68].mxu1  ;;  %v9104_v44 = vpop.f32.mrb[72].mxu0 }
0x1372   : > { %v9083_v15 = vpop.f32.mrb[69].mxu1  ;;  %v9105_v45 = vpop.f32.mrb[73].mxu0 }
0x1373   : > { %v9084_v54 = vadd.f32 %v9083_v15, %v9082_v14  ;;  %v9106_v55 = vadd.f32 %v9105_v45, %v9104_v44  ;;  %v9085_v56 = vpop.f32.mrb[70].mxu1  ;;  %v9107_v57 = vpop.f32.mrb[74].mxu0  ;;  %v10001_v15 = vld [vmem:[%s11457_s16] sm:$0xff]  }
0x1374   : > { %v9086_v58 = vpop.f32.mrb[71].mxu1  ;;  %v9108_v59 = vpop.f32.mrb[75].mxu0 }
0x1375   : > { %v4472_v61 = vadd.f32 %v9084_v54, %v4432_v43  ;;  %v8670_v43 = vld [vmem:[%s11456_s11] ss:$0 sm:$0xff]  ;;  %v10002_v54 = vld [vmem:[%s11457_s16 + $0x8] sm:$0xff]   ;;  %s11464_s11 = sld [smem:[#allocation20_spill]] }
0x1377   : > { %v4512_v62 = vadd.f32 %v9106_v55, %v4472_v61  ;;  %v8675_v55 = vld [vmem:[%s11458_s15] ss:$0 sm:$0xff] }
0x1391   : > { %v9126_v63 = vpop.f32.mrb[72].mxu1 }
0x1392   : > { %v9148_v0 = vpop.f32.mrb[76].mxu0  ;;  %v9127_v12 = vpop.f32.mrb[73].mxu1 }
0x1393   : > { %v9128_v5 = vadd.f32 %v9127_v12, %v9126_v63  ;;  %v9149_v6 = vpop.f32.mrb[77].mxu0  ;;  %v9129_v8 = vpop.f32.mrb[74].mxu1 }
0x1394   : > { %v9150_v9 = vadd.f32 %v9149_v6, %v9148_v0  ;;  %v9151_v16 = vpop.f32.mrb[78].mxu0  ;;  %v9130_v17 = vpop.f32.mrb[75].mxu1  ;;  %v8671_v6 = vld [vmem:[%s11459_s18] ss:$0 sm:$0xff] }
0x1395   : > { %v4552_v47 = vadd.f32 %v9128_v5, %v4512_v62  ;;  %v9152_v18 = vpop.f32.mrb[79].mxu0 }
0x1397   : > { %v4592_v19 = vadd.f32 %v9150_v9, %v4552_v47  ;;  %v8679_v9 = vld [vmem:[%s11460_s0] ss:$0 sm:$0xff] }
0x13b1   : > { %v9170_v21 = vpop.f32.mrb[76].mxu1 }
0x13b2   : > { %v9192_v22 = vpop.f32.mrb[80].mxu0  ;;  %v9171_v23 = vpop.f32.mrb[77].mxu1 }
0x13b3   : > { %v9172_v10 = vadd.f32 %v9171_v23, %v9170_v21  ;;  %v9193_v26 = vpop.f32.mrb[81].mxu0  ;;  %v9173_v27 = vpop.f32.mrb[78].mxu1  ;;  %v10003_v21 = vld [vmem:[%s11453_s2 + $0x10] sm:$0xff]  }
0x13b4   : > { %v9194_v28 = vadd.f32 %v9193_v26, %v9192_v22  ;;  %v9195_v29 = vpop.f32.mrb[82].mxu0  ;;  %v9174_v30 = vpop.f32.mrb[79].mxu1  ;;  %v10004_v27 = vld [vmem:[%s11453_s2 + $0x18] sm:$0xff]  }
0x13b5   : > { %v4632_v50 = vadd.f32 %v9172_v10, %v4592_v19  ;;  %v9196_v1 = vpop.f32.mrb[83].mxu0  ;;  %v10006_v29 = vld [vmem:[%s11457_s16 + $0x18] sm:$0xff]  }
0x13b7   : > { %v4672_v31 = vadd.f32 %v9194_v28, %v4632_v50  ;;  %v10005_v28 = vld [vmem:[%s11457_s16 + $0x10] sm:$0xff]  }
0x13b9   : > { %v4677_v32 = vadd.f32 %v4672_v31, %v10675_v35  ;;  %v9999_v35 = vld [vmem:[%s11453_s2 + $0x8] sm:$0xff]  }
0x13ba   : > { %9616 = vmatpush3.bf16.msra.mxu1 %v9999_v35 }
0x13bb   : > { %v4680_v33 = vsel %vm1261_vm3, %v4677_v32, 0.0  ;;  %9629 = vmatprep.subr.bf16.mxu1 %v10239_v2 }
0x13bc   : > { %4681 = vadd.xlane.f32.xlu0 %v4680_v33 }
0x1449   : > { %v4682_v34 = vpop.xlane.xlu0 %4681 }
0x144a   : > { %v4683_v11 = vmul.f32 0.03125, %v4682_v34 }
0x144c   : > { %v4684_v36 = vsub.f32 %v4677_v32, %v4683_v11 }
0x144e   : > { %v4685_v37 = vmul.f32 %v4684_v36, %v4684_v36 }
0x1450   : > { %v4686_v13 = vsel %vm1261_vm3, %v4685_v37, 0.0 }
0x1451   : > { %4687 = vadd.xlane.f32.xlu1 %v4686_v13  ;;  %v8708_v13 = vld [vmem:[%s11460_s0 + $0x1] ss:$0 sm:$0xff] }
0x14de   : > { %v4688_v41 = vpop.xlane.xlu1 %4687 }
0x14df   : > { %v4689_v46 = vmul.f32 0.03125, %v4688_v41 }
0x14e1   : > { %v4690_v24 = vadd.f32 1e-05, %v4689_v46 }
0x14e3   : > { %10170 = vrsqrt.f32 %v4690_v24 }
0x14ed   : > { %v10171_v25 = vpop.eup %10170 }
0x14ee   : > { %v4692_v42 = vmul.f32 %v10171_v25, %v4684_v36 }
0x14f0   : > { %v4699_v14 = vmul.f32 %v8669_v53, %v4692_v42 }
0x14f2   : > { %v10955_v44 = vadd.f32 %v8670_v43, %v4699_v14 }
0x14f4   : > { %v10960_v45 = vpack.c.bf16 %v10955_v44, %v10955_v44 }
0x14f6   : > { %9618 = vmatmul.mubr.msk.bf16.vlgmr.msra.gmra.mrb[80].mxu1 %vm1261_vm3, %v10960_v45  ;;  %9626 = vmatmul.mubr.msk.bf16.vlgmr.msra.gmra.mrb[84].mxu0 %vm1261_vm3, %v10960_v45 }
0x14f7   : > { %9630 = vmatpush3.bf16.msra.mxu1 %v10001_v15  ;;  %9633 = vmatprep.mubr.msk.bf16.mxu1 %vm10240_vm1, %v10239_v2 }
0x14f8   : > { %9631 = vmatprep.subr.bf16.mxu1 %v10239_v2  ;;  %9639 = vmatprep.mubr.msk.bf16.mxu0 %vm10240_vm1, %v10239_v2 }
0x14fb   : > { %9632 = vmatpush3.bf16.msra.mxu1 %v10002_v54 }
0x14fc   : > { %9643 = vmatprep.subr.bf16.mxu1 %v10239_v2 }
0x14fe   : > { %9634 = vmatmul.mubr.msk.bf16.vlgmr.msra.gmra.mrb[84].mxu1 %vm1261_vm3, %v10960_v45 }
0x14ff   : > { %9645 = vmatprep.mubr.msk.bf16.mxu1 %vm10240_vm1, %v10239_v2 }
0x15c9   : > { %v4768_v56 = vpop.f32.mrb[80].mxu1  ;;  %v4831_v57 = vpop.f32.mrb[84].mxu0 }
0x15ca   : > { %v4832_v58 = vadd.f32 %v8675_v55, %v4831_v57  ;;  %v9619_v59 = vpop.f32.mrb[81].mxu1  ;;  %v9627_v61 = vpop.f32.mrb[85].mxu0  ;;  %v4769_v16 = vadd.f32 %v8671_v6, %v4768_v56  ;;  %v10007_v56 = vld [vmem:[%s11454_s7 + $0x10] sm:$0xff]  }
0x15cb   : > { %v4771_v62 = vpop.f32.mrb[82].mxu1  ;;  %v4834_v63 = vpop.f32.mrb[86].mxu0 }
0x15cc   : > { %v4901_v0 = vpack.c.bf16 %v4832_v58, %v4832_v58  ;;  %v9620_v12 = vpop.f32.mrb[83].mxu1  ;;  %v9628_v5 = vpop.f32.mrb[87].mxu0  ;;  %v4900_v22 = vpack.c.bf16 %v4769_v16, %v4769_v16  ;;  %v10008_v58 = vld [vmem:[%s11454_s7 + $0x18] sm:$0xff]  }
0x15ce   : > { %v4907_v8 = vsel %vm1434_vm4, %v4901_v0, 0  ;;  %v8699_v0 = vld [vmem:[%s11458_s15 + $0x1] ss:$0 sm:$0xff] }
0x15cf   : > { %9638 = vmatpush3.bf16.xpose.msra.mxu0 %v4907_v8 }
0x15d0   : > { %9649 = vmatprep.subr.bf16.mxu0 %v10239_v2 }
0x15d1   : > { %v4894_v17 = vpop.f32.mrb[84].mxu1 }
0x15d2   : > { %v4895_v47 = vadd.f32 %v8679_v9, %v4894_v17  ;;  %v9635_v18 = vpop.f32.mrb[85].mxu1  ;;  %v8690_v17 = vld [vmem:[%s11459_s18 + $0x1] ss:$0 sm:$0xff] }
0x15d3   : > { %v4897_v19 = vpop.f32.mrb[86].mxu1 }
0x15d4   : > { %v4902_v23 = vpack.c.bf16 %v4895_v47, %v4895_v47  ;;  %v9636_v10 = vpop.f32.mrb[87].mxu1 }
0x15d6   : > { %v4966_v26 = vsel %vm1497_vm5, %v4902_v23, 0  ;;  %9640 = vmatmul.mubr.msk.bf16.vlgmr.msra.gmra.mrb[88].mxu0 %vm1434_vm4, %v4900_v22 }
0x15d7   : > { %9644 = vmatpush3.bf16.msra.mxu1 %v4966_v26  ;;  %9650 = vmatpush3.bf16.msra.mxu0 %v10003_v21 }
0x15d8   : > { %9651 = vmatprep.subr.bf16.mxu0 %v10239_v2  ;;  %9653 = vmatprep.mubr.msk.bf16.mxu0 %vm10240_vm1, %v10239_v2 }
0x15d9   : > { %9657 = vmatprep.subr.bf16.mxu1 %v10239_v2 }
0x15db   : > { %9652 = vmatpush3.bf16.msra.mxu0 %v10004_v27 }
0x15dc   : > { %9665 = vmatprep.subr.bf16.mxu0 %v10239_v2 }
0x15de   : > { %9654 = vmatmul.mubr.msk.bf16.vlgmr.msra.gmra.mrb[92].mxu0 %vm1261_vm3, %v10960_v45 }
0x15df   : > { %9666 = vmatpush3.bf16.msra.mxu0 %v10005_v28  ;;  %9669 = vmatprep.mubr.msk.bf16.mxu0 %vm10240_vm1, %v10239_v2 }
0x15e0   : > { %9667 = vmatprep.subr.bf16.mxu0 %v10239_v2 }
0x15e3   : > { %9668 = vmatpush3.bf16.msra.mxu0 %v10006_v29 }
0x15e4   : > { %9679 = vmatprep.subr.bf16.mxu0 %v10239_v2 }
0x15e6   : > { %9670 = vmatmul.mubr.msk.bf16.vlgmr.msra.gmra.mrb[96].mxu0 %vm1261_vm3, %v10960_v45 }
0x15e7   : > { %9681 = vmatprep.mubr.msk.bf16.mxu0 %vm10240_vm1, %v10239_v2 }
0x16a9   : > { %v4943_v30 = vpop.f32.mrb[88].mxu0 }
0x16aa   : > { %v4949_v50 = vmul.f32 0.35355338, %v4943_v30  ;;  %v9641_v1 = vpop.f32.mrb[89].mxu0 }
0x16ab   : > { %v4946_v31 = vpop.f32.mrb[90].mxu0 }
0x16ac   : > { %v9642_v32 = vpop.f32.mrb[91].mxu0  ;;  %v4950_v33 = vsel %vm1434_vm4, %v4949_v50, -inf  ;;  %v8714_v31 = vld [vmem:[%s11461_s12 + $0x4] sm:$0xf] }
0x16ad   : > { %4951 = vmax.xlane.f32.xlu0 %v4950_v33  ;;  %v5320_v32 = vsel %vm1497_vm5, %v8714_v31, 0 }
0x16b1   : > { %v5069_v34 = vpop.f32.mrb[92].mxu0 }
0x16b2   : > { %v9655_v11 = vpop.f32.mrb[93].mxu0  ;;  %v5070_v18 = vadd.f32 %v8690_v17, %v5069_v34  ;;  %v8722_v17 = vld [vmem:[%s11459_s18 + $0x2] ss:$0 sm:$0xff] }
0x16b3   : > { %v5072_v36 = vpop.f32.mrb[94].mxu0  ;;  %v5009_v11 = vld [vmem:[%s11461_s12] sm:$0xf] }
0x16b4   : > { %v9656_v37 = vpop.f32.mrb[95].mxu0  ;;  %v5205_v19 = vpack.c.bf16 %v5070_v18, %v5070_v18 }
0x16b9   : > { %v5199_v38 = vpop.f32.mrb[96].mxu0 }
0x16ba   : > { %v5200_v39 = vadd.f32 %v8708_v13, %v5199_v38  ;;  %v9671_v35 = vpop.f32.mrb[97].mxu0  ;;  %v5366_v13 = vsel %vm1497_vm5, %v5009_v11, 0  ;;  %v10009_v38 = vld [vmem:[%s11454_s7 + $0x20] sm:$0xff]  }
0x16bb   : > { %v5202_v40 = vpop.f32.mrb[98].mxu0  ;;  %v10010_v35 = vld [vmem:[%s11454_s7 + $0x28] sm:$0xff]  }
0x16bc   : > { %v5207_v41 = vpack.c.bf16 %v5200_v39, %v5200_v39  ;;  %v9672_v46 = vpop.f32.mrb[99].mxu0 }
0x16be   : > { %v5271_v24 = vsel %vm1497_vm5, %v5207_v41, 0  ;;  %v10011_v41 = vld [vmem:[%s11453_s2 + $0x20] sm:$0xff]  }
0x16bf   : > { %9680 = vmatpush3.bf16.msra.mxu0 %v5271_v24 }
0x16c0   : > { %9691 = vmatprep.subr.bf16.mxu0 %v10239_v2 }
0x173a   : > { %v4952_v25 = vpop.xlane.xlu0 %4951 }
0x173b   : > { %v4953_v53 = vsub.f32 %v4949_v50, %v4952_v25 }
0x173d   : > { %v4954_v42 = vmul.f32 1.442695, %v4953_v53 }
0x173f   : > { %10172 = vpow2.f32 %v4954_v42  ;;  %v10012_v42 = vld [vmem:[%s11453_s2 + $0x28] sm:$0xff]  }
0x1749   : > { %v10173_v43 = vpop.eup %10172 }
0x174a   : > { %v4956_v14 = vsel %vm1434_vm4, %v10173_v43, 0.0 }
0x174b   : > { %4957 = vadd.xlane.f32.xlu1 %v4956_v14  ;;  %v10013_v14 = vld [vmem:[%s11457_s16 + $0x20] sm:$0xff]  }
0x17d8   : > { %v4958_v15 = vpop.xlane.xlu1 %4957 }
0x17d9   : > { %10174 = vrcp.f32 %v4958_v15 }
0x17e3   : > { %v10175_v54 = vpop.eup %10174 }
0x17e4   : > { %v4960_v55 = vmul.f32 %v10175_v54, %v10173_v43 }
0x17e6   : > { %v4961_v57 = vpack.c.bf16 %v4960_v55, %v4960_v55 }
0x17e8   : > { %9646 = vmatmul.mubr.msk.bf16.vlgmr.msra.gmra.mrb[88].mxu1 %vm1434_vm4, %v4961_v57  ;;  %v8731_v57 = vld [vmem:[%s11458_s15 + $0x2] ss:$0 sm:$0xff] }
0x17e9   : > { %9658 = vmatpush3.bf16.msra.mxu1 %v10007_v56  ;;  %9661 = vmatprep.mubr.msk.bf16.mxu1 %vm10240_vm1, %v10239_v2  ;;  %v10014_v56 = vld [vmem:[%s11457_s16 + $0x28] sm:$0xff]  }
0x17ea   : > { %9659 = vmatprep.subr.bf16.mxu1 %v10239_v2 }
0x17ed   : > { %9660 = vmatpush3.bf16.msra.mxu1 %v10008_v58 }
0x17ee   : > { %9673 = vmatprep.subr.bf16.mxu1 %v10239_v2 }
0x17f0   : > { %9662 = vmatmul.mubr.msk.bf16.vlgmr.msra.gmra.mrb[92].mxu1 %vm1261_vm3, %v10960_v45 }
0x17f1   : > { %9675 = vmatprep.mubr.msk.bf16.mxu1 %vm10240_vm1, %v10239_v2 }
0x18bb   : > { %v5002_v59 = vpop.f32.mrb[88].mxu1 }
0x18bc   : > { %v9647_v61 = vpop.f32.mrb[89].mxu1  ;;  %v5008_v39 = vpack.c.bf16 %v5002_v59, %v5002_v59 }
0x18bd   : > { %v5005_v62 = vpop.f32.mrb[90].mxu1 }
0x18be   : > { %v9648_v63 = vpop.f32.mrb[91].mxu1 }
0x18c3   : > { %v5134_v12 = vpop.f32.mrb[92].mxu1 }
0x18c4   : > { %v5135_v5 = vadd.f32 %v8699_v0, %v5134_v12  ;;  %v9663_v6 = vpop.f32.mrb[93].mxu1 }
0x18c5   : > { %v5137_v8 = vpop.f32.mrb[94].mxu1 }
0x18c6   : > { %v5206_v9 = vpack.c.bf16 %v5135_v5, %v5135_v5  ;;  %v9664_v16 = vpop.f32.mrb[95].mxu1 }
0x18c8   : > { %v5212_v47 = vsel %vm1434_vm4, %v5206_v9, 0 }
0x18c9   : > { %9674 = vmatpush3.bf16.xpose.msra.mxu1 %v5212_v47 }
0x18ca   : > { %9685 = vmatprep.subr.bf16.mxu1 %v10239_v2 }
0x18d0   : > { %9676 = vmatmul.mubr.msk.bf16.vlgmr.msra.gmra.mrb[96].mxu1 %vm1434_vm4, %v5205_v19 }
0x18d1   : > { %9687 = vmatprep.mubr.msk.bf16.mxu1 %vm10240_vm1, %v10239_v2  ;;  %9686 = vmatpush3.bf16.msra.mxu1 %v5320_v32 }
0x18d2   : > { %9697 = vmatprep.subr.bf16.mxu1 %v10239_v2 }
0x19a3   : > { %v5248_v21 = vpop.f32.mrb[96].mxu1 }
0x19a4   : > { %v5254_v22 = vmul.f32 0.35355338, %v5248_v21  ;;  %v9677_v23 = vpop.f32.mrb[97].mxu1 }
0x19a5   : > { %v5251_v10 = vpop.f32.mrb[98].mxu1 }
0x19a6   : > { %v9678_v26 = vpop.f32.mrb[99].mxu1  ;;  %v5255_v27 = vsel %vm1434_vm4, %v5254_v22, -inf  ;;  %v8740_v10 = vld [vmem:[%s11460_s0 + $0x2] ss:$0 sm:$0xff] }
0x19a7   : > { %5256 = vmax.xlane.f32.xlu0 %v5255_v27 }
0x1a34   : > { %v5257_v28 = vpop.xlane.xlu0 %5256 }
0x1a35   : > { %v5258_v29 = vsub.f32 %v5254_v22, %v5257_v28 }
0x1a37   : > { %v5259_v30 = vmul.f32 1.442695, %v5258_v29 }
0x1a39   : > { %10176 = vpow2.f32 %v5259_v30 }
0x1a43   : > { %v10177_v50 = vpop.eup %10176 }
0x1a44   : > { %v5261_v1 = vsel %vm1434_vm4, %v10177_v50, 0.0 }
0x1a45   : > { %5262 = vadd.xlane.f32.xlu1 %v5261_v1 }
0x1ad2   : > { %v5263_v33 = vpop.xlane.xlu1 %5262 }
0x1ad3   : > { %10178 = vrcp.f32 %v5263_v33 }
0x1add   : > { %v10179_v34 = vpop.eup %10178 }
0x1ade   : > { %v5265_v36 = vmul.f32 %v10179_v34, %v10177_v50 }
0x1ae0   : > { %v5266_v37 = vpack.c.bf16 %v5265_v36, %v5265_v36 }
0x1ae2   : > { %9682 = vmatmul.mubr.msk.bf16.vlgmr.msra.gmra.mrb[100].mxu0 %vm1434_vm4, %v5266_v37 }
0x1ae3   : > { %9692 = vmatpush3.bf16.msra.mxu0 %v5366_v13  ;;  %9693 = vmatprep.mubr.msk.bf16.mxu0 %vm10240_vm1, %v10239_v2 }
0x1ae4   : > { %9705 = vmatprep.subr.bf16.mxu0 %v10239_v2 }
0x1aea   : > { %9694 = vmatmul.mubr.msk.bf16.vlgmr.msra.gmra.mrb[104].mxu0 %vm1434_vm4, %v5008_v39 }
0x1aeb   : > { %9706 = vmatpush3.bf16.msra.mxu0 %v10009_v38  ;;  %9709 = vmatprep.mubr.msk.bf16.mxu0 %vm10240_vm1, %v10239_v2 }
0x1aec   : > { %9707 = vmatprep.subr.bf16.mxu0 %v10239_v2 }
0x1aef   : > { %9708 = vmatpush3.bf16.msra.mxu0 %v10010_v35 }
0x1af0   : > { %9721 = vmatprep.subr.bf16.mxu0 %v10239_v2 }
0x1af2   : > { %9710 = vmatmul.mubr.msk.bf16.vlgmr.msra.gmra.mrb[108].mxu0 %vm1261_vm3, %v10960_v45 }
0x1af3   : > { %9723 = vmatprep.mubr.msk.bf16.mxu0 %vm10240_vm1, %v10239_v2 }
0x1bb5   : > { %v5307_v40 = vpop.f32.mrb[100].mxu0 }
0x1bb6   : > { %v5313_v46 = vpack.c.bf16 %v5307_v40, %v5307_v40  ;;  %v9683_v24 = vpop.f32.mrb[101].mxu0  ;;  %v8746_v40 = vld [vmem:[%s11461_s12 + $0x8] sm:$0xf] }
0x1bb7   : > { %v5310_v25 = vpop.f32.mrb[102].mxu0 }
0x1bb8   : > { %v9684_v53 = vpop.f32.mrb[103].mxu0  ;;  %9688 = vmatmul.mubr.msk.bf16.vlgmr.msra.gmra.mrb[100].mxu1 %vm1434_vm4, %v5313_v46 }
0x1bb9   : > { %9698 = vmatpush3.bf16.msra.mxu1 %v10011_v41  ;;  %9701 = vmatprep.mubr.msk.bf16.mxu1 %vm10240_vm1, %v10239_v2  ;;  %v5718_v41 = vsel %vm1497_vm5, %v8746_v40, 0  ;;  %v10015_v53 = vld [vmem:[%s11453_s2 + $0x30] sm:$0xff]  }
0x1bba   : > { %9699 = vmatprep.subr.bf16.mxu1 %v10239_v2 }
0x1bbd   : > { %v5402_v43 = vpop.f32.mrb[104].mxu0  ;;  %9700 = vmatpush3.bf16.msra.mxu1 %v10012_v42 }
0x1bbe   : > { %v9695_v15 = vpop.f32.mrb[105].mxu0  ;;  %9713 = vmatprep.subr.bf16.mxu1 %v10239_v2 }
0x1bbf   : > { %v5405_v54 = vpop.f32.mrb[106].mxu0  ;;  %v10018_v15 = vld [vmem:[%s11457_s16 + $0x38] sm:$0xff]  }
0x1bc0   : > { %v9696_v55 = vpop.f32.mrb[107].mxu0  ;;  %9702 = vmatmul.mubr.msk.bf16.vlgmr.msra.gmra.mrb[104].mxu1 %vm1261_vm3, %v10960_v45 }
0x1bc1   : > { %9714 = vmatpush3.bf16.msra.mxu1 %v10013_v14  ;;  %9717 = vmatprep.mubr.msk.bf16.mxu1 %vm10240_vm1, %v10239_v2  ;;  %v10017_v14 = vld [vmem:[%s11457_s16 + $0x30] sm:$0xff]  }
0x1bc2   : > { %9715 = vmatprep.subr.bf16.mxu1 %v10239_v2  ;;  %v10019_v55 = vld [vmem:[%s11454_s7 + $0x30] sm:$0xff]  }
0x1bc5   : > { %v5532_v58 = vpop.f32.mrb[108].mxu0  ;;  %9716 = vmatpush3.bf16.msra.mxu1 %v10014_v56 }
0x1bc6   : > { %v5533_v59 = vadd.f32 %v8731_v57, %v5532_v58  ;;  %v9711_v61 = vpop.f32.mrb[109].mxu0  ;;  %9727 = vmatprep.subr.bf16.mxu1 %v10239_v2 }
0x1bc7   : > { %v5535_v62 = vpop.f32.mrb[110].mxu0  ;;  %v10020_v61 = vld [vmem:[%s11454_s7 + $0x38] sm:$0xff]  }
0x1bc8   : > { %v5604_v63 = vpack.c.bf16 %v5533_v59, %v5533_v59  ;;  %v9712_v0 = vpop.f32.mrb[111].mxu0  ;;  %9718 = vmatmul.mubr.msk.bf16.vlgmr.msra.gmra.mrb[108].mxu1 %vm1261_vm3, %v10960_v45 }
0x1bc9   : > { %9729 = vmatprep.mubr.msk.bf16.mxu1 %vm10240_vm1, %v10239_v2 }
0x1bca   : > { %v5610_v12 = vsel %vm1434_vm4, %v5604_v63, 0 }
0x1bcb   : > { %9722 = vmatpush3.bf16.xpose.msra.mxu0 %v5610_v12 }
0x1bcc   : > { %9733 = vmatprep.subr.bf16.mxu0 %v10239_v2 }
0x1c8b   : > { %v5356_v5 = vpop.f32.mrb[100].mxu1 }
0x1c8c   : > { %v11070_v6 = vadd.f32 %v5402_v43, %v5356_v5  ;;  %v9689_v8 = vpop.f32.mrb[101].mxu1  ;;  %v10016_v43 = vld [vmem:[%s11453_s2 + $0x38] sm:$0xff]   ;;  %v8771_v5 = vld [vmem:[%s11460_s0 + $0x3] ss:$0 sm:$0xff]  ;;  %s11468_s0 = sld [smem:[#allocation19_spill]]  ;;  %s11471_s2 = sld [smem:[#allocation23_spill]] }
0x1c8d   : > { %v5359_v9 = vpop.f32.mrb[102].mxu1 }
0x1c8e   : > { %v9690_v16 = vpop.f32.mrb[103].mxu1 }
0x1c93   : > { %v5467_v47 = vpop.f32.mrb[104].mxu1 }
0x1c94   : > { %v5468_v18 = vadd.f32 %v8722_v17, %v5467_v47  ;;  %v9703_v19 = vpop.f32.mrb[105].mxu1 }
0x1c95   : > { %v5470_v21 = vpop.f32.mrb[106].mxu1 }
0x1c96   : > { %v5603_v22 = vpack.c.bf16 %v5468_v18, %v5468_v18  ;;  %v9704_v23 = vpop.f32.mrb[107].mxu1 }
0x1c98   : > { %9724 = vmatmul.mubr.msk.bf16.vlgmr.msra.gmra.mrb[112].mxu0 %vm1434_vm4, %v5603_v22 }
0x1c99   : > { %9735 = vmatprep.mubr.msk.bf16.mxu0 %vm10240_vm1, %v10239_v2  ;;  %9734 = vmatpush3.bf16.msra.mxu0 %v5718_v41 }
0x1c9a   : > { %9747 = vmatprep.subr.bf16.mxu0 %v10239_v2 }
0x1c9b   : > { %v5597_v26 = vpop.f32.mrb[108].mxu1 }
0x1c9c   : > { %v5598_v27 = vadd.f32 %v8740_v10, %v5597_v26  ;;  %v9719_v28 = vpop.f32.mrb[109].mxu1  ;;  %v8762_v26 = vld [vmem:[%s11458_s15 + $0x3] ss:$0 sm:$0xff] }
0x1c9d   : > { %v5600_v29 = vpop.f32.mrb[110].mxu1 }
0x1c9e   : > { %v5605_v30 = vpack.c.bf16 %v5598_v27, %v5598_v27  ;;  %v9720_v50 = vpop.f32.mrb[111].mxu1 }
0x1ca0   : > { %v5669_v1 = vsel %vm1497_vm5, %v5605_v30, 0 }
0x1ca1   : > { %9728 = vmatpush3.bf16.msra.mxu1 %v5669_v1 }
0x1ca2   : > { %9739 = vmatprep.subr.bf16.mxu1 %v10239_v2 }
0x1d6b   : > { %v5646_v31 = vpop.f32.mrb[112].mxu0 }
0x1d6c   : > { %v5652_v32 = vmul.f32 0.35355338, %v5646_v31  ;;  %v9725_v33 = vpop.f32.mrb[113].mxu0  ;;  %v8753_v31 = vld [vmem:[%s11459_s18 + $0x3] ss:$0 sm:$0xff] }
0x1d6d   : > { %v5649_v34 = vpop.f32.mrb[114].mxu0 }
0x1d6e   : > { %v9726_v11 = vpop.f32.mrb[115].mxu0  ;;  %v5653_v36 = vsel %vm1434_vm4, %v5652_v32, -inf }
0x1d6f   : > { %5654 = vmax.xlane.f32.xlu0 %v5653_v36 }
0x1dfc   : > { %v5655_v37 = vpop.xlane.xlu0 %5654 }
0x1dfd   : > { %v5656_v13 = vsub.f32 %v5652_v32, %v5655_v37 }
0x1dff   : > { %v5657_v38 = vmul.f32 1.442695, %v5656_v13 }
0x1e01   : > { %10180 = vpow2.f32 %v5657_v38 }
0x1e0b   : > { %v10181_v39 = vpop.eup %10180 }
0x1e0c   : > { %v5659_v35 = vsel %vm1434_vm4, %v10181_v39, 0.0 }
0x1e0d   : > { %5660 = vadd.xlane.f32.xlu1 %v5659_v35 }
0x1e9a   : > { %v5661_v46 = vpop.xlane.xlu1 %5660 }
0x1e9b   : > { %10182 = vrcp.f32 %v5661_v46 }
0x1ea5   : > { %v10183_v24 = vpop.eup %10182 }
0x1ea6   : > { %v5663_v25 = vmul.f32 %v10183_v24, %v10181_v39  ;;  %v8777_v24 = vld [vmem:[%s11461_s12 + $0xc] sm:$0xf] }
0x1ea8   : > { %v5664_v42 = vpack.c.bf16 %v5663_v25, %v5663_v25  ;;  %v6071_v25 = vsel %vm1497_vm5, %v8777_v24, 0 }
0x1eaa   : > { %9730 = vmatmul.mubr.msk.bf16.vlgmr.msra.gmra.mrb[112].mxu1 %vm1434_vm4, %v5664_v42 }
0x1eab   : > { %9740 = vmatpush3.bf16.msra.mxu1 %v10015_v53  ;;  %9743 = vmatprep.mubr.msk.bf16.mxu1 %vm10240_vm1, %v10239_v2 }
0x1eac   : > { %9741 = vmatprep.subr.bf16.mxu1 %v10239_v2 }
0x1eaf   : > { %9742 = vmatpush3.bf16.msra.mxu1 %v10016_v43 }
0x1eb0   : > { %9755 = vmatprep.subr.bf16.mxu1 %v10239_v2 }
0x1eb2   : > { %9744 = vmatmul.mubr.msk.bf16.vlgmr.msra.gmra.mrb[116].mxu1 %vm1261_vm3, %v10960_v45 }
0x1eb3   : > { %9756 = vmatpush3.bf16.msra.mxu1 %v10017_v14  ;;  %9759 = vmatprep.mubr.msk.bf16.mxu1 %vm10240_vm1, %v10239_v2 }
0x1eb4   : > { %9757 = vmatprep.subr.bf16.mxu1 %v10239_v2 }
0x1eb7   : > { %9758 = vmatpush3.bf16.msra.mxu1 %v10018_v15 }
0x1eb8   : > { %9769 = vmatprep.subr.bf16.mxu1 %v10239_v2 }
0x1eba   : > { %9760 = vmatmul.mubr.msk.bf16.vlgmr.msra.gmra.mrb[120].mxu1 %vm1261_vm3, %v10960_v45 }
0x1ebb   : > { %9771 = vmatprep.mubr.msk.bf16.mxu1 %vm10240_vm1, %v10239_v2 }
0x1f7d   : > { %v5705_v54 = vpop.f32.mrb[112].mxu1 }
0x1f7e   : > { %v5711_v56 = vpack.c.bf16 %v5705_v54, %v5705_v54  ;;  %v9731_v57 = vpop.f32.mrb[113].mxu1 }
0x1f7f   : > { %v5708_v58 = vpop.f32.mrb[114].mxu1 }
0x1f80   : > { %v9732_v59 = vpop.f32.mrb[115].mxu1  ;;  %9736 = vmatmul.mubr.msk.bf16.vlgmr.msra.gmra.mrb[116].mxu0 %vm1434_vm4, %v5711_v56 }
0x1f81   : > { %9748 = vmatpush3.bf16.msra.mxu0 %v10019_v55  ;;  %9751 = vmatprep.mubr.msk.bf16.mxu0 %vm10240_vm1, %v10239_v2  ;;  %v8779_v59 = vld [vmem:[%s11462_s1] ss:$0 sm:$0xff]  ;;  %s11465_s1 = sld [smem:[#allocation21_spill]] }
0x1f82   : > { %9749 = vmatprep.subr.bf16.mxu0 %v10239_v2 }
0x1f85   : > { %v5820_v62 = vpop.f32.mrb[116].mxu1  ;;  %9750 = vmatpush3.bf16.msra.mxu0 %v10020_v61 }
0x1f86   : > { %v9745_v63 = vpop.f32.mrb[117].mxu1  ;;  %9763 = vmatprep.subr.bf16.mxu0 %v10239_v2  ;;  %v5821_v33 = vadd.f32 %v8753_v31, %v5820_v62 }
0x1f87   : > { %v5823_v0 = vpop.f32.mrb[118].mxu1 }
0x1f88   : > { %v9746_v12 = vpop.f32.mrb[119].mxu1  ;;  %9752 = vmatmul.mubr.msk.bf16.vlgmr.msra.gmra.mrb[120].mxu0 %vm1261_vm3, %v10960_v45  ;;  %v5956_v34 = vpack.c.bf16 %v5821_v33, %v5821_v33  ;;  %v6155_v33 = vld [vmem:[%s11463_s10 + $0x10] sm:$0xff] }
0x1f89   : > { %9765 = vmatprep.mubr.msk.bf16.mxu0 %vm10240_vm1, %v10239_v2 }
0x1f8d   : > { %v5950_v8 = vpop.f32.mrb[120].mxu1 }
0x1f8e   : > { %v5951_v9 = vadd.f32 %v8771_v5, %v5950_v8  ;;  %v9761_v16 = vpop.f32.mrb[121].mxu1 }
0x1f8f   : > { %v5953_v17 = vpop.f32.mrb[122].mxu1 }
0x1f90   : > { %v5958_v47 = vpack.c.bf16 %v5951_v9, %v5951_v9  ;;  %v9762_v18 = vpop.f32.mrb[123].mxu1 }
0x1f92   : > { %v6022_v19 = vsel %vm1497_vm5, %v5958_v47, 0 }
0x1f93   : > { %9770 = vmatpush3.bf16.msra.mxu1 %v6022_v19  ;;  %v6153_v19 = vld [vmem:[%s11463_s10] sm:$0xff] }
0x2053   : > { %v5754_v21 = vpop.f32.mrb[116].mxu0 }
0x2054   : > { %v5760_v22 = vadd.f32 %v5754_v21, %v11070_v6  ;;  %v9737_v23 = vpop.f32.mrb[117].mxu0  ;;  %v6161_v21 = vld [vmem:[%s11463_s10 + $0x40] sm:$0xff] }
0x2055   : > { %v5757_v45 = vpop.f32.mrb[118].mxu0  ;;  %v8783_v23 = vcombine.high %v6153_v19, %v6161_v21 }
0x2056   : > { %v9738_v10 = vpop.f32.mrb[119].mxu0  ;;  %v6162_v45 = vld [vmem:[%s11463_s10 + $0x48] sm:$0xff] }
0x2057   : > { %6432 = vmatprep.subr.bf16.mxu1 %v8783_v23  ;;  %v6167_v23 = vld [vmem:[%s11463_s10 + $0x70] sm:$0xff] }
0x205b   : > { %v5885_v27 = vpop.f32.mrb[120].mxu0 }
0x205c   : > { %v5886_v28 = vadd.f32 %v8762_v26, %v5885_v27  ;;  %v9753_v29 = vpop.f32.mrb[121].mxu0  ;;  %v6169_v27 = vld [vmem:[%s11463_s10 + $0x80] sm:$0xff] }
0x205d   : > { %v5888_v30 = vpop.f32.mrb[122].mxu0  ;;  %v6170_v29 = vld [vmem:[%s11463_s10 + $0x88] sm:$0xff] }
0x205e   : > { %v5957_v50 = vpack.c.bf16 %v5886_v28, %v5886_v28  ;;  %v9754_v1 = vpop.f32.mrb[123].mxu0  ;;  %v6177_v28 = vld [vmem:[%s11463_s10 + $0xc0] sm:$0xff] }
0x205f   : > { %v8799_v30 = vcombine.high %v6169_v27, %v6177_v28  ;;  %v8798_v1 = vcombine.low %v6169_v27, %v6177_v28 }
0x2060   : > { %v5963_v32 = vsel %vm1434_vm4, %v5957_v50, 0  ;;  %v6178_v50 = vld [vmem:[%s11463_s10 + $0xc8] sm:$0xff] }
0x2061   : > { %9764 = vmatpush3.bf16.xpose.msra.mxu0 %v5963_v32  ;;  %v8800_v31 = vcombine.low %v6170_v29, %v6178_v50  ;;  %v8801_v32 = vcombine.high %v6170_v29, %v6178_v50  ;;  %v6175_v29 = vld [vmem:[%s11463_s10 + $0xb0] sm:$0xff]  ;;  %v6176_v50 = vld [vmem:[%s11463_s10 + $0xb8] sm:$0xff] }
0x2062   : > { %9775 = vmatprep.subr.bf16.mxu0 %v10239_v2 }
0x2068   : > { %9766 = vmatmul.mubr.msk.bf16.vlgmr.msra.gmra.mrb[124].mxu0 %vm1434_vm4, %v5956_v34  ;;  %v6163_v34 = vld [vmem:[%s11463_s10 + $0x50] sm:$0xff] }
0x2069   : > { %9777 = vmatprep.mubr.msk.bf16.mxu0 %vm10240_vm1, %v10239_v2  ;;  %9776 = vmatpush3.bf16.msra.mxu0 %v6071_v25  ;;  %v8781_v25 = vld [vmem:[%s11465_s1] ss:$0 sm:$0xff]  ;;  %s11467_s1 = sld [smem:[#allocation17_spill]] }
0x213b   : > { %v5999_v6 = vpop.f32.mrb[124].mxu0 }
0x213c   : > { %v6005_v11 = vmul.f32 0.35355338, %v5999_v6  ;;  %v9767_v36 = vpop.f32.mrb[125].mxu0  ;;  %v6156_v6 = vld [vmem:[%s11463_s10 + $0x18] sm:$0xff] }
0x213d   : > { %v6002_v37 = vpop.f32.mrb[126].mxu0  ;;  %v8787_v36 = vcombine.high %v6155_v33, %v6163_v34 }
0x213e   : > { %v9768_v13 = vpop.f32.mrb[127].mxu0  ;;  %v6006_v38 = vsel %vm1434_vm4, %v6005_v11, -inf  ;;  %v6164_v37 = vld [vmem:[%s11463_s10 + $0x58] sm:$0xff] }
0x213f   : > { %6007 = vmax.xlane.f32.xlu0 %v6006_v38  ;;  %v8788_v13 = vcombine.low %v6156_v6, %v6164_v37  ;;  %v8789_v38 = vcombine.high %v6156_v6, %v6164_v37 }
0x21cc   : > { %v6008_v39 = vpop.xlane.xlu0 %6007 }
0x21cd   : > { %v6009_v35 = vsub.f32 %v6005_v11, %v6008_v39  ;;  %v8786_v11 = vcombine.low %v6155_v33, %v6163_v34 }
0x21cf   : > { %v6010_v40 = vmul.f32 1.442695, %v6009_v35 }
0x21d1   : > { %10184 = vpow2.f32 %v6010_v40 }
0x21db   : > { %v10185_v41 = vpop.eup %10184 }
0x21dc   : > { %v6012_v46 = vsel %vm1434_vm4, %v10185_v41, 0.0 }
0x21dd   : > { %6013 = vadd.xlane.f32.xlu1 %v6012_v46  ;;  %v8780_v46 = vld [vmem:[%s11464_s11] ss:$0 sm:$0xff]  ;;  %s11466_s11 = sld [smem:[#allocation18_spill]] }
0x21e3   : > { %v10022_v37 = vld [vmem:[%s11466_s11 + $0xc0] sm:$0xff]  }
0x226a   : > { %v6014_v53 = vpop.xlane.xlu1 %6013 }
0x226b   : > { %10186 = vrcp.f32 %v6014_v53 }
0x2275   : > { %v10187_v42 = vpop.eup %10186 }
0x2276   : > { %v6016_v43 = vmul.f32 %v10187_v42, %v10185_v41  ;;  %v6171_v42 = vld [vmem:[%s11463_s10 + $0x90] sm:$0xff] }
0x2278   : > { %v6017_v14 = vpack.c.bf16 %v6016_v43, %v6016_v43  ;;  %v6179_v43 = vld [vmem:[%s11463_s10 + $0xd0] sm:$0xff] }
0x227a   : > { %9772 = vmatmul.mubr.msk.bf16.vlgmr.msra.gmra.mrb[124].mxu1 %vm1434_vm4, %v6017_v14  ;;  %v6172_v14 = vld [vmem:[%s11463_s10 + $0x98] sm:$0xff] }
0x227b   : > { %6464 = vmatprep.mubr.bf16.mxu1 %v10241_v20 }
0x234d   : > { %v6058_v15 = vpop.f32.mrb[124].mxu1 }
0x234e   : > { %v6064_v54 = vpack.c.bf16 %v6058_v15, %v6058_v15  ;;  %v9773_v55 = vpop.f32.mrb[125].mxu1  ;;  %v6180_v15 = vld [vmem:[%s11463_s10 + $0xd8] sm:$0xff] }
0x234f   : > { %v6061_v56 = vpop.f32.mrb[126].mxu1 }
0x2350   : > { %v9774_v57 = vpop.f32.mrb[127].mxu1  ;;  %9778 = vmatmul.mubr.msk.bf16.vlgmr.msra.gmra.mrb[128].mxu0 %vm1434_vm4, %v6064_v54  ;;  %v8803_v56 = vcombine.high %v6171_v42, %v6179_v43 }
0x2351   : > { %6505 = vmatprep.mubr.bf16.mxu0 %v10241_v20  ;;  %v8805_v57 = vcombine.high %v6172_v14, %v6180_v15 }
0x2423   : > { %v6107_v58 = vpop.f32.mrb[128].mxu0 }
0x2424   : > { %v6113_v61 = vadd.f32 %v6107_v58, %v5760_v22  ;;  %v9779_v62 = vpop.f32.mrb[129].mxu0  ;;  %v6154_v22 = vld [vmem:[%s11463_s10 + $0x8] sm:$0xff]  ;;  %v6157_v58 = vld [vmem:[%s11463_s10 + $0x20] sm:$0xff] }
0x2425   : > { %v6110_v63 = vpop.f32.mrb[130].mxu0  ;;  %v8784_v10 = vcombine.low %v6154_v22, %v6162_v45  ;;  %v8785_v26 = vcombine.high %v6154_v22, %v6162_v45  ;;  %v6166_v62 = vld [vmem:[%s11463_s10 + $0x68] sm:$0xff]  ;;  %v6159_v22 = vld [vmem:[%s11463_s10 + $0x30] sm:$0xff]  ;;  %v6160_v45 = vld [vmem:[%s11463_s10 + $0x38] sm:$0xff] }
0x2426   : > { %v6121_v0 = vadd.f32 %v8779_v59, %v6113_v61  ;;  %v9780_v12 = vpop.f32.mrb[131].mxu0  ;;  %v6165_v59 = vld [vmem:[%s11463_s10 + $0x60] sm:$0xff]  ;;  %v6158_v61 = vld [vmem:[%s11463_s10 + $0x28] sm:$0xff]  ;;  %v8802_v63 = vcombine.low %v6171_v42, %v6179_v43  ;;  %v8795_v27 = vcombine.high %v6159_v22, %v6167_v23  ;;  %v10034_v42 = vld [vmem:[%s11466_s11 + $0xd8] sm:$0xff]  }
0x2427   : > { %6473 = vmatprep.subr.bf16.mxu0 %v8785_v26  ;;  %v8791_v12 = vcombine.high %v6157_v58, %v6165_v59  ;;  %v10035_v43 = vld [vmem:[%s11466_s11 + $0x18] sm:$0xff]  }
0x2428   : > { %v6122_v5 = vadd.f32 %v6121_v0, %v10955_v44  ;;  %v8782_v44 = vcombine.low %v6153_v19, %v6161_v21  ;;  %6474 = vmatpush1.bf16.msra.mxu0 %v8784_v10  ;;  %v8804_v0 = vcombine.low %v6172_v14, %v6180_v15  ;;  %v10036_v14 = vld [vmem:[%s11466_s11 + $0x98] sm:$0xff]   ;;  %v10037_v15 = vld [vmem:[%s11466_s11 + $0x60] sm:$0xff]  }
0x2429   : > { %6475 = vmatprep.subr.bf16.mxu0 %v8801_v32 }
0x242a   : > { %v6125_v8 = vsel %vm1261_vm3, %v6122_v5, 0.0  ;;  %6433 = vmatpush1.bf16.msra.mxu1 %v8782_v44  ;;  %v6168_v44 = vld [vmem:[%s11463_s10 + $0x78] sm:$0xff] }
0x242b   : > { %6126 = vadd.xlane.f32.xlu0 %v6125_v8  ;;  %6434 = vmatprep.subr.bf16.mxu1 %v8799_v30  ;;  %v6173_v8 = vld [vmem:[%s11463_s10 + $0xa0] sm:$0xff]  ;;  %v8797_v28 = vcombine.high %v6160_v45, %v6168_v44  ;;  %v6183_v30 = vld [vmem:[%s11463_s10 + $0xf0] sm:$0xff]  ;;  %v8796_v32 = vcombine.low %v6160_v45, %v6168_v44 }
0x242c   : > { %6476 = vmatpush1.bf16.msra.mxu0 %v8800_v31  ;;  %v8794_v31 = vcombine.low %v6159_v22, %v6167_v23  ;;  %v8811_v33 = vcombine.high %v6175_v29, %v6183_v30  ;;  %v8810_v6 = vcombine.low %v6175_v29, %v6183_v30 }
0x242d   : > { %6555 = vmatprep.subr.bf16.mxu0 %v8789_v38  ;;  %v10024_v38 = vld [vmem:[%s11466_s11 + $0x80] sm:$0xff]  }
0x242e   : > { %6435 = vmatpush1.bf16.msra.mxu1 %v8798_v1  ;;  %v6184_v1 = vld [vmem:[%s11463_s10 + $0xf8] sm:$0xff] }
0x242f   : > { %6514 = vmatprep.subr.bf16.mxu1 %v8787_v36  ;;  %v8813_v34 = vcombine.high %v6176_v50, %v6184_v1  ;;  %v10021_v36 = vld [vmem:[%s11466_s11 + $0x40] sm:$0xff]  }
0x24b8   : > { %v6127_v9 = vpop.xlane.xlu0 %6126 }
0x24b9   : > { %v6128_v16 = vmul.f32 0.03125, %v6127_v9  ;;  %v6181_v9 = vld [vmem:[%s11463_s10 + $0xe0] sm:$0xff] }
0x24ba   : > { %v8807_v19 = vcombine.high %v6173_v8, %v6181_v9  ;;  %v8806_v10 = vcombine.low %v6173_v8, %v6181_v9  ;;  %v10049_v8 = vld [vmem:[%s11466_s11 + $0x78] sm:$0xff]  }
0x24bb   : > { %v6129_v17 = vsub.f32 %v6122_v5, %v6128_v16  ;;  %v8793_v5 = vcombine.high %v6158_v61, %v6166_v62  ;;  %v6174_v16 = vld [vmem:[%s11463_s10 + $0xa8] sm:$0xff]  ;;  %v10050_v9 = vld [vmem:[%s11466_s11 + $0xf8] sm:$0xff]  }
0x24bd   : > { %v6130_v47 = vmul.f32 %v6129_v17, %v6129_v17 }
0x24bf   : > { %v6131_v18 = vsel %vm1261_vm3, %v6130_v47, 0.0  ;;  %v8790_v47 = vcombine.low %v6157_v58, %v6165_v59  ;;  %v10041_v58 = vld [vmem:[%s11466_s11 + $0x68] sm:$0xff]  }
0x24c0   : > { %6132 = vadd.xlane.f32.xlu1 %v6131_v18  ;;  %v8792_v18 = vcombine.low %v6158_v61, %v6166_v62  ;;  %v10042_v59 = vld [vmem:[%s11466_s11 + $0xe8] sm:$0xff]  }
0x24c1   : > { %v10043_v61 = vld [vmem:[%s11466_s11 + $0x28] sm:$0xff]  }
0x24c2   : > { %v10044_v62 = vld [vmem:[%s11466_s11 + $0xa8] sm:$0xff]  }
0x254d   : > { %v6133_v39 = vpop.xlane.xlu1 %6132 }
0x254e   : > { %v6134_v35 = vmul.f32 0.03125, %v6133_v39  ;;  %v10025_v39 = vld [vmem:[%s11466_s11 + $0x48] sm:$0xff]  }
0x2550   : > { %v6135_v40 = vadd.f32 1e-05, %v6134_v35  ;;  %v10026_v35 = vld [vmem:[%s11466_s11 + $0xc8] sm:$0xff]  }
0x2552   : > { %10188 = vrsqrt.f32 %v6135_v40  ;;  %v10028_v40 = vld [vmem:[%s11466_s11 + $0x88] sm:$0xff]  }
0x255c   : > { %v10189_v41 = vpop.eup %10188 }
0x255d   : > { %v6137_v24 = vmul.f32 %v10189_v41, %v6129_v17  ;;  %v6182_v17 = vld [vmem:[%s11463_s10 + $0xe8] sm:$0xff]  ;;  %v10029_v41 = vld [vmem:[%s11466_s11 + $0x50] sm:$0xff]  }
0x255e   : > { %v8809_v21 = vcombine.high %v6174_v16, %v6182_v17  ;;  %v8808_v26 = vcombine.low %v6174_v16, %v6182_v17  ;;  %v10051_v16 = vld [vmem:[%s11466_s11 + $0x38] sm:$0xff]  }
0x255f   : > { %v6144_v53 = vmul.f32 %v8780_v46, %v6137_v24  ;;  %v10030_v46 = vld [vmem:[%s11466_s11 + $0xd0] sm:$0xff]   ;;  %v10052_v17 = vld [vmem:[%s11466_s11 + $0xb8] sm:$0xff]  }
0x2560   : > { %v10031_v24 = vld [vmem:[%s11466_s11 + $0x10] sm:$0xff]  }
0x2561   : > { %v11154_v54 = vadd.f32 %v8781_v25, %v6144_v53  ;;  %v10032_v25 = vld [vmem:[%s11466_s11 + $0x90] sm:$0xff]   ;;  %v10033_v53 = vld [vmem:[%s11466_s11 + $0x58] sm:$0xff]  }
0x2563   : > { %v11158_v55 = vpack.c.bf16 %v11154_v54, %v11154_v54 }
0x2565   : > { %8814 = vmatmul.mubr.msk.bf16.vlgmr.msra.gmra.mrb[128].mxu1 %vm1261_vm3, %v11158_v55  ;;  %8815 = vmatmul.mubr.msk.bf16.vlgmr.msra.gmra.mrb[132].mxu0 %vm1261_vm3, %v11158_v55 }
0x2566   : > { %6515 = vmatpush1.bf16.msra.mxu1 %v8786_v11  ;;  %6556 = vmatpush1.bf16.msra.mxu0 %v8788_v13  ;;  %v8812_v11 = vcombine.low %v6176_v50, %v6184_v1  ;;  %v10023_v13 = vld [vmem:[%s11466_s11] sm:$0xff]  }
0x2567   : > { %6516 = vmatprep.subr.bf16.mxu1 %v8803_v56  ;;  %6557 = vmatprep.subr.bf16.mxu0 %v8805_v57  ;;  %v10039_v56 = vld [vmem:[%s11466_s11 + $0x20] sm:$0xff]  }
0x2568   : > { %6546 = vmatprep.mubr.bf16.mxu1 %v10241_v20  ;;  %6587 = vmatprep.mubr.bf16.mxu0 %v10241_v20  ;;  %v10040_v57 = vld [vmem:[%s11466_s11 + $0xa0] sm:$0xff]  }
0x256a   : > { %6517 = vmatpush1.bf16.msra.mxu1 %v8802_v63  ;;  %6558 = vmatpush1.bf16.msra.mxu0 %v8804_v0  ;;  %v10045_v63 = vld [vmem:[%s11466_s11 + $0x70] sm:$0xff]  }
0x256b   : > { %6596 = vmatprep.subr.bf16.mxu1 %v8791_v12  ;;  %6637 = vmatprep.subr.bf16.mxu0 %v8793_v5  ;;  %v10046_v0 = vld [vmem:[%s11466_s11 + $0xf0] sm:$0xff]  }
0x256c   : > { %v10047_v12 = vld [vmem:[%s11466_s11 + $0x30] sm:$0xff]  }
0x256d   : > { %8816 = vmatmul.mubr.msk.bf16.vlgmr.msra.gmra.mrb[132].mxu1 %vm1261_vm3, %v11158_v55  ;;  %8817 = vmatmul.mubr.msk.bf16.vlgmr.msra.gmra.mrb[136].mxu0 %vm1261_vm3, %v11158_v55  ;;  %v10048_v5 = vld [vmem:[%s11466_s11 + $0xb0] sm:$0xff]  }
0x256e   : > { %6597 = vmatpush1.bf16.msra.mxu1 %v8790_v47  ;;  %6638 = vmatpush1.bf16.msra.mxu0 %v8792_v18  ;;  %v10053_v47 = vld [vmem:[%s11466_s11 + $0x140] sm:$0xff]  }
0x256f   : > { %6598 = vmatprep.subr.bf16.mxu1 %v8807_v19  ;;  %6639 = vmatprep.subr.bf16.mxu0 %v8809_v21  ;;  %v10054_v18 = vld [vmem:[%s11466_s11 + $0x1c0] sm:$0xff]  }
0x2570   : > { %6628 = vmatprep.mubr.bf16.mxu1 %v10241_v20  ;;  %6669 = vmatprep.mubr.bf16.mxu0 %v10241_v20  ;;  %v11233_v19 = vld [vmem:[%s11467_s1] sm:$0xff] }
0x2571   : > { %v6192_v21 = vrot.slane %v11233_v19, %v10756_v48  ;;  %v6200_v22 = vrot.slane %v11233_v19, %v10759_v49  ;;  %v6196_v23 = vrot.slane %v11233_v19, %v10765_v51  ;;  %v6204_v45 = vrot.slane %v11233_v19, %v10768_v52 }
0x2572   : > { %6599 = vmatpush1.bf16.msra.mxu1 %v8806_v10  ;;  %6640 = vmatpush1.bf16.msra.mxu0 %v8808_v26 }
0x2573   : > { %6678 = vmatprep.subr.bf16.mxu1 %v8795_v27  ;;  %6719 = vmatprep.subr.bf16.mxu0 %v8797_v28 }
0x2575   : > { %8818 = vmatmul.mubr.msk.bf16.vlgmr.msra.gmra.mrb[136].mxu1 %vm1261_vm3, %v11158_v55  ;;  %8819 = vmatmul.mubr.msk.bf16.vlgmr.msra.gmra.mrb[140].mxu0 %vm1261_vm3, %v11158_v55 }
0x2576   : > { %6679 = vmatpush1.bf16.msra.mxu1 %v8794_v31  ;;  %6720 = vmatpush1.bf16.msra.mxu0 %v8796_v32 }
0x2577   : > { %6680 = vmatprep.subr.bf16.mxu1 %v8811_v33  ;;  %6721 = vmatprep.subr.bf16.mxu0 %v8813_v34 }
0x2578   : > { %6710 = vmatprep.mubr.bf16.mxu1 %v10241_v20  ;;  %6751 = vmatprep.mubr.bf16.mxu0 %v10241_v20  ;;  %v10027_v20 = vld [vmem:[%s11466_s11 + $0x8] sm:$0xff]  }
0x257a   : > { %6681 = vmatpush1.bf16.msra.mxu1 %v8810_v6  ;;  %6722 = vmatpush1.bf16.msra.mxu0 %v8812_v11 }
0x257b   : > { %9258 = vmatprep.subr.bf16.mxu1 %v10021_v36  ;;  %9280 = vmatprep.subr.bf16.mxu0 %v10022_v37 }
0x257d   : > { %8820 = vmatmul.mubr.msk.bf16.vlgmr.msra.gmra.mrb[140].mxu1 %vm1261_vm3, %v11158_v55  ;;  %8821 = vmatmul.mubr.msk.bf16.vlgmr.msra.gmra.mrb[144].mxu0 %vm1261_vm3, %v11158_v55  ;;  %v10038_v55 = vld [vmem:[%s11466_s11 + $0xe0] sm:$0xff]  }
0x257e   : > { %9259 = vmatpush3.bf16.msra.mxu1 %v10023_v13  ;;  %9281 = vmatpush3.bf16.msra.mxu0 %v10024_v38  ;;  %v6212_v38 = vrot.slane %v11233_v19, %v10779_v3 }
0x257f   : > { %9260 = vmatprep.subr.bf16.mxu1 %v10025_v39  ;;  %9282 = vmatprep.subr.bf16.mxu0 %v10026_v35  ;;  %v6220_v39 = vrot.slane %v11233_v19, %v10782_v4  ;;  %v10055_v35 = vld [vmem:[%s11466_s11 + $0x100] sm:$0xff]  }
0x2582   : > { %9261 = vmatpush3.bf16.msra.mxu1 %v10027_v20  ;;  %9283 = vmatpush3.bf16.msra.mxu0 %v10028_v40  ;;  %v10056_v20 = vld [vmem:[%s11466_s11 + $0x180] sm:$0xff]  }
0x2583   : > { %9262 = vmatprep.subr.bf16.mxu1 %v10029_v41  ;;  %9284 = vmatprep.subr.bf16.mxu0 %v10030_v46  ;;  %v10057_v46 = vld [vmem:[%s11466_s11 + $0x148] sm:$0xff]  }
0x2586   : > { %9263 = vmatpush3.bf16.msra.mxu1 %v10031_v24  ;;  %9285 = vmatpush3.bf16.msra.mxu0 %v10032_v25  ;;  %v10058_v24 = vld [vmem:[%s11466_s11 + $0x1c8] sm:$0xff]  }
0x2587   : > { %9264 = vmatprep.subr.bf16.mxu1 %v10033_v53  ;;  %9286 = vmatprep.subr.bf16.mxu0 %v10034_v42 }
0x258a   : > { %9265 = vmatpush3.bf16.msra.mxu1 %v10035_v43  ;;  %9287 = vmatpush3.bf16.msra.mxu0 %v10036_v14 }
0x258b   : > { %9266 = vmatprep.subr.bf16.mxu1 %v10037_v15  ;;  %9288 = vmatprep.subr.bf16.mxu0 %v10038_v55 }
0x258e   : > { %9267 = vmatpush3.bf16.msra.mxu1 %v10039_v56  ;;  %9289 = vmatpush3.bf16.msra.mxu0 %v10040_v57  ;;  %v10059_v57 = vld [vmem:[%s11466_s11 + $0x108] sm:$0xff]  }
0x258f   : > { %9268 = vmatprep.subr.bf16.mxu1 %v10041_v58  ;;  %9290 = vmatprep.subr.bf16.mxu0 %v10042_v59  ;;  %v10060_v58 = vld [vmem:[%s11466_s11 + $0x188] sm:$0xff]  }
0x2592   : > { %9269 = vmatpush3.bf16.msra.mxu1 %v10043_v61  ;;  %9291 = vmatpush3.bf16.msra.mxu0 %v10044_v62  ;;  %v10061_v62 = vld [vmem:[%s11466_s11 + $0x150] sm:$0xff]  }
0x2593   : > { %9270 = vmatprep.subr.bf16.mxu1 %v10045_v63  ;;  %9292 = vmatprep.subr.bf16.mxu0 %v10046_v0  ;;  %v10062_v63 = vld [vmem:[%s11466_s11 + $0x1d0] sm:$0xff]  }
0x2596   : > { %9271 = vmatpush3.bf16.msra.mxu1 %v10047_v12  ;;  %9293 = vmatpush3.bf16.msra.mxu0 %v10048_v5 }
0x2597   : > { %9272 = vmatprep.subr.bf16.mxu1 %v10049_v8  ;;  %9294 = vmatprep.subr.bf16.mxu0 %v10050_v9  ;;  %v10063_v9 = vld [vmem:[%s11466_s11 + $0x110] sm:$0xff]  }
0x259a   : > { %9273 = vmatpush3.bf16.msra.mxu1 %v10051_v16  ;;  %9295 = vmatpush3.bf16.msra.mxu0 %v10052_v17  ;;  %v10064_v16 = vld [vmem:[%s11466_s11 + $0x190] sm:$0xff]   ;;  %v10065_v17 = vld [vmem:[%s11466_s11 + $0x158] sm:$0xff]  }
0x259b   : > { %9302 = vmatprep.subr.bf16.mxu1 %v10053_v47  ;;  %9324 = vmatprep.subr.bf16.mxu0 %v10054_v18  ;;  %v10066_v47 = vld [vmem:[%s11466_s11 + $0x1d8] sm:$0xff]  }
0x2638   : > { %v6466_v44 = vpop.f32.mrb[128].mxu1  ;;  %v6507_v10 = vpop.f32.mrb[132].mxu0 }
0x2639   : > { %v6467_v26 = vadd.f32 %v6466_v44, %v6192_v21  ;;  %v6508_v27 = vadd.f32 %v6507_v10, %v6200_v22  ;;  %v6468_v28 = vpop.f32.mrb[129].mxu1  ;;  %v6509_v29 = vpop.f32.mrb[133].mxu0  ;;  %v10067_v10 = vld [vmem:[%s11466_s11 + $0x118] sm:$0xff]  }
0x263a   : > { %v6469_v30 = vadd.f32 %v6468_v28, %v6196_v23  ;;  %v6510_v50 = vadd.f32 %v6509_v29, %v6204_v45  ;;  %v6470_v1 = vpop.f32.mrb[130].mxu1  ;;  %v6511_v31 = vpop.f32.mrb[134].mxu0  ;;  %v10069_v29 = vld [vmem:[%s11466_s11 + $0x160] sm:$0xff]  }
0x263b   : > { %v6760_v32 = vmax.f32 %v6467_v26, 0.0  ;;  %v6762_v33 = vmax.f32 %v6508_v27, 0.0  ;;  %v6471_v34 = vpop.f32.mrb[131].mxu1  ;;  %v6512_v6 = vpop.f32.mrb[135].mxu0  ;;  %v10068_v26 = vld [vmem:[%s11466_s11 + $0x198] sm:$0xff]   ;;  %v10071_v31 = vld [vmem:[%s11466_s11 + $0x120] sm:$0xff]  }
0x263c   : > { %v6761_v11 = vmax.f32 %v6469_v30, 0.0  ;;  %v6763_v36 = vmax.f32 %v6510_v50, 0.0  ;;  %v10070_v30 = vld [vmem:[%s11466_s11 + $0x1e0] sm:$0xff]   ;;  %v11272_v50 = vld [vmem:[%s11467_s1 + $0x8] sm:$0xff]  ;;  %s11470_s1 = sld [smem:[#allocation22_spill]] }
0x263d   : > { %v6776_v40 = vpack.c.bf16 %v6760_v32, %v6760_v32  ;;  %v6778_v41 = vpack.c.bf16 %v6762_v33, %v6762_v33  ;;  %v6248_v1 = vrot.slane %v11272_v50, %v10811_v60  ;;  %v10072_v32 = vld [vmem:[%s11466_s11 + $0x1a0] sm:$0xff]   ;;  %v10073_v33 = vld [vmem:[%s11466_s11 + $0x168] sm:$0xff]  }
0x263e   : > { %v6777_v37 = vpack.c.bf16 %v6761_v11, %v6761_v11  ;;  %v6779_v13 = vpack.c.bf16 %v6763_v36, %v6763_v36  ;;  %v10074_v34 = vld [vmem:[%s11466_s11 + $0x1e8] sm:$0xff]  }
0x2640   : > { %v11251_v25 = vpop.f32.mrb[132].mxu1  ;;  %v11253_v53 = vpop.f32.mrb[136].mxu0  ;;  %7855 = vmatprep.mubr.bf16.mxu1 %v6777_v37  ;;  %7895 = vmatprep.mubr.bf16.mxu0 %v6779_v13 }
0x2641   : > { %v6550_v42 = vpop.f32.mrb[133].mxu1  ;;  %v6591_v43 = vpop.f32.mrb[137].mxu0  ;;  %7856 = vmatmul.mubr.bf16.vlgmr.msra.gmra.mrb[144].mxu1 %v6776_v40  ;;  %7896 = vmatmul.mubr.bf16.vlgmr.msra.gmra.mrb[148].mxu0 %v6778_v41  ;;  %v6208_v40 = vrot.slane %v11233_v19, %v10823_v7  ;;  %v6216_v41 = vrot.slane %v11233_v19, %v10811_v60  ;;  %v10080_v60 = vld [vmem:[%s11466_s11 + $0x1b0] sm:$0xff]  }
0x2642   : > { %v6551_v14 = vadd.f32 %v6550_v42, %v6212_v38  ;;  %v6592_v15 = vadd.f32 %v6591_v43, %v6220_v39  ;;  %9303 = vmatpush3.bf16.msra.mxu1 %v10055_v35  ;;  %9325 = vmatpush3.bf16.msra.mxu0 %v10056_v20  ;;  %v6552_v55 = vpop.f32.mrb[134].mxu1  ;;  %v6593_v56 = vpop.f32.mrb[138].mxu0  ;;  %v10075_v35 = vld [vmem:[%s11466_s11 + $0x128] sm:$0xff]   ;;  %v10077_v42 = vld [vmem:[%s11466_s11 + $0x170] sm:$0xff]  }
0x2643   : > { %v6553_v59 = vpop.f32.mrb[135].mxu1  ;;  %v6594_v61 = vpop.f32.mrb[139].mxu0  ;;  %9304 = vmatprep.subr.bf16.mxu1 %v10057_v46  ;;  %9326 = vmatprep.subr.bf16.mxu0 %v10058_v24  ;;  %v10076_v20 = vld [vmem:[%s11466_s11 + $0x1a8] sm:$0xff]   ;;  %v10078_v43 = vld [vmem:[%s11466_s11 + $0x1f0] sm:$0xff]   ;;  %v6549_v19 = vadd.f32 %v11251_v25, %v6208_v40  ;;  %v6590_v56 = vadd.f32 %v11253_v53, %v6216_v41  ;;  %v10085_v25 = vld [vmem:[%s11466_s11 + $0x240] sm:$0xff]  }
0x2644   : > { %v6765_v0 = vmax.f32 %v6551_v14, 0.0  ;;  %v6767_v12 = vmax.f32 %v6592_v15, 0.0  ;;  %v6228_v14 = vrot.slane %v11272_v50, %v10765_v51  ;;  %v6236_v15 = vrot.slane %v11272_v50, %v10768_v52  ;;  %v10079_v55 = vld [vmem:[%s11466_s11 + $0x130] sm:$0xff]   ;;  %v10083_v52 = vld [vmem:[%s11466_s11 + $0x138] sm:$0xff]   ;;  %v10086_v53 = vld [vmem:[%s11466_s11 + $0x2c0] sm:$0xff]  }
0x2645   : > { %v10084_v61 = vld [vmem:[%s11466_s11 + $0x1b8] sm:$0xff]   ;;  %v10108_v40 = vld [vmem:[%s11466_s11 + $0x2a8] sm:$0xff]   ;;  %v10109_v41 = vld [vmem:[%s11466_s11 + $0x270] sm:$0xff]  }
0x2646   : > { %v6781_v5 = vpack.c.bf16 %v6765_v0, %v6765_v0  ;;  %v6783_v8 = vpack.c.bf16 %v6767_v12, %v6767_v12  ;;  %9305 = vmatpush3.bf16.msra.mxu1 %v10059_v57  ;;  %9327 = vmatpush3.bf16.msra.mxu0 %v10060_v58  ;;  %v10081_v57 = vld [vmem:[%s11466_s11 + $0x178] sm:$0xff]  }
0x2647   : > { %9306 = vmatprep.subr.bf16.mxu1 %v10061_v62  ;;  %9328 = vmatprep.subr.bf16.mxu0 %v10062_v63  ;;  %v10082_v58 = vld [vmem:[%s11466_s11 + $0x1f8] sm:$0xff]   ;;  %v6764_v62 = vmax.f32 %v6549_v19, 0.0  ;;  %v6766_v63 = vmax.f32 %v6590_v56, 0.0 }
0x2648   : > { %v11263_v18 = vpop.f32.mrb[136].mxu1  ;;  %v11265_v21 = vpop.f32.mrb[140].mxu0  ;;  %7935 = vmatprep.mubr.bf16.mxu1 %v6781_v5  ;;  %7975 = vmatprep.mubr.bf16.mxu0 %v6783_v8  ;;  %v10087_v5 = vld [vmem:[%s11466_s11 + $0x200] sm:$0xff]   ;;  %v10115_v19 = vld [vmem:[%s11466_s11 + $0x238] sm:$0xff]  }
0x2649   : > { %v6632_v22 = vpop.f32.mrb[137].mxu1  ;;  %v6673_v23 = vpop.f32.mrb[141].mxu0  ;;  %v6780_v8 = vpack.c.bf16 %v6764_v62, %v6764_v62  ;;  %v10121_v62 = vld [vmem:[%s11466_s11 + $0x348] sm:$0xff]  }
0x264a   : > { %9307 = vmatpush3.bf16.msra.mxu1 %v10063_v9  ;;  %9329 = vmatpush3.bf16.msra.mxu0 %v10064_v16  ;;  %v6634_v45 = vpop.f32.mrb[138].mxu1  ;;  %v6675_v44 = vpop.f32.mrb[142].mxu0  ;;  %v6633_v51 = vadd.f32 %v6632_v22, %v6228_v14  ;;  %v6674_v59 = vadd.f32 %v6673_v23, %v6236_v15  ;;  %v6782_v9 = vpack.c.bf16 %v6766_v63, %v6766_v63  ;;  %v10088_v16 = vld [vmem:[%s11466_s11 + $0x280] sm:$0xff]   ;;  %v10090_v22 = vld [vmem:[%s11466_s11 + $0x2c8] sm:$0xff]   ;;  %v10112_v15 = vld [vmem:[%s11466_s11 + $0x2b0] sm:$0xff]  }
0x264b   : > { %v6635_v27 = vpop.f32.mrb[139].mxu1  ;;  %v6676_v28 = vpop.f32.mrb[143].mxu0  ;;  %9308 = vmatprep.subr.bf16.mxu1 %v10065_v17  ;;  %9330 = vmatprep.subr.bf16.mxu0 %v10066_v47  ;;  %v10089_v47 = vld [vmem:[%s11466_s11 + $0x248] sm:$0xff]  }
0x264c   : > { %v6769_v0 = vmax.f32 %v6633_v51, 0.0  ;;  %v6771_v12 = vmax.f32 %v6674_v59, 0.0  ;;  %v10091_v45 = vld [vmem:[%s11466_s11 + $0x208] sm:$0xff]   ;;  %v10095_v27 = vld [vmem:[%s11466_s11 + $0x210] sm:$0xff]  }
0x264d   : > { %v10092_v44 = vld [vmem:[%s11466_s11 + $0x288] sm:$0xff]   ;;  %v10096_v28 = vld [vmem:[%s11466_s11 + $0x290] sm:$0xff]  }
0x264e   : > { %9309 = vmatpush3.bf16.msra.mxu1 %v10067_v10  ;;  %9331 = vmatpush3.bf16.msra.mxu0 %v10068_v26  ;;  %v6785_v17 = vpack.c.bf16 %v6769_v0, %v6769_v0  ;;  %v6787_v23 = vpack.c.bf16 %v6771_v12, %v6771_v12  ;;  %v10093_v10 = vld [vmem:[%s11466_s11 + $0x250] sm:$0xff]   ;;  %v10123_v0 = vld [vmem:[%s11466_s11 + $0x308] sm:$0xff]  }
0x264f   : > { %9310 = vmatprep.subr.bf16.mxu1 %v10069_v29  ;;  %9332 = vmatprep.subr.bf16.mxu0 %v10070_v30  ;;  %v10094_v26 = vld [vmem:[%s11466_s11 + $0x2d0] sm:$0xff]   ;;  %v10097_v29 = vld [vmem:[%s11466_s11 + $0x258] sm:$0xff]   ;;  %v10124_v12 = vld [vmem:[%s11466_s11 + $0x388] sm:$0xff]  }
0x2650   : > { %v11280_v6 = vpop.f32.mrb[140].mxu1  ;;  %v6753_v11 = vpop.f32.mrb[144].mxu0  ;;  %v10098_v30 = vld [vmem:[%s11466_s11 + $0x2d8] sm:$0xff]  }
0x2651   : > { %v11282_v36 = vadd.f32 %v6753_v11, %v6248_v1  ;;  %v11284_v37 = vpop.f32.mrb[141].mxu1  ;;  %v11286_v13 = vpop.f32.mrb[145].mxu0  ;;  %v10099_v1 = vld [vmem:[%s11466_s11 + $0x218] sm:$0xff]   ;;  %v10104_v11 = vld [vmem:[%s11466_s11 + $0x2a0] sm:$0xff]  }
0x2652   : > { %9311 = vmatpush3.bf16.msra.mxu1 %v10071_v31  ;;  %9333 = vmatpush3.bf16.msra.mxu0 %v10072_v32  ;;  %v6716_v38 = vpop.f32.mrb[142].mxu1  ;;  %v6757_v39 = vpop.f32.mrb[146].mxu0  ;;  %v10100_v31 = vld [vmem:[%s11466_s11 + $0x298] sm:$0xff]   ;;  %v10101_v32 = vld [vmem:[%s11466_s11 + $0x260] sm:$0xff]  }
0x2653   : > { %v6717_v46 = vpop.f32.mrb[143].mxu1  ;;  %v6758_v24 = vpop.f32.mrb[147].mxu0  ;;  %9312 = vmatprep.subr.bf16.mxu1 %v10073_v33  ;;  %9334 = vmatprep.subr.bf16.mxu0 %v10074_v34  ;;  %v10102_v33 = vld [vmem:[%s11466_s11 + $0x2e0] sm:$0xff]   ;;  %v10105_v38 = vld [vmem:[%s11466_s11 + $0x268] sm:$0xff]  }
0x2654   : > { %v10103_v34 = vld [vmem:[%s11466_s11 + $0x220] sm:$0xff]   ;;  %v10106_v39 = vld [vmem:[%s11466_s11 + $0x2e8] sm:$0xff]   ;;  %v6232_v46 = vrot.slane %v11272_v50, %v10759_v49  ;;  %v10110_v24 = vld [vmem:[%s11466_s11 + $0x2f0] sm:$0xff]  }
0x2655   : > { %v10113_v49 = vld [vmem:[%s11466_s11 + $0x278] sm:$0xff]  }
0x2656   : > { %9313 = vmatpush3.bf16.msra.mxu1 %v10075_v35  ;;  %9335 = vmatpush3.bf16.msra.mxu0 %v10076_v20  ;;  %v10107_v35 = vld [vmem:[%s11466_s11 + $0x228] sm:$0xff]   ;;  %v6224_v20 = vrot.slane %v11272_v50, %v10756_v48  ;;  %v10111_v48 = vld [vmem:[%s11466_s11 + $0x230] sm:$0xff]  }
0x2657   : > { %9314 = vmatprep.subr.bf16.mxu1 %v10077_v42  ;;  %9336 = vmatprep.subr.bf16.mxu0 %v10078_v43  ;;  %v6244_v42 = vrot.slane %v11272_v50, %v10779_v3  ;;  %v6252_v43 = vrot.slane %v11272_v50, %v10782_v4 }
0x2658   : > { %v6631_v14 = vadd.f32 %v11263_v18, %v6224_v20  ;;  %v10116_v18 = vld [vmem:[%s11466_s11 + $0x2b8] sm:$0xff]   ;;  %v6774_v20 = vmax.f32 %v11282_v36, 0.0  ;;  %v8822_v36 = vld [vmem:[%s11468_s0] ss:$0 sm:$0xff]  ;;  %s11469_s0 = sld [smem:[#allocation24_spill]] }
0x2659   : > { %v6715_v3 = vadd.f32 %v11284_v37, %v6244_v42  ;;  %v6756_v4 = vadd.f32 %v11286_v13, %v6252_v43  ;;  %v10119_v37 = vld [vmem:[%s11466_s11 + $0x300] sm:$0xff]  }
0x265a   : > { %9315 = vmatpush3.bf16.msra.mxu1 %v10079_v55  ;;  %9337 = vmatpush3.bf16.msra.mxu0 %v10080_v60  ;;  %v6672_v55 = vadd.f32 %v11265_v21, %v6232_v46  ;;  %v10114_v60 = vld [vmem:[%s11466_s11 + $0x2f8] sm:$0xff]   ;;  %v6768_v56 = vmax.f32 %v6631_v14, 0.0  ;;  %v10118_v21 = vld [vmem:[%s11466_s11 + $0x3c0] sm:$0xff]  }
0x265b   : > { %9316 = vmatprep.subr.bf16.mxu1 %v10081_v57  ;;  %9338 = vmatprep.subr.bf16.mxu0 %v10082_v58  ;;  %v10117_v57 = vld [vmem:[%s11466_s11 + $0x340] sm:$0xff]   ;;  %v6773_v51 = vmax.f32 %v6715_v3, 0.0  ;;  %v6775_v59 = vmax.f32 %v6756_v4, 0.0 }
0x265c   : > { %v6770_v58 = vmax.f32 %v6672_v55, 0.0  ;;  %v10120_v13 = vld [vmem:[%s11466_s11 + $0x380] sm:$0xff]  }
0x265d   : > { %v6789_v63 = vpack.c.bf16 %v6773_v51, %v6773_v51 }
0x265e   : > { %9317 = vmatpush3.bf16.msra.mxu1 %v10083_v52  ;;  %9339 = vmatpush3.bf16.msra.mxu0 %v10084_v61  ;;  %v6784_v52 = vpack.c.bf16 %v6768_v56, %v6768_v56  ;;  %v6786_v61 = vpack.c.bf16 %v6770_v58, %v6770_v58 }
0x265f   : > { %9346 = vmatprep.subr.bf16.mxu1 %v10085_v25  ;;  %9368 = vmatprep.subr.bf16.mxu0 %v10086_v53  ;;  %v10122_v25 = vld [vmem:[%s11466_s11 + $0x3c8] sm:$0xff]   ;;  %v6791_v53 = vpack.c.bf16 %v6775_v59, %v6775_v59 }
0x2661   : > { %7936 = vmatmul.mubr.bf16.vlgmr.msra.gmra.mrb[148].mxu1 %v6780_v8  ;;  %7976 = vmatmul.mubr.bf16.vlgmr.msra.gmra.mrb[152].mxu0 %v6782_v9  ;;  %v10126_v8 = vld [vmem:[%s11466_s11 + $0x3d0] sm:$0xff]  }
0x2662   : > { %9347 = vmatpush3.bf16.msra.mxu1 %v10087_v5  ;;  %8015 = vmatprep.mubr.bf16.mxu1 %v6785_v17  ;;  %v10125_v5 = vld [vmem:[%s11466_s11 + $0x350] sm:$0xff]   ;;  %v10129_v17 = vld [vmem:[%s11466_s11 + $0x358] sm:$0xff]  }
0x2663   : > { %9369 = vmatpush3.bf16.msra.mxu0 %v10088_v16  ;;  %8055 = vmatprep.mubr.bf16.mxu0 %v6787_v23  ;;  %v10127_v9 = vld [vmem:[%s11466_s11 + $0x310] sm:$0xff]   ;;  %v10132_v23 = vld [vmem:[%s11466_s11 + $0x398] sm:$0xff]  }
0x2664   : > { %9348 = vmatprep.subr.bf16.mxu1 %v10089_v47  ;;  %9370 = vmatprep.subr.bf16.mxu0 %v10090_v22  ;;  %v10128_v16 = vld [vmem:[%s11466_s11 + $0x390] sm:$0xff]   ;;  %v10130_v47 = vld [vmem:[%s11466_s11 + $0x3d8] sm:$0xff]  }
0x2665   : > { %v10131_v22 = vld [vmem:[%s11466_s11 + $0x318] sm:$0xff]  }
0x2666   : > { %9349 = vmatpush3.bf16.msra.mxu1 %v10091_v45  ;;  %v10133_v45 = vld [vmem:[%s11466_s11 + $0x360] sm:$0xff]  }
0x2667   : > { %9371 = vmatpush3.bf16.msra.mxu0 %v10092_v44  ;;  %9350 = vmatprep.subr.bf16.mxu1 %v10093_v10  ;;  %v10134_v44 = vld [vmem:[%s11466_s11 + $0x3e0] sm:$0xff]  }
0x2668   : > { %9372 = vmatprep.subr.bf16.mxu0 %v10094_v26  ;;  %v10135_v10 = vld [vmem:[%s11466_s11 + $0x320] sm:$0xff]  }
0x2669   : > { %v10136_v26 = vld [vmem:[%s11466_s11 + $0x3a0] sm:$0xff]  }
0x266a   : > { %9351 = vmatpush3.bf16.msra.mxu1 %v10095_v27  ;;  %v10137_v27 = vld [vmem:[%s11466_s11 + $0x368] sm:$0xff]  }
0x266b   : > { %9373 = vmatpush3.bf16.msra.mxu0 %v10096_v28  ;;  %9352 = vmatprep.subr.bf16.mxu1 %v10097_v29  ;;  %v10138_v28 = vld [vmem:[%s11466_s11 + $0x3e8] sm:$0xff]  }
0x266c   : > { %9374 = vmatprep.subr.bf16.mxu0 %v10098_v30  ;;  %v10139_v29 = vld [vmem:[%s11466_s11 + $0x328] sm:$0xff]   ;;  %v6240_v30 = vrot.slane %v11272_v50, %v10823_v7  ;;  %v10147_v7 = vld [vmem:[%s11466_s11 + $0x338] sm:$0xff]  }
0x266e   : > { %9353 = vmatpush3.bf16.msra.mxu1 %v10099_v1  ;;  %v10140_v1 = vld [vmem:[%s11466_s11 + $0x3a8] sm:$0xff]  }
0x266f   : > { %9375 = vmatpush3.bf16.msra.mxu0 %v10100_v31  ;;  %9354 = vmatprep.subr.bf16.mxu1 %v10101_v32  ;;  %v10141_v31 = vld [vmem:[%s11466_s11 + $0x370] sm:$0xff]  }
0x2670   : > { %9376 = vmatprep.subr.bf16.mxu0 %v10102_v33  ;;  %v10142_v32 = vld [vmem:[%s11466_s11 + $0x3f0] sm:$0xff]  }
0x2671   : > { %v10143_v33 = vld [vmem:[%s11466_s11 + $0x330] sm:$0xff]  }
0x2672   : > { %9355 = vmatpush3.bf16.msra.mxu1 %v10103_v34  ;;  %v6713_v34 = vadd.f32 %v11280_v6, %v6240_v30  ;;  %v6790_v6 = vpack.c.bf16 %v6774_v20, %v6774_v20 }
0x2673   : > { %9377 = vmatpush3.bf16.msra.mxu0 %v10104_v11  ;;  %9356 = vmatprep.subr.bf16.mxu1 %v10105_v38  ;;  %v10144_v11 = vld [vmem:[%s11466_s11 + $0x3b0] sm:$0xff]   ;;  %v10145_v38 = vld [vmem:[%s11466_s11 + $0x378] sm:$0xff]  }
0x2674   : > { %9378 = vmatprep.subr.bf16.mxu0 %v10106_v39  ;;  %v10146_v39 = vld [vmem:[%s11466_s11 + $0x3f8] sm:$0xff]   ;;  %v6772_v50 = vmax.f32 %v6713_v34, 0.0 }
0x2676   : > { %9357 = vmatpush3.bf16.msra.mxu1 %v10107_v35  ;;  %v10148_v35 = vld [vmem:[%s11466_s11 + $0x3b8] sm:$0xff]  }
0x2677   : > { %9379 = vmatpush3.bf16.msra.mxu0 %v10108_v40  ;;  %9358 = vmatprep.subr.bf16.mxu1 %v10109_v41  ;;  %v6788_v40 = vpack.c.bf16 %v6772_v50, %v6772_v50  ;;  %v10150_v50 = vld [vmem:[%s11469_s0 + $0x8] sm:$0xff]  }
0x2678   : > { %9380 = vmatprep.subr.bf16.mxu0 %v10110_v24 }
0x267a   : > { %9359 = vmatpush3.bf16.msra.mxu1 %v10111_v48 }
0x267b   : > { %9381 = vmatpush3.bf16.msra.mxu0 %v10112_v15  ;;  %9360 = vmatprep.subr.bf16.mxu1 %v10113_v49 }
0x267c   : > { %9382 = vmatprep.subr.bf16.mxu0 %v10114_v60 }
0x267e   : > { %9361 = vmatpush3.bf16.msra.mxu1 %v10115_v19 }
0x267f   : > { %9383 = vmatpush3.bf16.msra.mxu0 %v10116_v18  ;;  %9390 = vmatprep.subr.bf16.mxu1 %v10117_v57 }
0x2680   : > { %9412 = vmatprep.subr.bf16.mxu0 %v10118_v21 }
0x2681   : > { %8016 = vmatmul.mubr.bf16.vlgmr.msra.gmra.mrb[152].mxu1 %v6784_v52 }
0x2682   : > { %8056 = vmatmul.mubr.bf16.vlgmr.msra.gmra.mrb[156].mxu0 %v6786_v61  ;;  %9391 = vmatpush3.bf16.msra.mxu1 %v10119_v37 }
0x2683   : > { %8095 = vmatprep.mubr.bf16.mxu1 %v6789_v63  ;;  %9413 = vmatpush3.bf16.msra.mxu0 %v10120_v13 }
0x2684   : > { %8135 = vmatprep.mubr.bf16.mxu0 %v6791_v53  ;;  %9392 = vmatprep.subr.bf16.mxu1 %v10121_v62 }
0x2685   : > { %9414 = vmatprep.subr.bf16.mxu0 %v10122_v25 }
0x2686   : > { %9393 = vmatpush3.bf16.msra.mxu1 %v10123_v0 }
0x2687   : > { %9415 = vmatpush3.bf16.msra.mxu0 %v10124_v12  ;;  %9394 = vmatprep.subr.bf16.mxu1 %v10125_v5 }
0x2688   : > { %9416 = vmatprep.subr.bf16.mxu0 %v10126_v8 }
0x268a   : > { %9395 = vmatpush3.bf16.msra.mxu1 %v10127_v9 }
0x268b   : > { %9417 = vmatpush3.bf16.msra.mxu0 %v10128_v16  ;;  %9396 = vmatprep.subr.bf16.mxu1 %v10129_v17 }
0x268c   : > { %9418 = vmatprep.subr.bf16.mxu0 %v10130_v47 }
0x268e   : > { %9397 = vmatpush3.bf16.msra.mxu1 %v10131_v22 }
0x268f   : > { %9419 = vmatpush3.bf16.msra.mxu0 %v10132_v23  ;;  %9398 = vmatprep.subr.bf16.mxu1 %v10133_v45 }
0x2690   : > { %9420 = vmatprep.subr.bf16.mxu0 %v10134_v44 }
0x2692   : > { %9399 = vmatpush3.bf16.msra.mxu1 %v10135_v10 }
0x2693   : > { %9421 = vmatpush3.bf16.msra.mxu0 %v10136_v26  ;;  %9400 = vmatprep.subr.bf16.mxu1 %v10137_v27 }
0x2694   : > { %9422 = vmatprep.subr.bf16.mxu0 %v10138_v28 }
0x2696   : > { %9401 = vmatpush3.bf16.msra.mxu1 %v10139_v29 }
0x2697   : > { %9423 = vmatpush3.bf16.msra.mxu0 %v10140_v1  ;;  %9402 = vmatprep.subr.bf16.mxu1 %v10141_v31 }
0x2698   : > { %9424 = vmatprep.subr.bf16.mxu0 %v10142_v32 }
0x269a   : > { %9403 = vmatpush3.bf16.msra.mxu1 %v10143_v33 }
0x269b   : > { %9425 = vmatpush3.bf16.msra.mxu0 %v10144_v11  ;;  %9404 = vmatprep.subr.bf16.mxu1 %v10145_v38 }
0x269c   : > { %9426 = vmatprep.subr.bf16.mxu0 %v10146_v39 }
0x269e   : > { %9405 = vmatpush3.bf16.msra.mxu1 %v10147_v7  ;;  %v10149_v7 = vld [vmem:[%s11469_s0] sm:$0xff]  }
0x269f   : > { %9427 = vmatpush3.bf16.msra.mxu0 %v10148_v35  ;;  %9781 = vmatprep.subr.bf16.mxu1 %v10239_v2 }
0x26a0   : > { %9789 = vmatprep.subr.bf16.mxu0 %v10239_v2 }
0x26a1   : > { %8096 = vmatmul.mubr.bf16.vlgmr.msra.gmra.mrb[156].mxu1 %v6788_v40 }
0x26a2   : > { %8136 = vmatmul.mubr.bf16.vlgmr.msra.gmra.mrb[160].mxu0 %v6790_v6  ;;  %9785 = vmatprep.mubr.msk.bf16.mxu1 %vm10240_vm1, %v10239_v2  ;;  %v8951_v6 = vld [vmem:[%s11470_s1] ss:$0 sm:$0xff] }
0x26a3   : > { %9791 = vmatprep.mubr.msk.bf16.mxu0 %vm10240_vm1, %v10239_v2  ;;  %9782 = vmatpush3.bf16.msra.mxu1 %v10149_v7 }
0x26a4   : > { %9783 = vmatprep.subr.bf16.mxu1 %v10239_v2  ;;  %v10151_v2 = vld [vmem:[%s10435_s4] sm:$0xff]  }
0x26a5   : > { %9790 = vmatpush3.bf16.msra.mxu0 %v10151_v2 }
0x26a7   : > { %9784 = vmatpush3.bf16.msra.mxu1 %v10150_v50 }
0x2714   : > { %v9274_v41 = vpop.f32.mrb[144].mxu1  ;;  %v9296_v46 = vpop.f32.mrb[148].mxu0 }
0x2715   : > { %v9275_v24 = vpop.f32.mrb[145].mxu1  ;;  %v9297_v42 = vpop.f32.mrb[149].mxu0 }
0x2716   : > { %v9276_v43 = vadd.f32 %v9275_v24, %v9274_v41  ;;  %v9298_v48 = vadd.f32 %v9297_v42, %v9296_v46  ;;  %v9277_v14 = vpop.f32.mrb[146].mxu1  ;;  %v9299_v15 = vpop.f32.mrb[150].mxu0  ;;  %v8952_v46 = vld [vmem:[%s11471_s2] ss:$0 sm:$0xff]  ;;  %s1177_s2 = scalar_lea.vmem %s10443_s30, %s11473_s23 }
0x2717   : > { %v9278_v49 = vpop.f32.mrb[147].mxu1  ;;  %v9300_v55 = vpop.f32.mrb[151].mxu0  ;;  %v8178_v14 = vld [vmem:[%s10430_s6] sm:$0x1] }
0x2718   : > { %v7858_v60 = vadd.f32 %v9276_v43, %v8822_v36 }
0x271a   : > { %v7898_v3 = vadd.f32 %v9298_v48, %v7858_v60 }
0x2734   : > { %v9318_v4 = vpop.f32.mrb[148].mxu1  ;;  %v9340_v19 = vpop.f32.mrb[152].mxu0 }
0x2735   : > { %v9319_v56 = vpop.f32.mrb[149].mxu1  ;;  %v9341_v18 = vpop.f32.mrb[153].mxu0 }
0x2736   : > { %v9320_v57 = vadd.f32 %v9319_v56, %v9318_v4  ;;  %v9342_v58 = vadd.f32 %v9341_v18, %v9340_v19  ;;  %v9321_v21 = vpop.f32.mrb[150].mxu1  ;;  %v9343_v51 = vpop.f32.mrb[154].mxu0  ;;  %v8242_v56 = vld [vmem:[#allocation2] sm:$0x1] }
0x2737   : > { %v9322_v59 = vpop.f32.mrb[151].mxu1  ;;  %v9344_v37 = vpop.f32.mrb[155].mxu0 }
0x2738   : > { %v7938_v52 = vadd.f32 %v9320_v57, %v7898_v3 }
0x273a   : > { %v7978_v13 = vadd.f32 %v9342_v58, %v7938_v52 }
0x2754   : > { %v9362_v61 = vpop.f32.mrb[152].mxu1 }
0x2755   : > { %v9384_v62 = vpop.f32.mrb[156].mxu0  ;;  %v9363_v63 = vpop.f32.mrb[153].mxu1 }
0x2756   : > { %v9364_v25 = vadd.f32 %v9363_v63, %v9362_v61  ;;  %v9385_v53 = vpop.f32.mrb[157].mxu0  ;;  %v9365_v0 = vpop.f32.mrb[154].mxu1 }
0x2757   : > { %v9386_v12 = vadd.f32 %v9385_v53, %v9384_v62  ;;  %v9387_v5 = vpop.f32.mrb[158].mxu0  ;;  %v9366_v8 = vpop.f32.mrb[155].mxu1 }
0x2758   : > { %v8018_v9 = vadd.f32 %v9364_v25, %v7978_v13  ;;  %v9388_v16 = vpop.f32.mrb[159].mxu0 }
0x275a   : > { %v8058_v17 = vadd.f32 %v9386_v12, %v8018_v9 }
0x2774   : > { %v9406_v47 = vpop.f32.mrb[156].mxu1 }
0x2775   : > { %v9428_v22 = vpop.f32.mrb[160].mxu0  ;;  %v9407_v23 = vpop.f32.mrb[157].mxu1 }
0x2776   : > { %v9408_v45 = vadd.f32 %v9407_v23, %v9406_v47  ;;  %v9429_v44 = vpop.f32.mrb[161].mxu0  ;;  %v9409_v10 = vpop.f32.mrb[158].mxu1 }
0x2777   : > { %v9430_v26 = vadd.f32 %v9429_v44, %v9428_v22  ;;  %v9431_v27 = vpop.f32.mrb[162].mxu0  ;;  %v9410_v28 = vpop.f32.mrb[159].mxu1 }
0x2778   : > { %v8098_v29 = vadd.f32 %v9408_v45, %v8058_v17  ;;  %v9432_v30 = vpop.f32.mrb[163].mxu0 }
0x277a   : > { %v8138_v1 = vadd.f32 %v9430_v26, %v8098_v29 }
0x277c   : > { %v8143_v31 = vadd.f32 %v8138_v1, %v11154_v54 }
0x277e   : > { %v8146_v32 = vsel %vm1261_vm3, %v8143_v31, 0.0 }
0x277f   : > { %8147 = vadd.xlane.f32.xlu0 %v8146_v32 }
0x280c   : > { %v8148_v33 = vpop.xlane.xlu0 %8147 }
0x280d   : > { %v8149_v34 = vmul.f32 0.03125, %v8148_v33 }
0x280f   : > { %v8150_v11 = vsub.f32 %v8143_v31, %v8149_v34 }
0x2811   : > { %v8151_v38 = vmul.f32 %v8150_v11, %v8150_v11 }
0x2813   : > { %v8152_v39 = vsel %vm1261_vm3, %v8151_v38, 0.0 }
0x2814   : > { %8153 = vadd.xlane.f32.xlu1 %v8152_v39 }
0x28a1   : > { %v8154_v54 = vpop.xlane.xlu1 %8153 }
0x28a2   : > { %v8155_v35 = vmul.f32 0.03125, %v8154_v54 }
0x28a4   : > { %v8156_v20 = vadd.f32 1e-05, %v8155_v35 }
0x28a6   : > { %10190 = vrsqrt.f32 %v8156_v20 }
0x28b0   : > { %v10191_v40 = vpop.eup %10190 }
0x28b1   : > { %v8158_v41 = vmul.f32 %v10191_v40, %v8150_v11 }
0x28b3   : > { %v8165_v36 = vmul.f32 %v8951_v6, %v8158_v41 }
0x28b5   : > { %v8172_v24 = vadd.f32 %v8952_v46, %v8165_v36 }
0x28b7   : > { %v8173_v42 = vpack.c.bf16 %v8172_v24, %v8172_v24 }
0x28b9   : > { %v8180_v43 = vshrl.u32 %v8173_v42, 16 }
0x28bb   : > { %v8182_v48 = vrot.slane %v8180_v43, 3 }
0x28bd   : > { %9786 = vmatmul.mubr.msk.bf16.vlgmr.msra.gmra.mrb[160].mxu1 %vm1261_vm3, %v8182_v48 }
0x2990   : > { %v8232_v15 = vpop.f32.mrb[160].mxu1 }
0x2991   : > { %v8233_v49 = vadd.f32 %v8232_v15, %v8178_v14  ;;  %v9787_v55 = vpop.f32.mrb[161].mxu1 }
0x2992   : > { %v8235_v60 = vpop.f32.mrb[162].mxu1 }
0x2993   : > { %v8238_v3 = vmax.f32 %v8233_v49, 0.0  ;;  %v9788_v4 = vpop.f32.mrb[163].mxu1 }
0x2995   : > { %v8239_v19 = vpack.c.bf16 %v8238_v3, %v8238_v3 }
0x2997   : > { %9792 = vmatmul.mubr.msk.bf16.vlgmr.msra.gmra.mrb[164].mxu0 %vm8249_vm6, %v8239_v19 }
0x2a6a   : > { %v8287_v18 = vpop.f32.mrb[164].mxu0 }
0x2a6b   : > { %v8288_v57 = vadd.f32 %v8287_v18, %v8242_v56  ;;  %v9793_v58 = vpop.f32.mrb[165].mxu0 }
0x2a6c   : > { %v8290_v21 = vpop.f32.mrb[166].mxu0 }
0x2a6d   : > { %8294 = vst.msk [vmem:[%s1177_s2] sm:$0x1] %vm8293_vm7, %v8288_v57  ;;  %v9794_v51 = vpop.f32.mrb[167].mxu0 }
0x2a6e PF: > { %s91_s22 = sadd.s32 1, %s10198_s22  }
0x2a6f   : > { %p88_p4 = scmp.ge.s32.totalorder %s91_s22, 4  }
0x2a71   :  { %90 = sbr.rel (!%p88_p4) target bundleno = 73 (0x49), region = 287 }

</bundles_post_ra>
